<compile_context>
chip_gen: v5e
topology: v5e:2x2
jax: 0.10.0
libtpu: 0.0.40
codegen_flags: <defaults>
</compile_context>

<pallas_src>
import functools

import jax
import jax.numpy as jnp
from jax.experimental import pallas as pl
from jax.experimental.pallas import tpu as pltpu

LANE = 128          # channel axes are padded to a multiple of the TPU lane width
_BN_EPS = 1e-5

_CPARAMS = pltpu.CompilerParams(
    dimension_semantics=("parallel",),       # batch grid axis -> both TCs on v7x
    vmem_limit_bytes=32 * 1024 * 1024,       # explicit budget (v7x has 64 MiB VMEM)
)


def _rup(x, m):
    return (x + m - 1) // m * m


# ------------------------------ Pallas kernels ------------------------------ #

def _upconv_kernel(x_ref, w_ref, b_ref, o_ref):
    """ConvTranspose2d(k=2, s=2) for one image as a single lane-dense matmul.

    x_ref: (H*W, CPin)    bf16  flattened NHWC pixels, channels zero-padded
    w_ref: (CPin, 4*CPh)  bf16  tap-major packed weight (resident)
    b_ref: (1, 4*CPh)     f32   bias replicated per 2x2 tap
    o_ref: (H*W, 4*CPh)   bf16  per-pixel 2x2 output taps
    """
    y = jnp.dot(x_ref[...], w_ref[...], preferred_element_type=jnp.float32)
    o_ref[...] = (y + b_ref[...]).astype(o_ref.dtype)


def _conv_relu_kernel(x_ref, w_ref, b_ref, o_ref, *, width, hout):
    """3x3 valid conv + bias + ReLU with im2col fused (9 tap matmuls).

    x_ref rows are r = h*width + w (+2 zero halo rows).  The output keeps the
    full width; columns w >= width-2 are junk that the next stage never reads
    for its valid outputs.  Pad rows of the output block are zeroed.
    """
    rows = hout * width
    co = o_ref.shape[-1]
    acc = jnp.zeros((rows, co), jnp.float32)
    for t in range(9):                                   # statically unrolled taps
        off = (t // 3) * width + (t % 3)
        acc = acc + jnp.dot(x_ref[off:off + rows, :], w_ref[t],
                            preferred_element_type=jnp.float32)
    y = jnp.maximum(acc + b_ref[...], 0.0).astype(o_ref.dtype)
    o_ref[0:rows, :] = y
    if o_ref.shape[0] > rows:                            # zero halo rows for next conv
        o_ref[rows:, :] = jnp.zeros((o_ref.shape[0] - rows, co), o_ref.dtype)


def _conv_stats_kernel(x_ref, w_ref, o_ref, stat_ref, *, width, hout, wout):
    """3x3 valid conv (bias dropped: cancelled by BN) + per-image BN partials.

    o_ref:    (hout*width, C) f32  pre-BN conv output (junk at columns >= wout)
    stat_ref: (2, C)          f32  [sum, sum-of-squares] over *valid* columns
    """
    rows = hout * width
    co = o_ref.shape[-1]
    acc = jnp.zeros((rows, co), jnp.float32)
    for t in range(9):
        off = (t // 3) * width + (t % 3)
        acc = acc + jnp.dot(x_ref[off:off + rows, :], w_ref[t],
                            preferred_element_type=jnp.float32)
    o_ref[...] = acc
    col = jax.lax.broadcasted_iota(jnp.int32, (rows, 1), 0) % width
    valid = (col < wout).astype(jnp.float32)             # mask junk columns
    av = acc * valid
    stat_ref[0:1, :] = jnp.sum(av, axis=0, keepdims=True)
    stat_ref[1:2, :] = jnp.sum(av * acc, axis=0, keepdims=True)


def _bn_relu_kernel(y_ref, stats_ref, g_ref, b_ref, o_ref, *, count):
    """BatchNorm2d (training batch stats, biased variance) + ReLU for one image."""
    s = jnp.sum(stats_ref[...], axis=0)                  # (2, C): reduce partials
    inv_n = 1.0 / count
    mean = s[0:1, :] * inv_n
    var = jnp.maximum(s[1:2, :] * inv_n - mean * mean, 0.0)
    inv = jax.lax.rsqrt(var + _BN_EPS)
    o_ref[...] = jnp.maximum(
        (y_ref[...] - mean) * inv * g_ref[...] + b_ref[...], 0.0)


# ------------------------------ weight packing ------------------------------ #

def _pack_w_up(w, cp_in, cp_h):
    """ConvTranspose2d weight (Cin, Ch, 2, 2) -> (cp_in, 4*cp_h), tap-major cols."""
    cin, ch = w.shape[0], w.shape[1]
    wt = jnp.transpose(w, (2, 3, 0, 1))                           # (2,2,Cin,Ch)
    wt = jnp.pad(wt, ((0, 0), (0, 0), (0, cp_in - cin), (0, cp_h - ch)))
    return jnp.transpose(wt, (2, 0, 1, 3)).reshape(cp_in, 4 * cp_h)


def _pack_w_conv(w, cp_in, cp_out):
    """Conv2d weight (Cout, Cin, 3, 3) -> (9, cp_in, cp_out), one slab per tap."""
    cout, cin = w.shape[0], w.shape[1]
    wt = jnp.transpose(w, (2, 3, 1, 0))                           # (3,3,Cin,Cout)
    wt = jnp.pad(wt, ((0, 0), (0, 0), (0, cp_in - cin), (0, cp_out - cout)))
    return wt.reshape(9, cp_in, cp_out)


def _pad_row(v, cp):
    return jnp.pad(v, (0, cp - v.shape[0])).reshape(1, cp)


# --------------------------------- forward ---------------------------------- #

@jax.jit
def upstep_forward(x, x_down, params):
    N, Cin, H, W = x.shape
    Ch = Cin // 2
    H0, W0 = 2 * H, 2 * W                 # size after transpose conv / concat
    H1, H2, W2 = H0 - 2, H0 - 4, W0 - 4   # valid sizes after conv1 / conv2
    CP_in = _rup(Cin, LANE)               # padded concat (= conv1 input) channels
    CP_h = _rup(Ch, LANE)                 # padded half channels (conv outputs)
    bf16 = jnp.bfloat16

    # ---- ConvTranspose2d(Cin, Ch, 2, stride=2): one matmul per image --------
    x_rows = jnp.transpose(x, (0, 2, 3, 1)).reshape(N, H * W, Cin)
    x_rows = jnp.pad(x_rows, ((0, 0), (0, 0), (0, CP_in - Cin))).astype(bf16)
    w_up = _pack_w_up(params["w_up"], CP_in, CP_h).astype(bf16)
    b_up = jnp.tile(jnp.pad(params["b_up"], (0, CP_h - Ch)), 4).reshape(1, 4 * CP_h)

    up = pl.pallas_call(
        _upconv_kernel,
        out_shape=jax.ShapeDtypeStruct((N, H * W, 4 * CP_h), bf16),
        grid=(N,),
        in_specs=[
            pl.BlockSpec((None, H * W, CP_in), lambda n: (n, 0, 0)),
            pl.BlockSpec((CP_in, 4 * CP_h), lambda n: (0, 0)),     # resident
            pl.BlockSpec((1, 4 * CP_h), lambda n: (0, 0)),
        ],
        out_specs=pl.BlockSpec((None, H * W, 4 * CP_h), lambda n: (n, 0, 0)),
        compiler_params=_CPARAMS,
    )(x_rows, w_up, b_up)

    # scatter the 2x2 taps into the 2x-upsampled image, then torch.cat along
    # channels (layout glue only; channel axis stays the padded lane axis).
    up = up.reshape(N, H, W, 2, 2, CP_h).transpose(0, 1, 3, 2, 4, 5)
    up = up.reshape(N, H0, W0, CP_h)[..., :Ch]
    xd = jnp.transpose(x_down, (0, 2, 3, 1)).astype(bf16)
    cat = jnp.pad(jnp.concatenate([up, xd], axis=-1),
                  ((0, 0), (0, 0), (0, 0), (0, CP_in - Cin)))

    # flattened same-width strips; +2 zero halo rows so tap (2,2) never reads OOB
    R0p = _rup(H0 * W0 + 2, 8)
    cat = jnp.pad(cat.reshape(N, H0 * W0, CP_in), ((0, 0), (0, R0p - H0 * W0), (0, 0)))

    # ---- conv1 3x3 + ReLU (im2col fused as 9 tap matmuls) --------------------
    R1 = H1 * W0
    R1p = _rup(R1 + 2, 8)
    w1 = _pack_w_conv(params["w1"], CP_in, CP_h).astype(bf16)
    b1 = _pad_row(params["b1"], CP_h)
    y1 = pl.pallas_call(
        functools.partial(_conv_relu_kernel, width=W0, hout=H1),
        out_shape=jax.ShapeDtypeStruct((N, R1p, CP_h), bf16),
        grid=(N,),
        in_specs=[
            pl.BlockSpec((None, R0p, CP_in), lambda n: (n, 0, 0)),
            pl.BlockSpec((9, CP_in, CP_h), lambda n: (0, 0, 0)),   # resident
            pl.BlockSpec((1, CP_h), lambda n: (0, 0)),
        ],
        out_specs=pl.BlockSpec((None, R1p, CP_h), lambda n: (n, 0, 0)),
        compiler_params=_CPARAMS,
    )(cat, w1, b1)

    # ---- conv2 3x3 (no bias: cancelled by BN) + per-image BN partial stats ---
    R2 = H2 * W0
    w2 = _pack_w_conv(params["w2"], CP_h, CP_h).astype(bf16)
    y2, stats = pl.pallas_call(
        functools.partial(_conv_stats_kernel, width=W0, hout=H2, wout=W2),
        out_shape=(jax.ShapeDtypeStruct((N, R2, CP_h), jnp.float32),
                   jax.ShapeDtypeStruct((N, 2, CP_h), jnp.float32)),
        grid=(N,),
        in_specs=[
            pl.BlockSpec((None, R1p, CP_h), lambda n: (n, 0, 0)),
            pl.BlockSpec((9, CP_h, CP_h), lambda n: (0, 0, 0)),    # resident
        ],
        out_specs=(pl.BlockSpec((None, R2, CP_h), lambda n: (n, 0, 0)),
                   pl.BlockSpec((None, 2, CP_h), lambda n: (n, 0, 0))),
        compiler_params=_CPARAMS,
    )(y1, w2)

    # ---- BatchNorm2d (batch statistics, training mode) + ReLU ----------------
    gamma = _pad_row(params["gamma"], CP_h)
    beta = _pad_row(params["beta"], CP_h)
    out = pl.pallas_call(
        functools.partial(_bn_relu_kernel, count=float(N * H2 * W2)),
        out_shape=jax.ShapeDtypeStruct((N, R2, CP_h), jnp.float32),
        grid=(N,),
        in_specs=[
            pl.BlockSpec((None, R2, CP_h), lambda n: (n, 0, 0)),
            pl.BlockSpec((N, 2, CP_h), lambda n: (0, 0, 0)),       # all partials, resident
            pl.BlockSpec((1, CP_h), lambda n: (0, 0)),
            pl.BlockSpec((1, CP_h), lambda n: (0, 0)),
        ],
        out_specs=pl.BlockSpec((None, R2, CP_h), lambda n: (n, 0, 0)),
        compiler_params=_CPARAMS,
    )(y2, stats, gamma, beta)

    # strip junk columns / padded channels, back to NCHW
    out = out.reshape(N, H2, W0, CP_h)[:, :, :W2, :Ch]
    return jnp.transpose(out, (0, 3, 1, 2))


# ------------------------------ params & ref --------------------------------- #

def init_params(key, cin):
    """PyTorch-default-style uniform init for upStep(input_channel=cin)."""
    ch = cin // 2
    ks = jax.random.split(key, 6)
    bu = 1.0 / (cin * 4) ** 0.5
    b1 = 1.0 / (cin * 9) ** 0.5
    b2 = 1.0 / (ch * 9) ** 0.5
    u = jax.random.uniform
    return dict(
        w_up=u(ks[0], (cin, ch, 2, 2), jnp.float32, -bu, bu),   # ConvTranspose2d (I,O,kh,kw)
        b_up=u(ks[1], (ch,), jnp.float32, -bu, bu),
        w1=u(ks[2], (ch, cin, 3, 3), jnp.float32, -b1, b1),     # Conv2d (O,I,kh,kw)
        b1=u(ks[3], (ch,), jnp.float32, -b1, b1),
        w2=u(ks[4], (ch, ch, 3, 3), jnp.float32, -b2, b2),
        b2=u(ks[5], (ch,), jnp.float32, -b2, b2),
        gamma=jnp.ones((ch,), jnp.float32),                     # BatchNorm2d defaults
        beta=jnp.zeros((ch,), jnp.float32),
    )


def _reference(x, x_down, p):
    """Pure-JAX f32 reference of upStep.forward (BatchNorm2d in training mode)."""
    N, Cin, H, W = x.shape
    Ch = Cin // 2
    hp = jax.lax.Precision.HIGHEST
    up = jnp.einsum("nchw,cdij->ndhwij", x, p["w_up"], precision=hp)
    up = up + p["b_up"][None, :, None, None, None, None]
    up = jnp.transpose(up, (0, 1, 2, 4, 3, 5)).reshape(N, Ch, 2 * H, 2 * W)
    z = jnp.concatenate([up, x_down], axis=1)

    def conv(a, w, b):
        y = jax.lax.conv_general_dilated(
            a, w, (1, 1), "VALID",
            dimension_numbers=("NCHW", "OIHW", "NCHW"), precision=hp)
        return y + b[None, :, None, None]

    y = jax.nn.relu(conv(z, p["w1"], p["b1"]))
    y = conv(y, p["w2"], p["b2"])
    mean = y.mean(axis=(0, 2, 3), keepdims=True)
    var = y.var(axis=(0, 2, 3), keepdims=True)
    y = (y - mean) * jax.lax.rsqrt(var + _BN_EPS)
    y = y * p["gamma"][None, :, None, None] + p["beta"][None, :, None, None]
    return jax.nn.relu(y)


# ---------------------------------- main ------------------------------------- #

if __name__ == "__main__":
    key = jax.random.PRNGKey(0)
    kx, kd, kp = jax.random.split(key, 3)

    # upStep(input_channel=8): x (2, 8, 8, 8), skip connection x_down (2, 4, 16, 16)
    N, Cin, H, W = 2, 8, 8, 8
    Ch = Cin // 2
    x = jax.random.normal(kx, (N, Cin, H, W), jnp.float32)
    x_down = jax.random.normal(kd, (N, Ch, 2 * H, 2 * W), jnp.float32)
    params = init_params(kp, Cin)

    out = jax.block_until_ready(upstep_forward(x, x_down, params))
    assert out.shape == (N, Ch, 2 * H - 4, 2 * W - 4), out.shape

    ref = jax.block_until_ready(_reference(x, x_down, params))
    err = float(jnp.max(jnp.abs(out - ref)))
    # bf16 MXU operands (f32 accumulation) -> ~1e-2 absolute error after BN
    if not jnp.allclose(out, ref, atol=5e-2, rtol=5e-2):
        raise AssertionError(f"mismatch vs reference: max abs err = {err}")
    print("KERNEL_OK")
</pallas_src>

<mosaic_0001>
module attributes {stable_mosaic.version = 11 : i64} {
  func.func @_upconv_kernel(%arg0: i32, %arg1: memref<1x64x128xbf16, #tpu.memory_space<vmem>>, %arg2: memref<128x512xbf16, #tpu.memory_space<vmem>>, %arg3: memref<1x512xf32, #tpu.memory_space<vmem>>, %arg4: memref<1x64x512xbf16, #tpu.memory_space<vmem>>) attributes {dimension_semantics = [#tpu.dimension_semantics<parallel>], iteration_bounds = array<i64: 2>, scalar_prefetch = 0 : i64, scratch_operands = 0 : i64, tpu.core_type = #tpu.core_type<tc>, window_params = [{transform_indices = @transform_0, window_bounds = array<i64: 1, 64, 128>}, {pipeline_mode = #tpu.pipeline_mode<synchronous>, transform_indices = @transform_1, window_bounds = array<i64: 128, 512>}, {pipeline_mode = #tpu.pipeline_mode<synchronous>, transform_indices = @transform_2, window_bounds = array<i64: 1, 512>}, {transform_indices = @transform_3, window_bounds = array<i64: 1, 64, 512>}]} {
    %c0 = arith.constant 0 : index
    %c0_0 = arith.constant 0 : index
    %c0_1 = arith.constant 0 : index
    %0 = vector.load %arg1[%c0, %c0_0, %c0_1] : memref<1x64x128xbf16, #tpu.memory_space<vmem>>, vector<1x64x128xbf16>
    %1 = vector.shape_cast %0 : vector<1x64x128xbf16> to vector<64x128xbf16>
    %c0_2 = arith.constant 0 : index
    %c0_3 = arith.constant 0 : index
    %2 = vector.load %arg2[%c0_2, %c0_3] : memref<128x512xbf16, #tpu.memory_space<vmem>>, vector<128x512xbf16>
    %cst = arith.constant dense<0.000000e+00> : vector<64x512xf32>
    %3 = tpu.matmul %1, %2, %cst {dimension_numbers = #tpu.dot_dimension_numbers<[1], [0], [0], [1], [0, 0, 1, 1], [], []>} : vector<64x128xbf16>, vector<128x512xbf16>, vector<64x512xf32> -> vector<64x512xf32>
    %c0_4 = arith.constant 0 : index
    %c0_5 = arith.constant 0 : index
    %4 = vector.load %arg3[%c0_4, %c0_5] : memref<1x512xf32, #tpu.memory_space<vmem>>, vector<1x512xf32>
    %5 = vector.broadcast %4 : vector<1x512xf32> to vector<64x512xf32>
    %6 = arith.addf %3, %5 : vector<64x512xf32>
    %7 = arith.truncf %6 : vector<64x512xf32> to vector<64x512xbf16>
    %c0_6 = arith.constant 0 : index
    %c0_7 = arith.constant 0 : index
    %c0_8 = arith.constant 0 : index
    %8 = vector.load %arg4[%c0_6, %c0_7, %c0_8] : memref<1x64x512xbf16, #tpu.memory_space<vmem>>, vector<1x64x512xbf16>
    %9 = vector.shape_cast %8 : vector<1x64x512xbf16> to vector<64x512xbf16>
    %10 = vector.shape_cast %7 : vector<64x512xbf16> to vector<1x64x512xbf16>
    tpu.vector_store %arg4[%c0_6, %c0_7, %c0_8], %10 {strides = array<i32>} : memref<1x64x512xbf16, #tpu.memory_space<vmem>>, vector<1x64x512xbf16>,
    return
  }
  func.func @transform_0(%arg0: i32) -> (i32, i32, i32) {
    %c0_i32 = arith.constant 0 : i32
    %c0_i32_0 = arith.constant 0 : i32
    %c0_i32_1 = arith.constant 0 : i32
    return %arg0, %c0_i32, %c0_i32_0 : i32, i32, i32
  }
  func.func @transform_1(%arg0: i32) -> (i32, i32) {
    %c0_i32 = arith.constant 0 : i32
    %c0_i32_0 = arith.constant 0 : i32
    %c0_i32_1 = arith.constant 0 : i32
    return %c0_i32, %c0_i32_0 : i32, i32
  }
  func.func @transform_2(%arg0: i32) -> (i32, i32) {
    %c0_i32 = arith.constant 0 : i32
    %c0_i32_0 = arith.constant 0 : i32
    %c0_i32_1 = arith.constant 0 : i32
    return %c0_i32, %c0_i32_0 : i32, i32
  }
  func.func @transform_3(%arg0: i32) -> (i32, i32, i32) {
    %c0_i32 = arith.constant 0 : i32
    %c0_i32_0 = arith.constant 0 : i32
    %c0_i32_1 = arith.constant 0 : i32
    return %arg0, %c0_i32, %c0_i32_0 : i32, i32, i32
  }
}

module attributes {stable_mosaic.version = 11 : i64} {
  func.func @_conv_relu_kernel(%arg0: i32, %arg1: memref<1x264x128xbf16, #tpu.memory_space<vmem>>, %arg2: memref<9x128x128xbf16, #tpu.memory_space<vmem>>, %arg3: memref<1x128xf32, #tpu.memory_space<vmem>>, %arg4: memref<1x232x128xbf16, #tpu.memory_space<vmem>>) attributes {dimension_semantics = [#tpu.dimension_semantics<parallel>], iteration_bounds = array<i64: 2>, scalar_prefetch = 0 : i64, scratch_operands = 0 : i64, tpu.core_type = #tpu.core_type<tc>, window_params = [{transform_indices = @transform_0, window_bounds = array<i64: 1, 264, 128>}, {pipeline_mode = #tpu.pipeline_mode<synchronous>, transform_indices = @transform_1, window_bounds = array<i64: 9, 128, 128>}, {pipeline_mode = #tpu.pipeline_mode<synchronous>, transform_indices = @transform_2, window_bounds = array<i64: 1, 128>}, {transform_indices = @transform_3, window_bounds = array<i64: 1, 232, 128>}]} {
    %cst = arith.constant 0.000000e+00 : f32
    %0 = vector.broadcast %cst : f32 to vector<224x128xf32>
    %c0 = arith.constant 0 : index
    %c0_0 = arith.constant 0 : index
    %c0_1 = arith.constant 0 : index
    %1 = vector.load %arg1[%c0, %c0_0, %c0_1] : memref<1x264x128xbf16, #tpu.memory_space<vmem>>, vector<1x224x128xbf16>
    %2 = vector.shape_cast %1 : vector<1x224x128xbf16> to vector<224x128xbf16>
    %c0_2 = arith.constant 0 : index
    %c0_3 = arith.constant 0 : index
    %c0_4 = arith.constant 0 : index
    %3 = vector.load %arg2[%c0_2, %c0_3, %c0_4] : memref<9x128x128xbf16, #tpu.memory_space<vmem>>, vector<1x128x128xbf16>
    %4 = vector.shape_cast %3 : vector<1x128x128xbf16> to vector<128x128xbf16>
    %cst_5 = arith.constant dense<0.000000e+00> : vector<224x128xf32>
    %5 = tpu.matmul %2, %4, %cst_5 {dimension_numbers = #tpu.dot_dimension_numbers<[1], [0], [0], [1], [0, 0, 1, 1], [], []>} : vector<224x128xbf16>, vector<128x128xbf16>, vector<224x128xf32> -> vector<224x128xf32>
    %6 = arith.addf %0, %5 : vector<224x128xf32>
    %c0_6 = arith.constant 0 : index
    %c1 = arith.constant 1 : index
    %c0_7 = arith.constant 0 : index
    %7 = vector.load %arg1[%c0_6, %c1, %c0_7] : memref<1x264x128xbf16, #tpu.memory_space<vmem>>, vector<1x224x128xbf16>
    %8 = vector.shape_cast %7 : vector<1x224x128xbf16> to vector<224x128xbf16>
    %c1_8 = arith.constant 1 : index
    %c0_9 = arith.constant 0 : index
    %c0_10 = arith.constant 0 : index
    %9 = vector.load %arg2[%c1_8, %c0_9, %c0_10] : memref<9x128x128xbf16, #tpu.memory_space<vmem>>, vector<1x128x128xbf16>
    %10 = vector.shape_cast %9 : vector<1x128x128xbf16> to vector<128x128xbf16>
    %cst_11 = arith.constant dense<0.000000e+00> : vector<224x128xf32>
    %11 = tpu.matmul %8, %10, %cst_11 {dimension_numbers = #tpu.dot_dimension_numbers<[1], [0], [0], [1], [0, 0, 1, 1], [], []>} : vector<224x128xbf16>, vector<128x128xbf16>, vector<224x128xf32> -> vector<224x128xf32>
    %12 = arith.addf %6, %11 : vector<224x128xf32>
    %c0_12 = arith.constant 0 : index
    %c2 = arith.constant 2 : index
    %c0_13 = arith.constant 0 : index
    %13 = vector.load %arg1[%c0_12, %c2, %c0_13] : memref<1x264x128xbf16, #tpu.memory_space<vmem>>, vector<1x224x128xbf16>
    %14 = vector.shape_cast %13 : vector<1x224x128xbf16> to vector<224x128xbf16>
    %c2_14 = arith.constant 2 : index
    %c0_15 = arith.constant 0 : index
    %c0_16 = arith.constant 0 : index
    %15 = vector.load %arg2[%c2_14, %c0_15, %c0_16] : memref<9x128x128xbf16, #tpu.memory_space<vmem>>, vector<1x128x128xbf16>
    %16 = vector.shape_cast %15 : vector<1x128x128xbf16> to vector<128x128xbf16>
    %cst_17 = arith.constant dense<0.000000e+00> : vector<224x128xf32>
    %17 = tpu.matmul %14, %16, %cst_17 {dimension_numbers = #tpu.dot_dimension_numbers<[1], [0], [0], [1], [0, 0, 1, 1], [], []>} : vector<224x128xbf16>, vector<128x128xbf16>, vector<224x128xf32> -> vector<224x128xf32>
    %18 = arith.addf %12, %17 : vector<224x128xf32>
    %c0_18 = arith.constant 0 : index
    %c16 = arith.constant 16 : index
    %c0_19 = arith.constant 0 : index
    %19 = vector.load %arg1[%c0_18, %c16, %c0_19] : memref<1x264x128xbf16, #tpu.memory_space<vmem>>, vector<1x224x128xbf16>
    %20 = vector.shape_cast %19 : vector<1x224x128xbf16> to vector<224x128xbf16>
    %c3 = arith.constant 3 : index
    %c0_20 = arith.constant 0 : index
    %c0_21 = arith.constant 0 : index
    %21 = vector.load %arg2[%c3, %c0_20, %c0_21] : memref<9x128x128xbf16, #tpu.memory_space<vmem>>, vector<1x128x128xbf16>
    %22 = vector.shape_cast %21 : vector<1x128x128xbf16> to vector<128x128xbf16>
    %cst_22 = arith.constant dense<0.000000e+00> : vector<224x128xf32>
    %23 = tpu.matmul %20, %22, %cst_22 {dimension_numbers = #tpu.dot_dimension_numbers<[1], [0], [0], [1], [0, 0, 1, 1], [], []>} : vector<224x128xbf16>, vector<128x128xbf16>, vector<224x128xf32> -> vector<224x128xf32>
    %24 = arith.addf %18, %23 : vector<224x128xf32>
    %c0_23 = arith.constant 0 : index
    %c17 = arith.constant 17 : index
    %c0_24 = arith.constant 0 : index
    %25 = vector.load %arg1[%c0_23, %c17, %c0_24] : memref<1x264x128xbf16, #tpu.memory_space<vmem>>, vector<1x224x128xbf16>
    %26 = vector.shape_cast %25 : vector<1x224x128xbf16> to vector<224x128xbf16>
    %c4 = arith.constant 4 : index
    %c0_25 = arith.constant 0 : index
    %c0_26 = arith.constant 0 : index
    %27 = vector.load %arg2[%c4, %c0_25, %c0_26] : memref<9x128x128xbf16, #tpu.memory_space<vmem>>, vector<1x128x128xbf16>
    %28 = vector.shape_cast %27 : vector<1x128x128xbf16> to vector<128x128xbf16>
    %cst_27 = arith.constant dense<0.000000e+00> : vector<224x128xf32>
    %29 = tpu.matmul %26, %28, %cst_27 {dimension_numbers = #tpu.dot_dimension_numbers<[1], [0], [0], [1], [0, 0, 1, 1], [], []>} : vector<224x128xbf16>, vector<128x128xbf16>, vector<224x128xf32> -> vector<224x128xf32>
    %30 = arith.addf %24, %29 : vector<224x128xf32>
    %c0_28 = arith.constant 0 : index
    %c18 = arith.constant 18 : index
    %c0_29 = arith.constant 0 : index
    %31 = vector.load %arg1[%c0_28, %c18, %c0_29] : memref<1x264x128xbf16, #tpu.memory_space<vmem>>, vector<1x224x128xbf16>
    %32 = vector.shape_cast %31 : vector<1x224x128xbf16> to vector<224x128xbf16>
    %c5 = arith.constant 5 : index
    %c0_30 = arith.constant 0 : index
    %c0_31 = arith.constant 0 : index
    %33 = vector.load %arg2[%c5, %c0_30, %c0_31] : memref<9x128x128xbf16, #tpu.memory_space<vmem>>, vector<1x128x128xbf16>
    %34 = vector.shape_cast %33 : vector<1x128x128xbf16> to vector<128x128xbf16>
    %cst_32 = arith.constant dense<0.000000e+00> : vector<224x128xf32>
    %35 = tpu.matmul %32, %34, %cst_32 {dimension_numbers = #tpu.dot_dimension_numbers<[1], [0], [0], [1], [0, 0, 1, 1], [], []>} : vector<224x128xbf16>, vector<128x128xbf16>, vector<224x128xf32> -> vector<224x128xf32>
    %36 = arith.addf %30, %35 : vector<224x128xf32>
    %c0_33 = arith.constant 0 : index
    %c32 = arith.constant 32 : index
    %c0_34 = arith.constant 0 : index
    %37 = vector.load %arg1[%c0_33, %c32, %c0_34] : memref<1x264x128xbf16, #tpu.memory_space<vmem>>, vector<1x224x128xbf16>
    %38 = vector.shape_cast %37 : vector<1x224x128xbf16> to vector<224x128xbf16>
    %c6 = arith.constant 6 : index
    %c0_35 = arith.constant 0 : index
    %c0_36 = arith.constant 0 : index
    %39 = vector.load %arg2[%c6, %c0_35, %c0_36] : memref<9x128x128xbf16, #tpu.memory_space<vmem>>, vector<1x128x128xbf16>
    %40 = vector.shape_cast %39 : vector<1x128x128xbf16> to vector<128x128xbf16>
    %cst_37 = arith.constant dense<0.000000e+00> : vector<224x128xf32>
    %41 = tpu.matmul %38, %40, %cst_37 {dimension_numbers = #tpu.dot_dimension_numbers<[1], [0], [0], [1], [0, 0, 1, 1], [], []>} : vector<224x128xbf16>, vector<128x128xbf16>, vector<224x128xf32> -> vector<224x128xf32>
    %42 = arith.addf %36, %41 : vector<224x128xf32>
    %c0_38 = arith.constant 0 : index
    %c33 = arith.constant 33 : index
    %c0_39 = arith.constant 0 : index
    %43 = vector.load %arg1[%c0_38, %c33, %c0_39] : memref<1x264x128xbf16, #tpu.memory_space<vmem>>, vector<1x224x128xbf16>
    %44 = vector.shape_cast %43 : vector<1x224x128xbf16> to vector<224x128xbf16>
    %c7 = arith.constant 7 : index
    %c0_40 = arith.constant 0 : index
    %c0_41 = arith.constant 0 : index
    %45 = vector.load %arg2[%c7, %c0_40, %c0_41] : memref<9x128x128xbf16, #tpu.memory_space<vmem>>, vector<1x128x128xbf16>
    %46 = vector.shape_cast %45 : vector<1x128x128xbf16> to vector<128x128xbf16>
    %cst_42 = arith.constant dense<0.000000e+00> : vector<224x128xf32>
    %47 = tpu.matmul %44, %46, %cst_42 {dimension_numbers = #tpu.dot_dimension_numbers<[1], [0], [0], [1], [0, 0, 1, 1], [], []>} : vector<224x128xbf16>, vector<128x128xbf16>, vector<224x128xf32> -> vector<224x128xf32>
    %48 = arith.addf %42, %47 : vector<224x128xf32>
    %c0_43 = arith.constant 0 : index
    %c34 = arith.constant 34 : index
    %c0_44 = arith.constant 0 : index
    %49 = vector.load %arg1[%c0_43, %c34, %c0_44] : memref<1x264x128xbf16, #tpu.memory_space<vmem>>, vector<1x224x128xbf16>
    %50 = vector.shape_cast %49 : vector<1x224x128xbf16> to vector<224x128xbf16>
    %c8 = arith.constant 8 : index
    %c0_45 = arith.constant 0 : index
    %c0_46 = arith.constant 0 : index
    %51 = vector.load %arg2[%c8, %c0_45, %c0_46] : memref<9x128x128xbf16, #tpu.memory_space<vmem>>, vector<1x128x128xbf16>
    %52 = vector.shape_cast %51 : vector<1x128x128xbf16> to vector<128x128xbf16>
    %cst_47 = arith.constant dense<0.000000e+00> : vector<224x128xf32>
    %53 = tpu.matmul %50, %52, %cst_47 {dimension_numbers = #tpu.dot_dimension_numbers<[1], [0], [0], [1], [0, 0, 1, 1], [], []>} : vector<224x128xbf16>, vector<128x128xbf16>, vector<224x128xf32> -> vector<224x128xf32>
    %54 = arith.addf %48, %53 : vector<224x128xf32>
    %c0_48 = arith.constant 0 : index
    %c0_49 = arith.constant 0 : index
    %55 = vector.load %arg3[%c0_48, %c0_49] : memref<1x128xf32, #tpu.memory_space<vmem>>, vector<1x128xf32>
    %56 = vector.broadcast %55 : vector<1x128xf32> to vector<224x128xf32>
    %57 = arith.addf %54, %56 : vector<224x128xf32>
    %cst_50 = arith.constant 0.000000e+00 : f32
    %58 = vector.broadcast %cst_50 : f32 to vector<224x128xf32>
    %59 = arith.maximumf %57, %58 : vector<224x128xf32>
    %60 = arith.truncf %59 : vector<224x128xf32> to vector<224x128xbf16>
    %c0_51 = arith.constant 0 : index
    %c0_52 = arith.constant 0 : index
    %c0_53 = arith.constant 0 : index
    %61 = vector.load %arg4[%c0_51, %c0_52, %c0_53] : memref<1x232x128xbf16, #tpu.memory_space<vmem>>, vector<1x224x128xbf16>
    %62 = vector.shape_cast %61 : vector<1x224x128xbf16> to vector<224x128xbf16>
    %63 = vector.shape_cast %60 : vector<224x128xbf16> to vector<1x224x128xbf16>
    tpu.vector_store %arg4[%c0_51, %c0_52, %c0_53], %63 {strides = array<i32>} : memref<1x232x128xbf16, #tpu.memory_space<vmem>>, vector<1x224x128xbf16>,
    %cst_54 = arith.constant 0.000000e+00 : bf16
    %64 = vector.broadcast %cst_54 : bf16 to vector<8x128xbf16>
    %c0_55 = arith.constant 0 : index
    %c224 = arith.constant 224 : index
    %c0_56 = arith.constant 0 : index
    %65 = vector.load %arg4[%c0_55, %c224, %c0_56] : memref<1x232x128xbf16, #tpu.memory_space<vmem>>, vector<1x8x128xbf16>
    %66 = vector.shape_cast %65 : vector<1x8x128xbf16> to vector<8x128xbf16>
    %67 = vector.shape_cast %64 : vector<8x128xbf16> to vector<1x8x128xbf16>
    tpu.vector_store %arg4[%c0_55, %c224, %c0_56], %67 {strides = array<i32>} : memref<1x232x128xbf16, #tpu.memory_space<vmem>>, vector<1x8x128xbf16>,
    return
  }
  func.func @transform_0(%arg0: i32) -> (i32, i32, i32) {
    %c0_i32 = arith.constant 0 : i32
    %c0_i32_0 = arith.constant 0 : i32
    %c0_i32_1 = arith.constant 0 : i32
    return %arg0, %c0_i32, %c0_i32_0 : i32, i32, i32
  }
  func.func @transform_1(%arg0: i32) -> (i32, i32, i32) {
    %c0_i32 = arith.constant 0 : i32
    %c0_i32_0 = arith.constant 0 : i32
    %c0_i32_1 = arith.constant 0 : i32
    %c0_i32_2 = arith.constant 0 : i32
    return %c0_i32, %c0_i32_0, %c0_i32_1 : i32, i32, i32
  }
  func.func @transform_2(%arg0: i32) -> (i32, i32) {
    %c0_i32 = arith.constant 0 : i32
    %c0_i32_0 = arith.constant 0 : i32
    %c0_i32_1 = arith.constant 0 : i32
    return %c0_i32, %c0_i32_0 : i32, i32
  }
  func.func @transform_3(%arg0: i32) -> (i32, i32, i32) {
    %c0_i32 = arith.constant 0 : i32
    %c0_i32_0 = arith.constant 0 : i32
    %c0_i32_1 = arith.constant 0 : i32
    return %arg0, %c0_i32, %c0_i32_0 : i32, i32, i32
  }
}

module attributes {stable_mosaic.version = 11 : i64} {
  func.func @_bn_relu_kernel(%arg0: i32, %arg1: memref<1x192x128xf32, #tpu.memory_space<vmem>>, %arg2: memref<2x2x128xf32, #tpu.memory_space<vmem>>, %arg3: memref<1x128xf32, #tpu.memory_space<vmem>>, %arg4: memref<1x128xf32, #tpu.memory_space<vmem>>, %arg5: memref<1x192x128xf32, #tpu.memory_space<vmem>>) attributes {dimension_semantics = [#tpu.dimension_semantics<parallel>], iteration_bounds = array<i64: 2>, scalar_prefetch = 0 : i64, scratch_operands = 0 : i64, tpu.core_type = #tpu.core_type<tc>, window_params = [{transform_indices = @transform_0, window_bounds = array<i64: 1, 192, 128>}, {pipeline_mode = #tpu.pipeline_mode<synchronous>, transform_indices = @transform_1, window_bounds = array<i64: 2, 2, 128>}, {pipeline_mode = #tpu.pipeline_mode<synchronous>, transform_indices = @transform_2, window_bounds = array<i64: 1, 128>}, {pipeline_mode = #tpu.pipeline_mode<synchronous>, transform_indices = @transform_3, window_bounds = array<i64: 1, 128>}, {transform_indices = @transform_4, window_bounds = array<i64: 1, 192, 128>}]} {
    %c0 = arith.constant 0 : index
    %c0_0 = arith.constant 0 : index
    %c0_1 = arith.constant 0 : index
    %0 = vector.load %arg2[%c0, %c0_0, %c0_1] : memref<2x2x128xf32, #tpu.memory_space<vmem>>, vector<2x2x128xf32>
    %cst = arith.constant dense<0.000000e+00> : vector<2x128xf32>
    %1 = vector.multi_reduction <add>, %0, %cst [0] : vector<2x2x128xf32> to vector<2x128xf32>
    %2 = vector.extract_strided_slice %1 {offsets = [0, 0], sizes = [1, 128], strides = [1, 1]} : vector<2x128xf32> to vector<1x128xf32>
    %cst_2 = arith.constant 0.00347222225 : f32
    %3 = vector.broadcast %cst_2 : f32 to vector<1x128xf32>
    %4 = arith.mulf %2, %3 : vector<1x128xf32>
    %5 = vector.extract_strided_slice %1 {offsets = [1, 0], sizes = [1, 128], strides = [1, 1]} : vector<2x128xf32> to vector<1x128xf32>
    %cst_3 = arith.constant 0.00347222225 : f32
    %6 = vector.broadcast %cst_3 : f32 to vector<1x128xf32>
    %7 = arith.mulf %5, %6 : vector<1x128xf32>
    %8 = arith.mulf %4, %4 : vector<1x128xf32>
    %9 = arith.subf %7, %8 : vector<1x128xf32>
    %cst_4 = arith.constant 0.000000e+00 : f32
    %10 = vector.broadcast %cst_4 : f32 to vector<1x128xf32>
    %11 = arith.maximumf %9, %10 : vector<1x128xf32>
    %cst_5 = arith.constant 9.99999974E-6 : f32
    %12 = vector.broadcast %cst_5 : f32 to vector<1x128xf32>
    %13 = arith.addf %11, %12 : vector<1x128xf32>
    %14 = math.rsqrt %13 : vector<1x128xf32>
    %c0_6 = arith.constant 0 : index
    %c0_7 = arith.constant 0 : index
    %c0_8 = arith.constant 0 : index
    %15 = vector.load %arg1[%c0_6, %c0_7, %c0_8] : memref<1x192x128xf32, #tpu.memory_space<vmem>>, vector<1x192x128xf32>
    %16 = vector.shape_cast %15 : vector<1x192x128xf32> to vector<192x128xf32>
    %17 = vector.broadcast %4 : vector<1x128xf32> to vector<192x128xf32>
    %18 = arith.subf %16, %17 : vector<192x128xf32>
    %19 = vector.broadcast %14 : vector<1x128xf32> to vector<192x128xf32>
    %20 = arith.mulf %18, %19 : vector<192x128xf32>
    %c0_9 = arith.constant 0 : index
    %c0_10 = arith.constant 0 : index
    %21 = vector.load %arg3[%c0_9, %c0_10] : memref<1x128xf32, #tpu.memory_space<vmem>>, vector<1x128xf32>
    %22 = vector.broadcast %21 : vector<1x128xf32> to vector<192x128xf32>
    %23 = arith.mulf %20, %22 : vector<192x128xf32>
    %c0_11 = arith.constant 0 : index
    %c0_12 = arith.constant 0 : index
    %24 = vector.load %arg4[%c0_11, %c0_12] : memref<1x128xf32, #tpu.memory_space<vmem>>, vector<1x128xf32>
    %25 = vector.broadcast %24 : vector<1x128xf32> to vector<192x128xf32>
    %26 = arith.addf %23, %25 : vector<192x128xf32>
    %cst_13 = arith.constant 0.000000e+00 : f32
    %27 = vector.broadcast %cst_13 : f32 to vector<192x128xf32>
    %28 = arith.maximumf %26, %27 : vector<192x128xf32>
    %c0_14 = arith.constant 0 : index
    %c0_15 = arith.constant 0 : index
    %c0_16 = arith.constant 0 : index
    %29 = vector.load %arg5[%c0_14, %c0_15, %c0_16] : memref<1x192x128xf32, #tpu.memory_space<vmem>>, vector<1x192x128xf32>
    %30 = vector.shape_cast %29 : vector<1x192x128xf32> to vector<192x128xf32>
    %31 = vector.shape_cast %28 : vector<192x128xf32> to vector<1x192x128xf32>
    tpu.vector_store %arg5[%c0_14, %c0_15, %c0_16], %31 {strides = array<i32>} : memref<1x192x128xf32, #tpu.memory_space<vmem>>, vector<1x192x128xf32>,
    return
  }
  func.func @transform_0(%arg0: i32) -> (i32, i32, i32) {
    %c0_i32 = arith.constant 0 : i32
    %c0_i32_0 = arith.constant 0 : i32
    %c0_i32_1 = arith.constant 0 : i32
    return %arg0, %c0_i32, %c0_i32_0 : i32, i32, i32
  }
  func.func @transform_1(%arg0: i32) -> (i32, i32, i32) {
    %c0_i32 = arith.constant 0 : i32
    %c0_i32_0 = arith.constant 0 : i32
    %c0_i32_1 = arith.constant 0 : i32
    %c0_i32_2 = arith.constant 0 : i32
    return %c0_i32, %c0_i32_0, %c0_i32_1 : i32, i32, i32
  }
  func.func @transform_2(%arg0: i32) -> (i32, i32) {
    %c0_i32 = arith.constant 0 : i32
    %c0_i32_0 = arith.constant 0 : i32
    %c0_i32_1 = arith.constant 0 : i32
    return %c0_i32, %c0_i32_0 : i32, i32
  }
  func.func @transform_3(%arg0: i32) -> (i32, i32) {
    %c0_i32 = arith.constant 0 : i32
    %c0_i32_0 = arith.constant 0 : i32
    %c0_i32_1 = arith.constant 0 : i32
    return %c0_i32, %c0_i32_0 : i32, i32
  }
  func.func @transform_4(%arg0: i32) -> (i32, i32, i32) {
    %c0_i32 = arith.constant 0 : i32
    %c0_i32_0 = arith.constant 0 : i32
    %c0_i32_1 = arith.constant 0 : i32
    return %arg0, %c0_i32, %c0_i32_0 : i32, i32, i32
  }
}

module attributes {stable_mosaic.version = 11 : i64} {
  func.func @_conv_stats_kernel(%arg0: i32, %arg1: memref<1x232x128xbf16, #tpu.memory_space<vmem>>, %arg2: memref<9x128x128xbf16, #tpu.memory_space<vmem>>, %arg3: memref<1x192x128xf32, #tpu.memory_space<vmem>>, %arg4: memref<1x2x128xf32, #tpu.memory_space<vmem>>) attributes {dimension_semantics = [#tpu.dimension_semantics<parallel>], iteration_bounds = array<i64: 2>, scalar_prefetch = 0 : i64, scratch_operands = 0 : i64, tpu.core_type = #tpu.core_type<tc>, window_params = [{transform_indices = @transform_0, window_bounds = array<i64: 1, 232, 128>}, {pipeline_mode = #tpu.pipeline_mode<synchronous>, transform_indices = @transform_1, window_bounds = array<i64: 9, 128, 128>}, {transform_indices = @transform_2, window_bounds = array<i64: 1, 192, 128>}, {transform_indices = @transform_3, window_bounds = array<i64: 1, 2, 128>}]} {
    %cst = arith.constant 0.000000e+00 : f32
    %0 = vector.broadcast %cst : f32 to vector<192x128xf32>
    %c0 = arith.constant 0 : index
    %c0_0 = arith.constant 0 : index
    %c0_1 = arith.constant 0 : index
    %1 = vector.load %arg1[%c0, %c0_0, %c0_1] : memref<1x232x128xbf16, #tpu.memory_space<vmem>>, vector<1x192x128xbf16>
    %2 = vector.shape_cast %1 : vector<1x192x128xbf16> to vector<192x128xbf16>
    %c0_2 = arith.constant 0 : index
    %c0_3 = arith.constant 0 : index
    %c0_4 = arith.constant 0 : index
    %3 = vector.load %arg2[%c0_2, %c0_3, %c0_4] : memref<9x128x128xbf16, #tpu.memory_space<vmem>>, vector<1x128x128xbf16>
    %4 = vector.shape_cast %3 : vector<1x128x128xbf16> to vector<128x128xbf16>
    %cst_5 = arith.constant dense<0.000000e+00> : vector<192x128xf32>
    %5 = tpu.matmul %2, %4, %cst_5 {dimension_numbers = #tpu.dot_dimension_numbers<[1], [0], [0], [1], [0, 0, 1, 1], [], []>} : vector<192x128xbf16>, vector<128x128xbf16>, vector<192x128xf32> -> vector<192x128xf32>
    %6 = arith.addf %0, %5 : vector<192x128xf32>
    %c0_6 = arith.constant 0 : index
    %c1 = arith.constant 1 : index
    %c0_7 = arith.constant 0 : index
    %7 = vector.load %arg1[%c0_6, %c1, %c0_7] : memref<1x232x128xbf16, #tpu.memory_space<vmem>>, vector<1x192x128xbf16>
    %8 = vector.shape_cast %7 : vector<1x192x128xbf16> to vector<192x128xbf16>
    %c1_8 = arith.constant 1 : index
    %c0_9 = arith.constant 0 : index
    %c0_10 = arith.constant 0 : index
    %9 = vector.load %arg2[%c1_8, %c0_9, %c0_10] : memref<9x128x128xbf16, #tpu.memory_space<vmem>>, vector<1x128x128xbf16>
    %10 = vector.shape_cast %9 : vector<1x128x128xbf16> to vector<128x128xbf16>
    %cst_11 = arith.constant dense<0.000000e+00> : vector<192x128xf32>
    %11 = tpu.matmul %8, %10, %cst_11 {dimension_numbers = #tpu.dot_dimension_numbers<[1], [0], [0], [1], [0, 0, 1, 1], [], []>} : vector<192x128xbf16>, vector<128x128xbf16>, vector<192x128xf32> -> vector<192x128xf32>
    %12 = arith.addf %6, %11 : vector<192x128xf32>
    %c0_12 = arith.constant 0 : index
    %c2 = arith.constant 2 : index
    %c0_13 = arith.constant 0 : index
    %13 = vector.load %arg1[%c0_12, %c2, %c0_13] : memref<1x232x128xbf16, #tpu.memory_space<vmem>>, vector<1x192x128xbf16>
    %14 = vector.shape_cast %13 : vector<1x192x128xbf16> to vector<192x128xbf16>
    %c2_14 = arith.constant 2 : index
    %c0_15 = arith.constant 0 : index
    %c0_16 = arith.constant 0 : index
    %15 = vector.load %arg2[%c2_14, %c0_15, %c0_16] : memref<9x128x128xbf16, #tpu.memory_space<vmem>>, vector<1x128x128xbf16>
    %16 = vector.shape_cast %15 : vector<1x128x128xbf16> to vector<128x128xbf16>
    %cst_17 = arith.constant dense<0.000000e+00> : vector<192x128xf32>
    %17 = tpu.matmul %14, %16, %cst_17 {dimension_numbers = #tpu.dot_dimension_numbers<[1], [0], [0], [1], [0, 0, 1, 1], [], []>} : vector<192x128xbf16>, vector<128x128xbf16>, vector<192x128xf32> -> vector<192x128xf32>
    %18 = arith.addf %12, %17 : vector<192x128xf32>
    %c0_18 = arith.constant 0 : index
    %c16 = arith.constant 16 : index
    %c0_19 = arith.constant 0 : index
    %19 = vector.load %arg1[%c0_18, %c16, %c0_19] : memref<1x232x128xbf16, #tpu.memory_space<vmem>>, vector<1x192x128xbf16>
    %20 = vector.shape_cast %19 : vector<1x192x128xbf16> to vector<192x128xbf16>
    %c3 = arith.constant 3 : index
    %c0_20 = arith.constant 0 : index
    %c0_21 = arith.constant 0 : index
    %21 = vector.load %arg2[%c3, %c0_20, %c0_21] : memref<9x128x128xbf16, #tpu.memory_space<vmem>>, vector<1x128x128xbf16>
    %22 = vector.shape_cast %21 : vector<1x128x128xbf16> to vector<128x128xbf16>
    %cst_22 = arith.constant dense<0.000000e+00> : vector<192x128xf32>
    %23 = tpu.matmul %20, %22, %cst_22 {dimension_numbers = #tpu.dot_dimension_numbers<[1], [0], [0], [1], [0, 0, 1, 1], [], []>} : vector<192x128xbf16>, vector<128x128xbf16>, vector<192x128xf32> -> vector<192x128xf32>
    %24 = arith.addf %18, %23 : vector<192x128xf32>
    %c0_23 = arith.constant 0 : index
    %c17 = arith.constant 17 : index
    %c0_24 = arith.constant 0 : index
    %25 = vector.load %arg1[%c0_23, %c17, %c0_24] : memref<1x232x128xbf16, #tpu.memory_space<vmem>>, vector<1x192x128xbf16>
    %26 = vector.shape_cast %25 : vector<1x192x128xbf16> to vector<192x128xbf16>
    %c4 = arith.constant 4 : index
    %c0_25 = arith.constant 0 : index
    %c0_26 = arith.constant 0 : index
    %27 = vector.load %arg2[%c4, %c0_25, %c0_26] : memref<9x128x128xbf16, #tpu.memory_space<vmem>>, vector<1x128x128xbf16>
    %28 = vector.shape_cast %27 : vector<1x128x128xbf16> to vector<128x128xbf16>
    %cst_27 = arith.constant dense<0.000000e+00> : vector<192x128xf32>
    %29 = tpu.matmul %26, %28, %cst_27 {dimension_numbers = #tpu.dot_dimension_numbers<[1], [0], [0], [1], [0, 0, 1, 1], [], []>} : vector<192x128xbf16>, vector<128x128xbf16>, vector<192x128xf32> -> vector<192x128xf32>
    %30 = arith.addf %24, %29 : vector<192x128xf32>
    %c0_28 = arith.constant 0 : index
    %c18 = arith.constant 18 : index
    %c0_29 = arith.constant 0 : index
    %31 = vector.load %arg1[%c0_28, %c18, %c0_29] : memref<1x232x128xbf16, #tpu.memory_space<vmem>>, vector<1x192x128xbf16>
    %32 = vector.shape_cast %31 : vector<1x192x128xbf16> to vector<192x128xbf16>
    %c5 = arith.constant 5 : index
    %c0_30 = arith.constant 0 : index
    %c0_31 = arith.constant 0 : index
    %33 = vector.load %arg2[%c5, %c0_30, %c0_31] : memref<9x128x128xbf16, #tpu.memory_space<vmem>>, vector<1x128x128xbf16>
    %34 = vector.shape_cast %33 : vector<1x128x128xbf16> to vector<128x128xbf16>
    %cst_32 = arith.constant dense<0.000000e+00> : vector<192x128xf32>
    %35 = tpu.matmul %32, %34, %cst_32 {dimension_numbers = #tpu.dot_dimension_numbers<[1], [0], [0], [1], [0, 0, 1, 1], [], []>} : vector<192x128xbf16>, vector<128x128xbf16>, vector<192x128xf32> -> vector<192x128xf32>
    %36 = arith.addf %30, %35 : vector<192x128xf32>
    %c0_33 = arith.constant 0 : index
    %c32 = arith.constant 32 : index
    %c0_34 = arith.constant 0 : index
    %37 = vector.load %arg1[%c0_33, %c32, %c0_34] : memref<1x232x128xbf16, #tpu.memory_space<vmem>>, vector<1x192x128xbf16>
    %38 = vector.shape_cast %37 : vector<1x192x128xbf16> to vector<192x128xbf16>
    %c6 = arith.constant 6 : index
    %c0_35 = arith.constant 0 : index
    %c0_36 = arith.constant 0 : index
    %39 = vector.load %arg2[%c6, %c0_35, %c0_36] : memref<9x128x128xbf16, #tpu.memory_space<vmem>>, vector<1x128x128xbf16>
    %40 = vector.shape_cast %39 : vector<1x128x128xbf16> to vector<128x128xbf16>
    %cst_37 = arith.constant dense<0.000000e+00> : vector<192x128xf32>
    %41 = tpu.matmul %38, %40, %cst_37 {dimension_numbers = #tpu.dot_dimension_numbers<[1], [0], [0], [1], [0, 0, 1, 1], [], []>} : vector<192x128xbf16>, vector<128x128xbf16>, vector<192x128xf32> -> vector<192x128xf32>
    %42 = arith.addf %36, %41 : vector<192x128xf32>
    %c0_38 = arith.constant 0 : index
    %c33 = arith.constant 33 : index
    %c0_39 = arith.constant 0 : index
    %43 = vector.load %arg1[%c0_38, %c33, %c0_39] : memref<1x232x128xbf16, #tpu.memory_space<vmem>>, vector<1x192x128xbf16>
    %44 = vector.shape_cast %43 : vector<1x192x128xbf16> to vector<192x128xbf16>
    %c7 = arith.constant 7 : index
    %c0_40 = arith.constant 0 : index
    %c0_41 = arith.constant 0 : index
    %45 = vector.load %arg2[%c7, %c0_40, %c0_41] : memref<9x128x128xbf16, #tpu.memory_space<vmem>>, vector<1x128x128xbf16>
    %46 = vector.shape_cast %45 : vector<1x128x128xbf16> to vector<128x128xbf16>
    %cst_42 = arith.constant dense<0.000000e+00> : vector<192x128xf32>
    %47 = tpu.matmul %44, %46, %cst_42 {dimension_numbers = #tpu.dot_dimension_numbers<[1], [0], [0], [1], [0, 0, 1, 1], [], []>} : vector<192x128xbf16>, vector<128x128xbf16>, vector<192x128xf32> -> vector<192x128xf32>
    %48 = arith.addf %42, %47 : vector<192x128xf32>
    %c0_43 = arith.constant 0 : index
    %c34 = arith.constant 34 : index
    %c0_44 = arith.constant 0 : index
    %49 = vector.load %arg1[%c0_43, %c34, %c0_44] : memref<1x232x128xbf16, #tpu.memory_space<vmem>>, vector<1x192x128xbf16>
    %50 = vector.shape_cast %49 : vector<1x192x128xbf16> to vector<192x128xbf16>
    %c8 = arith.constant 8 : index
    %c0_45 = arith.constant 0 : index
    %c0_46 = arith.constant 0 : index
    %51 = vector.load %arg2[%c8, %c0_45, %c0_46] : memref<9x128x128xbf16, #tpu.memory_space<vmem>>, vector<1x128x128xbf16>
    %52 = vector.shape_cast %51 : vector<1x128x128xbf16> to vector<128x128xbf16>
    %cst_47 = arith.constant dense<0.000000e+00> : vector<192x128xf32>
    %53 = tpu.matmul %50, %52, %cst_47 {dimension_numbers = #tpu.dot_dimension_numbers<[1], [0], [0], [1], [0, 0, 1, 1], [], []>} : vector<192x128xbf16>, vector<128x128xbf16>, vector<192x128xf32> -> vector<192x128xf32>
    %54 = arith.addf %48, %53 : vector<192x128xf32>
    %c0_48 = arith.constant 0 : index
    %c0_49 = arith.constant 0 : index
    %c0_50 = arith.constant 0 : index
    %55 = vector.load %arg3[%c0_48, %c0_49, %c0_50] : memref<1x192x128xf32, #tpu.memory_space<vmem>>, vector<1x192x128xf32>
    %56 = vector.shape_cast %55 : vector<1x192x128xf32> to vector<192x128xf32>
    %57 = vector.shape_cast %54 : vector<192x128xf32> to vector<1x192x128xf32>
    tpu.vector_store %arg3[%c0_48, %c0_49, %c0_50], %57 {strides = array<i32>} : memref<1x192x128xf32, #tpu.memory_space<vmem>>, vector<1x192x128xf32>,
    %58 = tpu.iota {dimensions = array<i32: 0>} : vector<192x1xi32>
    %c16_i32 = arith.constant 16 : i32
    %c0_i32 = arith.constant 0 : i32
    %59 = arith.cmpi eq, %c16_i32, %c0_i32 : i32
    %c1_i32 = arith.constant 1 : i32
    %60 = arith.select %59, %c1_i32, %c16_i32 : i32
    %61 = vector.broadcast %60 : i32 to vector<192x1xi32>
    %62 = arith.remsi %58, %61 : vector<192x1xi32>
    %c0_i32_51 = arith.constant 0 : i32
    %63 = vector.broadcast %c0_i32_51 : i32 to vector<192x1xi32>
    %64 = arith.cmpi ne, %62, %63 : vector<192x1xi32>
    %c0_i32_52 = arith.constant 0 : i32
    %65 = vector.broadcast %c0_i32_52 : i32 to vector<192x1xi32>
    %66 = arith.cmpi slt, %62, %65 : vector<192x1xi32>
    %c0_i32_53 = arith.constant 0 : i32
    %67 = arith.cmpi slt, %60, %c0_i32_53 : i32
    %68 = vector.broadcast %67 : i1 to vector<192x1xi1>
    %69 = vector.broadcast %68 : vector<192x1xi1> to vector<192x1xi1>
    %70 = arith.xori %66, %69 : vector<192x1xi1>
    %71 = arith.andi %70, %64 : vector<192x1xi1>
    %72 = vector.broadcast %60 : i32 to vector<192x1xi32>
    %73 = arith.addi %62, %72 : vector<192x1xi32>
    %74 = arith.select %71, %73, %62 : vector<192x1xi1>, vector<192x1xi32>
    %c12_i32 = arith.constant 12 : i32
    %75 = vector.broadcast %c12_i32 : i32 to vector<192x1xi32>
    %76 = arith.cmpi slt, %74, %75 : vector<192x1xi32>
    %77 = arith.extui %76 : vector<192x1xi1> to vector<192x1xi32>
    %78 = arith.sitofp %77 : vector<192x1xi32> to vector<192x1xf32>
    %79 = vector.broadcast %78 : vector<192x1xf32> to vector<192x128xf32>
    %80 = arith.mulf %54, %79 : vector<192x128xf32>
    %cst_54 = arith.constant dense<0.000000e+00> : vector<128xf32>
    %81 = vector.multi_reduction <add>, %80, %cst_54 [0] : vector<192x128xf32> to vector<128xf32>
    %82 = vector.shape_cast %81 : vector<128xf32> to vector<1x128xf32>
    %c0_55 = arith.constant 0 : index
    %c0_56 = arith.constant 0 : index
    %c0_57 = arith.constant 0 : index
    %83 = vector.load %arg4[%c0_55, %c0_56, %c0_57] : memref<1x2x128xf32, #tpu.memory_space<vmem>>, vector<1x1x128xf32>
    %84 = vector.shape_cast %83 : vector<1x1x128xf32> to vector<1x128xf32>
    %85 = vector.shape_cast %82 : vector<1x128xf32> to vector<1x1x128xf32>
    tpu.vector_store %arg4[%c0_55, %c0_56, %c0_57], %85 {strides = array<i32>} : memref<1x2x128xf32, #tpu.memory_space<vmem>>, vector<1x1x128xf32>,
    %86 = arith.mulf %80, %54 : vector<192x128xf32>
    %cst_58 = arith.constant dense<0.000000e+00> : vector<128xf32>
    %87 = vector.multi_reduction <add>, %86, %cst_58 [0] : vector<192x128xf32> to vector<128xf32>
    %88 = vector.shape_cast %87 : vector<128xf32> to vector<1x128xf32>
    %c0_59 = arith.constant 0 : index
    %c1_60 = arith.constant 1 : index
    %c0_61 = arith.constant 0 : index
    %89 = vector.load %arg4[%c0_59, %c1_60, %c0_61] : memref<1x2x128xf32, #tpu.memory_space<vmem>>, vector<1x1x128xf32>
    %90 = vector.shape_cast %89 : vector<1x1x128xf32> to vector<1x128xf32>
    %91 = vector.shape_cast %88 : vector<1x128xf32> to vector<1x1x128xf32>
    tpu.vector_store %arg4[%c0_59, %c1_60, %c0_61], %91 {strides = array<i32>} : memref<1x2x128xf32, #tpu.memory_space<vmem>>, vector<1x1x128xf32>,
    return
  }
  func.func @transform_0(%arg0: i32) -> (i32, i32, i32) {
    %c0_i32 = arith.constant 0 : i32
    %c0_i32_0 = arith.constant 0 : i32
    %c0_i32_1 = arith.constant 0 : i32
    return %arg0, %c0_i32, %c0_i32_0 : i32, i32, i32
  }
  func.func @transform_1(%arg0: i32) -> (i32, i32, i32) {
    %c0_i32 = arith.constant 0 : i32
    %c0_i32_0 = arith.constant 0 : i32
    %c0_i32_1 = arith.constant 0 : i32
    %c0_i32_2 = arith.constant 0 : i32
    return %c0_i32, %c0_i32_0, %c0_i32_1 : i32, i32, i32
  }
  func.func @transform_2(%arg0: i32) -> (i32, i32, i32) {
    %c0_i32 = arith.constant 0 : i32
    %c0_i32_0 = arith.constant 0 : i32
    %c0_i32_1 = arith.constant 0 : i32
    return %arg0, %c0_i32, %c0_i32_0 : i32, i32, i32
  }
  func.func @transform_3(%arg0: i32) -> (i32, i32, i32) {
    %c0_i32 = arith.constant 0 : i32
    %c0_i32_0 = arith.constant 0 : i32
    %c0_i32_1 = arith.constant 0 : i32
    return %arg0, %c0_i32, %c0_i32_0 : i32, i32, i32
  }
}

</mosaic_0001>

<bundles_post_ra>
// kernel: tile.8
= control target key start
LH: loop header
LB: loop body
LE: loop exit
PB: predicated region body
PF: predicated region fallthrough
CT: control target
= control target key end

     0   :  { %s22_s0 = inlined_call_operand.vmem [shape: f32[128], index: 0, kind: input, shape index: {}]   ;;  %s23_s1 = inlined_call_operand.vmem [shape: f32[4,128], index: 1, kind: output, shape index: {}]  }
   0x1   :  { %v4_v0 = vld [vmem:[%s22_s0] ss:$0 sm:$0xff] }
   0x2   :  { %5 = vst [vmem:[%s23_s1] sm:$0xf] %v4_v0 }

// kernel: upstep_forward.4
= control target key start
LH: loop header
LB: loop body
LE: loop exit
PB: predicated region body
PF: predicated region fallthrough
CT: control target
= control target key end

     0   :  { %s837_s12 = smov 0   ;;  %s1115_s0 = inlined_call_operand.vmem [shape: bf16[2,64,128], index: 0, kind: input, shape index: {}]   ;;  %s1116_s1 = inlined_call_operand.vmem [shape: bf16[128,512], index: 1, kind: input, shape index: {}]   ;;  %s1117_s2 = inlined_call_operand.vmem [shape: f32[1,512], index: 2, kind: input, shape index: {}]   ;;  %s1118_s3 = inlined_call_operand.vmem [shape: bf16[2,64,512], index: 3, kind: output, shape index: {}]  }
   0x1 LB: > { %s608_s13 = sadd.s32 4294967295, %s815_s12   ;;  %p612_p0 = scmp.ge.s32.totalorder %s815_s12, 1  ;;  %s815_s12 = sphi %s837_s12, %s13_s12  }
   0x2   : > { %p137_p1 = scmp.lt.s32.totalorder %s815_s12, 3 }
   0x4   : > { %p138_p2 = pnand %p612_p0, %p137_p1 }
   0x5   : > { %p161_p3 = scmp.lt.s32.totalorder (!%p138_p2), %s608_s13, 1 }
   0x6   : > { %141 = sbr.rel (%p138_p2) target bundleno = 240 (0xf0), region = 32 }
   0xb   : > { %v747_v0 = vld [vmem:[%s1116_s1 + $0xe0] sm:$0xf]  ;;  %v799_v1 = vld [vmem:[%s1116_s1 + $0xec] sm:$0xf0]  ;;  %v797_v2 = vld [vmem:[%s1116_s1 + $0xe4] sm:$0xf] }
   0xc   : > { %v748_v3 = vor.u32 %v799_v1, %v747_v0  ;;  %v749_v4 = vld [vmem:[%s1116_s1 + $0xf0] sm:$0xf0]  ;;  %v755_v5 = vld [vmem:[%s1116_s1 + $0xe8] sm:$0xf]  ;;  %v800_v6 = vld [vmem:[%s1116_s1 + $0xf4] sm:$0xf0] }
   0xd   : > { %v752_v7 = vor.u32 %v797_v2, %v749_v4  ;;  %v756_v8 = vor.u32 %v800_v6, %v755_v5  ;;  %v798_v9 = vld [vmem:[%s1116_s1 + $0xec] sm:$0xf]  ;;  %v757_v10 = vld [vmem:[%s1116_s1 + $0xf8] sm:$0xf0]  ;;  %v731_v11 = vld [vmem:[%s1116_s1 + $0xc0] sm:$0xf] }
   0xe   : > { %405 = vmatpush.bf16.msra.mxu0 %v748_v3  ;;  %v760_v12 = vor.u32 %v798_v9, %v757_v10  ;;  %v795_v13 = vld [vmem:[%s1116_s1 + $0xcc] sm:$0xf0]  ;;  %v793_v14 = vld [vmem:[%s1116_s1 + $0xc4] sm:$0xf]  ;;  %v733_v15 = vld [vmem:[%s1116_s1 + $0xd0] sm:$0xf0] }
   0xf   : > { %434 = vmatpush.bf16.msra.mxu1 %v752_v7  ;;  %463 = vmatpush.bf16.msra.mxu2 %v756_v8  ;;  %v732_v16 = vor.u32 %v795_v13, %v731_v11  ;;  %v736_v17 = vor.u32 %v793_v14, %v733_v15  ;;  %v739_v18 = vld [vmem:[%s1116_s1 + $0xc8] sm:$0xf]  ;;  %v796_v19 = vld [vmem:[%s1116_s1 + $0xd4] sm:$0xf0]  ;;  %v794_v20 = vld [vmem:[%s1116_s1 + $0xcc] sm:$0xf] }
  0x10   : > { %492 = vmatpush.bf16.msra.mxu3 %v760_v12  ;;  %v740_v21 = vor.u32 %v796_v19, %v739_v18  ;;  %v741_v22 = vld [vmem:[%s1116_s1 + $0xd8] sm:$0xf0]  ;;  %v715_v23 = vld [vmem:[%s1116_s1 + $0xa0] sm:$0xf]  ;;  %v791_v24 = vld [vmem:[%s1116_s1 + $0xac] sm:$0xf0] }
  0x11   : > { %v744_v25 = vor.u32 %v794_v20, %v741_v22  ;;  %v789_v26 = vld [vmem:[%s1116_s1 + $0xa4] sm:$0xf]  ;;  %v717_v27 = vld [vmem:[%s1116_s1 + $0xb0] sm:$0xf0]  ;;  %v723_v28 = vld [vmem:[%s1116_s1 + $0xa8] sm:$0xf]  ;;  %v716_v29 = vor.u32 %v791_v24, %v715_v23 }
  0x12   : > { %406 = vmatpush.bf16.msra.mxu0 %v732_v16  ;;  %v792_v30 = vld [vmem:[%s1116_s1 + $0xb4] sm:$0xf0]  ;;  %v790_v31 = vld [vmem:[%s1116_s1 + $0xac] sm:$0xf]  ;;  %v725_v32 = vld [vmem:[%s1116_s1 + $0xb8] sm:$0xf0]  ;;  %v720_v33 = vor.u32 %v789_v26, %v717_v27 }
  0x13   : > { %435 = vmatpush.bf16.msra.mxu1 %v736_v17  ;;  %464 = vmatpush.bf16.msra.mxu2 %v740_v21  ;;  %v724_v34 = vor.u32 %v792_v30, %v723_v28  ;;  %v699_v35 = vld [vmem:[%s1116_s1 + $0x80] sm:$0xf]  ;;  %v787_v36 = vld [vmem:[%s1116_s1 + $0x8c] sm:$0xf0]  ;;  %v785_v37 = vld [vmem:[%s1116_s1 + $0x84] sm:$0xf]  ;;  %v728_v38 = vor.u32 %v790_v31, %v725_v32 }
  0x14   : > { %493 = vmatpush.bf16.msra.mxu3 %v744_v25  ;;  %v701_v39 = vld [vmem:[%s1116_s1 + $0x90] sm:$0xf0]  ;;  %v707_v40 = vld [vmem:[%s1116_s1 + $0x88] sm:$0xf]  ;;  %v788_v41 = vld [vmem:[%s1116_s1 + $0x94] sm:$0xf0]  ;;  %v700_v44 = vor.u32 %v787_v36, %v699_v35 }
  0x15   : > { %v786_v42 = vld [vmem:[%s1116_s1 + $0x8c] sm:$0xf]  ;;  %v709_v43 = vld [vmem:[%s1116_s1 + $0x98] sm:$0xf0]  ;;  %v704_v45 = vor.u32 %v785_v37, %v701_v39  ;;  %v708_v46 = vor.u32 %v788_v41, %v707_v40  ;;  %v683_v47 = vld [vmem:[%s1116_s1 + $0x60] sm:$0xf] }
  0x16   : > { %407 = vmatpush.bf16.msra.mxu0 %v716_v29  ;;  %v783_v48 = vld [vmem:[%s1116_s1 + $0x6c] sm:$0xf0]  ;;  %v781_v49 = vld [vmem:[%s1116_s1 + $0x64] sm:$0xf]  ;;  %v712_v50 = vor.u32 %v786_v42, %v709_v43  ;;  %v685_v51 = vld [vmem:[%s1116_s1 + $0x70] sm:$0xf0] }
  0x17   : > { %436 = vmatpush.bf16.msra.mxu1 %v720_v33  ;;  %465 = vmatpush.bf16.msra.mxu2 %v724_v34  ;;  %v691_v52 = vld [vmem:[%s1116_s1 + $0x68] sm:$0xf]  ;;  %v784_v53 = vld [vmem:[%s1116_s1 + $0x74] sm:$0xf0]  ;;  %v782_v54 = vld [vmem:[%s1116_s1 + $0x6c] sm:$0xf]  ;;  %v684_v56 = vor.u32 %v783_v48, %v683_v47  ;;  %v688_v57 = vor.u32 %v781_v49, %v685_v51 }
  0x18   : > { %494 = vmatpush.bf16.msra.mxu3 %v728_v38  ;;  %v693_v55 = vld [vmem:[%s1116_s1 + $0x78] sm:$0xf0]  ;;  %v692_v58 = vor.u32 %v784_v53, %v691_v52  ;;  %v667_v59 = vld [vmem:[%s1116_s1 + $0x40] sm:$0xf]  ;;  %v779_v60 = vld [vmem:[%s1116_s1 + $0x4c] sm:$0xf0] }
  0x19   : > { %v777_v61 = vld [vmem:[%s1116_s1 + $0x44] sm:$0xf]  ;;  %v696_v62 = vor.u32 %v782_v54, %v693_v55  ;;  %v669_v63 = vld [vmem:[%s1116_s1 + $0x50] sm:$0xf0]  ;;  %v675_v0 = vld [vmem:[%s1116_s1 + $0x48] sm:$0xf]  ;;  %v668_v4 = vor.u32 %v779_v60, %v667_v59 }
  0x1a   : > { %408 = vmatpush.bf16.msra.mxu0 %v700_v44  ;;  %v780_v1 = vld [vmem:[%s1116_s1 + $0x54] sm:$0xf0]  ;;  %v778_v2 = vld [vmem:[%s1116_s1 + $0x4c] sm:$0xf]  ;;  %v677_v3 = vld [vmem:[%s1116_s1 + $0x58] sm:$0xf0]  ;;  %v672_v6 = vor.u32 %v777_v61, %v669_v63 }
  0x1b   : > { %437 = vmatpush.bf16.msra.mxu1 %v704_v45  ;;  %466 = vmatpush.bf16.msra.mxu2 %v708_v46  ;;  %v651_v5 = vld [vmem:[%s1116_s1 + $0x20] sm:$0xf]  ;;  %v676_v7 = vor.u32 %v780_v1, %v675_v0  ;;  %v775_v8 = vld [vmem:[%s1116_s1 + $0x2c] sm:$0xf0]  ;;  %v773_v9 = vld [vmem:[%s1116_s1 + $0x24] sm:$0xf]  ;;  %v680_v11 = vor.u32 %v778_v2, %v677_v3 }
  0x1c   : > { %495 = vmatpush.bf16.msra.mxu3 %v712_v50  ;;  %v653_v10 = vld [vmem:[%s1116_s1 + $0x30] sm:$0xf0]  ;;  %v659_v12 = vld [vmem:[%s1116_s1 + $0x28] sm:$0xf]  ;;  %v776_v13 = vld [vmem:[%s1116_s1 + $0x34] sm:$0xf0]  ;;  %v652_v16 = vor.u32 %v775_v8, %v651_v5 }
  0x1d   : > { %v774_v14 = vld [vmem:[%s1116_s1 + $0x2c] sm:$0xf]  ;;  %v661_v15 = vld [vmem:[%s1116_s1 + $0x38] sm:$0xf0]  ;;  %v635_v17 = vld [vmem:[%s1116_s1] sm:$0xf]  ;;  %v656_v18 = vor.u32 %v773_v9, %v653_v10  ;;  %v660_v19 = vor.u32 %v776_v13, %v659_v12 }
  0x1e   : > { %409 = vmatpush.bf16.msra.mxu0 %v684_v56  ;;  %s1120_s13 = smov (!%p161_p3, %s608_s13), 1  ;;  %v771_v20 = vld [vmem:[%s1116_s1 + $0xc] sm:$0xf0]  ;;  %v769_v21 = vld [vmem:[%s1116_s1 + $0x4] sm:$0xf]  ;;  %v664_v23 = vor.u32 %v774_v14, %v661_v15 }
  0x1f   : > { %438 = vmatpush.bf16.msra.mxu1 %v688_v57  ;;  %467 = vmatpush.bf16.msra.mxu2 %v692_v58  ;;  %v637_v22 = vld [vmem:[%s1116_s1 + $0x10] sm:$0xf0]  ;;  %v643_v24 = vld [vmem:[%s1116_s1 + $0x8] sm:$0xf]  ;;  %v772_v25 = vld [vmem:[%s1116_s1 + $0x14] sm:$0xf0]  ;;  %v636_v28 = vor.u32 %v771_v20, %v635_v17 }
  0x20   : > { %496 = vmatpush.bf16.msra.mxu3 %v696_v62  ;;  %s763_s11 = sshll.u32 %s1120_s13, 5  ;;  %v770_v26 = vld [vmem:[%s1116_s1 + $0xc] sm:$0xf]  ;;  %v645_v27 = vld [vmem:[%s1116_s1 + $0x18] sm:$0xf0]  ;;  %v640_v29 = vor.u32 %v769_v21, %v637_v22  ;;  %v644_v30 = vor.u32 %v772_v25, %v643_v24  ;;  %s764_s23 = sshll.u32 %s1120_s13, 7 }
  0x21   : > { %s165_s20 = scalar_lea.vmem %s1115_s0, %s763_s11  ;;  %v648_v31 = vor.u32 %v770_v26, %v645_v27  ;;  %v211_v36 = vld [vmem:[%s1117_s2] sm:$0xf]  ;;  %s1060_s26 = scalar_lea.vmem %s1118_s3, %s764_s23 }
  0x22   : > { %410 = vmatpush.bf16.msra.mxu0 %v668_v4  ;;  %v765_v32 = vld [vmem:[%s165_s20] sm:$0xff]  ;;  %v766_v33 = vld [vmem:[%s165_s20 + $0x8] sm:$0xff]  ;;  %v767_v34 = vld [vmem:[%s165_s20 + $0x10] sm:$0xff]  ;;  %v1050_v37 = vperm.slane %v211_v36, 0  ;;  %v1052_v38 = vperm.slane %v211_v36, 1  ;;  %v1062_v44 = vperm.slane %v211_v36, 2 }
  0x23   : > { %439 = vmatpush.bf16.msra.mxu1 %v672_v6  ;;  %468 = vmatpush.bf16.msra.mxu2 %v676_v7  ;;  %v768_v35 = vld [vmem:[%s165_s20 + $0x18] sm:$0xff]  ;;  %v1064_v45 = vperm.slane %v211_v36, 3 }
  0x24   : > { %497 = vmatpush.bf16.msra.mxu3 %v680_v11 }
  0x26   : > { %411 = vmatpush.bf16.msra.mxu0 %v652_v16 }
  0x27   : > { %440 = vmatpush.bf16.msra.mxu1 %v656_v18  ;;  %469 = vmatpush.bf16.msra.mxu2 %v660_v19 }
  0x28   : > { %498 = vmatpush.bf16.msra.mxu3 %v664_v23 }
  0x2a   : > { %412 = vmatpush.bf16.msra.mxu0 %v636_v28 }
  0x2b   : > { %441 = vmatpush.bf16.msra.mxu1 %v640_v29  ;;  %470 = vmatpush.bf16.msra.mxu2 %v644_v30 }
  0x2c   : > { %499 = vmatpush.bf16.msra.mxu3 %v648_v31 }
  0x2d   : > { %413 = vmatmul.bf16.vlgmr.msra.gmra.mxu0 %v765_v32 }
  0x2e   : > { %442 = vmatmul.bf16.vlgmr.msra.gmra.mxu1 %v765_v32  ;;  %471 = vmatmul.bf16.vlgmr.msra.gmra.mxu2 %v765_v32 }
  0x2f   : > { %500 = vmatmul.bf16.vlgmr.msra.gmra.mxu3 %v765_v32 }
  0x3d   : > { %418 = vmatmul.bf16.gmra.mxu0 %v766_v33 }
  0x3e   : > { %447 = vmatmul.bf16.gmra.mxu1 %v766_v33  ;;  %476 = vmatmul.bf16.gmra.mxu2 %v766_v33 }
  0x3f   : > { %505 = vmatmul.bf16.gmra.mxu3 %v766_v33 }
  0x4d   : > { %423 = vmatmul.bf16.gmra.mxu0 %v767_v34 }
  0x4e   : > { %452 = vmatmul.bf16.gmra.mxu1 %v767_v34  ;;  %481 = vmatmul.bf16.gmra.mxu2 %v767_v34 }
  0x4f   : > { %510 = vmatmul.bf16.gmra.mxu3 %v767_v34 }
  0x5d   : > { %428 = vmatmul.bf16.gmra.mxu0 %v768_v35 }
  0x5e   : > { %457 = vmatmul.bf16.gmra.mxu1 %v768_v35  ;;  %486 = vmatmul.bf16.gmra.mxu2 %v768_v35 }
  0x5f   : > { %515 = vmatmul.bf16.gmra.mxu3 %v768_v35 }
  0xaa   : > { %v414_v39 = vpop.f32.mrf.mxu0 }
  0xab   : > { %v415_v40 = vadd.f32 %v414_v39, %v1050_v37  ;;  %v443_v41 = vpop.f32.mrf.mxu1 }
  0xac   : > { %v444_v42 = vadd.f32 %v443_v41, %v1052_v38 }
  0xae   : > { %v521_v43 = vpack.c.bf16 %v444_v42, %v415_v40 }
  0xb0   : > { %537 = vst [vmem:[%s1060_s26] sm:$0xff] %v521_v43 }
  0xb1   : > { %v472_v46 = vpop.f32.mrf.mxu2 }
  0xb2   : > { %v473_v47 = vadd.f32 %v472_v46, %v1062_v44  ;;  %v501_v48 = vpop.f32.mrf.mxu3  ;;  %v416_v49 = vpop.f32.mrf.mxu0 }
  0xb3   : > { %v502_v50 = vadd.f32 %v501_v48, %v1064_v45  ;;  %v417_v51 = vadd.f32 %v416_v49, %v1050_v37  ;;  %v445_v52 = vpop.f32.mrf.mxu1 }
  0xb4   : > { %v446_v53 = vadd.f32 %v445_v52, %v1052_v38 }
  0xb5   : > { %v522_v54 = vpack.c.bf16 %v502_v50, %v473_v47 }
  0xb6   : > { %v523_v55 = vpack.c.bf16 %v446_v53, %v417_v51 }
  0xb7   : > { %538 = vst [vmem:[%s1060_s26 + $0x8] sm:$0xff] %v522_v54 }
  0xb8   : > { %539 = vst [vmem:[%s1060_s26 + $0x10] sm:$0xff] %v523_v55 }
  0xb9   : > { %v474_v56 = vpop.f32.mrf.mxu2 }
  0xba   : > { %v475_v57 = vadd.f32 %v474_v56, %v1062_v44  ;;  %v503_v58 = vpop.f32.mrf.mxu3  ;;  %v419_v59 = vpop.f32.mrf.mxu0 }
  0xbb   : > { %v504_v60 = vadd.f32 %v503_v58, %v1064_v45  ;;  %v420_v61 = vadd.f32 %v419_v59, %v1050_v37  ;;  %v448_v62 = vpop.f32.mrf.mxu1 }
  0xbc   : > { %v449_v63 = vadd.f32 %v448_v62, %v1052_v38 }
  0xbd   : > { %v524_v0 = vpack.c.bf16 %v504_v60, %v475_v57 }
  0xbe   : > { %v525_v1 = vpack.c.bf16 %v449_v63, %v420_v61 }
  0xbf   : > { %540 = vst [vmem:[%s1060_s26 + $0x18] sm:$0xff] %v524_v0 }
  0xc0   : > { %541 = vst [vmem:[%s1060_s26 + $0x20] sm:$0xff] %v525_v1 }
  0xc1   : > { %v477_v2 = vpop.f32.mrf.mxu2 }
  0xc2   : > { %v478_v3 = vadd.f32 %v477_v2, %v1062_v44  ;;  %v506_v4 = vpop.f32.mrf.mxu3  ;;  %v421_v5 = vpop.f32.mrf.mxu0 }
  0xc3   : > { %v507_v6 = vadd.f32 %v506_v4, %v1064_v45  ;;  %v422_v7 = vadd.f32 %v421_v5, %v1050_v37  ;;  %v450_v8 = vpop.f32.mrf.mxu1 }
  0xc4   : > { %v451_v9 = vadd.f32 %v450_v8, %v1052_v38 }
  0xc5   : > { %v526_v10 = vpack.c.bf16 %v507_v6, %v478_v3 }
  0xc6   : > { %v527_v11 = vpack.c.bf16 %v451_v9, %v422_v7 }
  0xc7   : > { %542 = vst [vmem:[%s1060_s26 + $0x28] sm:$0xff] %v526_v10 }
  0xc8   : > { %543 = vst [vmem:[%s1060_s26 + $0x30] sm:$0xff] %v527_v11 }
  0xc9   : > { %v479_v12 = vpop.f32.mrf.mxu2 }
  0xca   : > { %v480_v13 = vadd.f32 %v479_v12, %v1062_v44  ;;  %v508_v14 = vpop.f32.mrf.mxu3  ;;  %v424_v15 = vpop.f32.mrf.mxu0 }
  0xcb   : > { %v509_v16 = vadd.f32 %v508_v14, %v1064_v45  ;;  %v425_v17 = vadd.f32 %v424_v15, %v1050_v37  ;;  %v453_v18 = vpop.f32.mrf.mxu1 }
  0xcc   : > { %v454_v19 = vadd.f32 %v453_v18, %v1052_v38 }
  0xcd   : > { %v528_v20 = vpack.c.bf16 %v509_v16, %v480_v13 }
  0xce   : > { %v529_v21 = vpack.c.bf16 %v454_v19, %v425_v17 }
  0xcf   : > { %544 = vst [vmem:[%s1060_s26 + $0x38] sm:$0xff] %v528_v20 }
  0xd0   : > { %545 = vst [vmem:[%s1060_s26 + $0x40] sm:$0xff] %v529_v21 }
  0xd1   : > { %v482_v22 = vpop.f32.mrf.mxu2 }
  0xd2   : > { %v483_v23 = vadd.f32 %v482_v22, %v1062_v44  ;;  %v511_v24 = vpop.f32.mrf.mxu3  ;;  %v426_v25 = vpop.f32.mrf.mxu0 }
  0xd3   : > { %v512_v26 = vadd.f32 %v511_v24, %v1064_v45  ;;  %v427_v27 = vadd.f32 %v426_v25, %v1050_v37  ;;  %v455_v28 = vpop.f32.mrf.mxu1 }
  0xd4   : > { %v456_v29 = vadd.f32 %v455_v28, %v1052_v38 }
  0xd5   : > { %v530_v30 = vpack.c.bf16 %v512_v26, %v483_v23 }
  0xd6   : > { %v531_v31 = vpack.c.bf16 %v456_v29, %v427_v27 }
  0xd7   : > { %546 = vst [vmem:[%s1060_s26 + $0x48] sm:$0xff] %v530_v30 }
  0xd8   : > { %547 = vst [vmem:[%s1060_s26 + $0x50] sm:$0xff] %v531_v31 }
  0xd9   : > { %v484_v32 = vpop.f32.mrf.mxu2 }
  0xda   : > { %v485_v33 = vadd.f32 %v484_v32, %v1062_v44  ;;  %v513_v34 = vpop.f32.mrf.mxu3  ;;  %v429_v35 = vpop.f32.mrf.mxu0 }
  0xdb   : > { %v514_v36 = vadd.f32 %v513_v34, %v1064_v45  ;;  %v430_v39 = vadd.f32 %v429_v35, %v1050_v37  ;;  %v458_v40 = vpop.f32.mrf.mxu1 }
  0xdc   : > { %v459_v41 = vadd.f32 %v458_v40, %v1052_v38 }
  0xdd   : > { %v532_v42 = vpack.c.bf16 %v514_v36, %v485_v33 }
  0xde   : > { %v533_v43 = vpack.c.bf16 %v459_v41, %v430_v39 }
  0xdf   : > { %548 = vst [vmem:[%s1060_s26 + $0x58] sm:$0xff] %v532_v42 }
  0xe0   : > { %549 = vst [vmem:[%s1060_s26 + $0x60] sm:$0xff] %v533_v43 }
  0xe1   : > { %v487_v46 = vpop.f32.mrf.mxu2 }
  0xe2   : > { %v488_v47 = vadd.f32 %v487_v46, %v1062_v44  ;;  %v516_v48 = vpop.f32.mrf.mxu3  ;;  %v431_v49 = vpop.f32.mrf.mxu0 }
  0xe3   : > { %v517_v50 = vadd.f32 %v516_v48, %v1064_v45  ;;  %v432_v51 = vadd.f32 %v431_v49, %v1050_v37  ;;  %v460_v52 = vpop.f32.mrf.mxu1 }
  0xe4   : > { %v461_v53 = vadd.f32 %v460_v52, %v1052_v38 }
  0xe5   : > { %v534_v54 = vpack.c.bf16 %v517_v50, %v488_v47 }
  0xe6   : > { %v535_v55 = vpack.c.bf16 %v461_v53, %v432_v51 }
  0xe7   : > { %550 = vst [vmem:[%s1060_s26 + $0x68] sm:$0xff] %v534_v54 }
  0xe8   : > { %551 = vst [vmem:[%s1060_s26 + $0x70] sm:$0xff] %v535_v55 }
  0xe9   : > { %v489_v56 = vpop.f32.mrf.mxu2 }
  0xea   : > { %v490_v57 = vadd.f32 %v489_v56, %v1062_v44  ;;  %v518_v58 = vpop.f32.mrf.mxu3 }
  0xeb   : > { %v519_v59 = vadd.f32 %v518_v58, %v1064_v45 }
  0xed   : > { %v536_v60 = vpack.c.bf16 %v519_v59, %v490_v57 }
  0xef   : > { %552 = vst [vmem:[%s1060_s26 + $0x78] sm:$0xff] %v536_v60 }
  0xf0 PF: > { %s13_s12 = sadd.s32 1, %s815_s12  }
  0xf1   : > { %p10_p4 = scmp.ge.s32.totalorder %s13_s12, 4  }
  0xf3   :  { %12 = sbr.rel (!%p10_p4) target bundleno = 1 (0x1), region = 62 }

// kernel: upstep_forward.7
= control target key start
LH: loop header
LB: loop body
LE: loop exit
PB: predicated region body
PF: predicated region fallthrough
CT: control target
= control target key end

     0   :  { %s510_s15 = smov 0   ;;  %s781_s0 = inlined_call_operand.vmem [shape: f32[2,192,128], index: 0, kind: input, shape index: {}]   ;;  %s782_s1 = inlined_call_operand.vmem [shape: f32[2,2,128], index: 1, kind: input, shape index: {}]   ;;  %s783_s2 = inlined_call_operand.vmem [shape: f32[1,128], index: 2, kind: input, shape index: {}]   ;;  %s784_s3 = inlined_call_operand.vmem [shape: f32[1,128], index: 3, kind: input, shape index: {}]   ;;  %s785_s4 = inlined_call_operand.vmem [shape: f32[2,192,128], index: 4, kind: output, shape index: {}]  }
   0x1 LB: > { %s455_s16 = sadd.s32 4294967295, %s483_s15   ;;  %p459_p0 = scmp.ge.s32.totalorder %s483_s15, 1  ;;  %s483_s15 = sphi %s510_s15, %s14_s15  }
   0x2   : > { %p162_p1 = scmp.lt.s32.totalorder %s483_s15, 3 }
   0x4   : > { %p163_p2 = pnand %p459_p0, %p162_p1 }
   0x5   : > { %p188_p3 = scmp.lt.s32.totalorder (!%p163_p2), %s455_s16, 1 }
   0x6   : > { %166 = sbr.rel (%p163_p2) target bundleno = 79 (0x4f), region = 36 }
   0xb   : > { %v198_v0 = vld [vmem:[%s782_s1] sm:$0x3]  ;;  %v199_v1 = vld [vmem:[%s782_s1 + $0x2] sm:$0x3]  ;;  %vm200_vm0 = vcmask 1041408   ;;  %s789_s16 = smov (!%p188_p3, %s455_s16), 1 }
   0xc   : > { %v201_v2 = vsel %vm200_vm0, %v198_v0, 0.0  ;;  %v202_v3 = vsel %vm200_vm0, %v199_v1, 0.0  ;;  %s464_s21 = smul.u32 192, %s789_s16  ;;  %v630_v62 = vld [vmem:[%s783_s2] ss:$0 sm:$0xff] }
   0xd   : > { %v203_v4 = vadd.f32 %v202_v3, %v201_v2 }
   0xe   : > { %s532_s24 = scalar_lea.vmem %s781_s0, %s464_s21  ;;  %s676_s5 = scalar_lea.vmem %s785_s4, %s464_s21 }
   0xf   : > { %v204_v5 = vmul.f32 0.0034722222, %v203_v4  ;;  %v222_v13 = vld [vmem:[%s532_s24] sm:$0xff]  ;;  %v223_v16 = vld [vmem:[%s532_s24 + $0x8] sm:$0xff]  ;;  %v224_v17 = vld [vmem:[%s532_s24 + $0x10] sm:$0xff] }
  0x10   : > { %v225_v18 = vld [vmem:[%s532_s24 + $0x18] sm:$0xff]  ;;  %v226_v19 = vld [vmem:[%s532_s24 + $0x20] sm:$0xff]  ;;  %v227_v20 = vld [vmem:[%s532_s24 + $0x28] sm:$0xff] }
  0x11   : > { %v205_v6 = vmul.f32 %v204_v5, %v204_v5  ;;  %v535_v15 = vperm.slane %v204_v5, 0  ;;  %v228_v21 = vld [vmem:[%s532_s24 + $0x30] sm:$0xff]  ;;  %v229_v23 = vld [vmem:[%s532_s24 + $0x38] sm:$0xff]  ;;  %v545_v24 = vld [vmem:[%s532_s24 + $0x40] sm:$0xff] }
  0x12   : > { %v548_v25 = vld [vmem:[%s532_s24 + $0x48] sm:$0xff]  ;;  %v551_v26 = vld [vmem:[%s532_s24 + $0x50] sm:$0xff]  ;;  %v554_v27 = vld [vmem:[%s532_s24 + $0x58] sm:$0xff] }
  0x13   : > { %v207_v7 = vrot.slane %v205_v6, 7  ;;  %v557_v28 = vld [vmem:[%s532_s24 + $0x60] sm:$0xff]  ;;  %v247_v30 = vsub.f32 %v222_v13, %v535_v15  ;;  %v248_v31 = vsub.f32 %v223_v16, %v535_v15  ;;  %v249_v32 = vsub.f32 %v224_v17, %v535_v15  ;;  %v563_v33 = vld [vmem:[%s532_s24 + $0x68] sm:$0xff]  ;;  %v566_v34 = vld [vmem:[%s532_s24 + $0x70] sm:$0xff] }
  0x14   : > { %v569_v35 = vld [vmem:[%s532_s24 + $0x78] sm:$0xff]  ;;  %v250_v37 = vsub.f32 %v225_v18, %v535_v15  ;;  %v251_v38 = vsub.f32 %v226_v19, %v535_v15  ;;  %v252_v39 = vsub.f32 %v227_v20, %v535_v15  ;;  %v253_v40 = vsub.f32 %v228_v21, %v535_v15  ;;  %v581_v41 = vld [vmem:[%s532_s24 + $0x80] sm:$0xff]  ;;  %v584_v42 = vld [vmem:[%s532_s24 + $0x88] sm:$0xff] }
  0x15   : > { %v209_v8 = vsub.f32 %v204_v5, %v207_v7  ;;  %v254_v44 = vsub.f32 %v229_v23, %v535_v15  ;;  %v255_v45 = vsub.f32 %v545_v24, %v535_v15  ;;  %v256_v46 = vsub.f32 %v548_v25, %v535_v15  ;;  %v592_v47 = vld [vmem:[%s532_s24 + $0x90] sm:$0xff]  ;;  %v595_v48 = vld [vmem:[%s532_s24 + $0x98] sm:$0xff]  ;;  %v598_v49 = vld [vmem:[%s532_s24 + $0xa0] sm:$0xff] }
  0x16   : > { %v257_v50 = vsub.f32 %v551_v26, %v535_v15  ;;  %v258_v51 = vsub.f32 %v554_v27, %v535_v15  ;;  %v259_v52 = vsub.f32 %v557_v28, %v535_v15  ;;  %v260_v53 = vsub.f32 %v563_v33, %v535_v15  ;;  %v609_v54 = vld [vmem:[%s532_s24 + $0xa8] sm:$0xff]  ;;  %v612_v55 = vld [vmem:[%s532_s24 + $0xb0] sm:$0xff]  ;;  %v615_v56 = vld [vmem:[%s532_s24 + $0xb8] sm:$0xff] }
  0x17   : > { %v210_v9 = vmax.f32 %v209_v8, 0.0  ;;  %v261_v58 = vsub.f32 %v566_v34, %v535_v15  ;;  %v262_v59 = vsub.f32 %v569_v35, %v535_v15  ;;  %v263_v60 = vsub.f32 %v581_v41, %v535_v15  ;;  %v650_v7 = vld [vmem:[%s784_s3] ss:$0 sm:$0xff] }
  0x18   : > { %v264_v63 = vsub.f32 %v584_v42, %v535_v15  ;;  %v265_v0 = vsub.f32 %v592_v47, %v535_v15  ;;  %v266_v1 = vsub.f32 %v595_v48, %v535_v15  ;;  %v267_v2 = vsub.f32 %v598_v49, %v535_v15 }
  0x19   : > { %v211_v10 = vadd.f32 1e-05, %v210_v9  ;;  %v268_v3 = vsub.f32 %v609_v54, %v535_v15  ;;  %v269_v4 = vsub.f32 %v612_v55, %v535_v15  ;;  %v270_v5 = vsub.f32 %v615_v56, %v535_v15 }
  0x1b   : > { %475 = vrsqrt.f32 %v211_v10  ;;  %vm218_vm1 = vweird.f32 %v211_v10 }
  0x21   : > { %v476_v11 = vpop.eup %475 }
  0x22   : > { %v213_v12 = vmul.f32 %v476_v11, %v211_v10  ;;  %vm219_vm2 = vweird.f32 %v476_v11 }
  0x23   : > { %vm572_vm3 = vmor %vm218_vm1, %vm219_vm2 }
  0x24   : > { %v214_v14 = vmul.f32 %v476_v11, %v213_v12 }
  0x26   : > { %v215_v22 = vmul.f32 0.5, %v214_v14 }
  0x28   : > { %v216_v29 = vsub.f32 1.5, %v215_v22 }
  0x2a   : > { %v217_v43 = vmul.f32 %v476_v11, %v216_v29 }
  0x2c   : > { %v221_v57 = vsel %vm572_vm3, %v476_v11, %v217_v43 }
  0x2d   : > { %v625_v61 = vperm.slane %v221_v57, 1 }
  0x2f   : > { %v272_v6 = vmul.f32 %v625_v61, %v247_v30  ;;  %v273_v8 = vmul.f32 %v625_v61, %v248_v31  ;;  %v274_v9 = vmul.f32 %v625_v61, %v249_v32  ;;  %v275_v10 = vmul.f32 %v625_v61, %v250_v37 }
  0x30   : > { %v276_v11 = vmul.f32 %v625_v61, %v251_v38  ;;  %v277_v12 = vmul.f32 %v625_v61, %v252_v39  ;;  %v278_v13 = vmul.f32 %v625_v61, %v253_v40  ;;  %v279_v14 = vmul.f32 %v625_v61, %v254_v44 }
  0x31   : > { %v300_v16 = vmul.f32 %v630_v62, %v272_v6  ;;  %v301_v17 = vmul.f32 %v630_v62, %v273_v8  ;;  %v302_v18 = vmul.f32 %v630_v62, %v274_v9  ;;  %v303_v19 = vmul.f32 %v630_v62, %v275_v10 }
  0x32   : > { %v304_v20 = vmul.f32 %v630_v62, %v276_v11  ;;  %v305_v21 = vmul.f32 %v630_v62, %v277_v12  ;;  %v306_v22 = vmul.f32 %v630_v62, %v278_v13  ;;  %v307_v23 = vmul.f32 %v630_v62, %v279_v14 }
  0x33   : > { %v328_v24 = vadd.f32 %v650_v7, %v300_v16  ;;  %v329_v25 = vadd.f32 %v650_v7, %v301_v17  ;;  %v330_v26 = vadd.f32 %v650_v7, %v302_v18  ;;  %v331_v27 = vadd.f32 %v650_v7, %v303_v19 }
  0x34   : > { %v332_v28 = vadd.f32 %v650_v7, %v304_v20  ;;  %v333_v29 = vadd.f32 %v650_v7, %v305_v21  ;;  %v334_v30 = vadd.f32 %v650_v7, %v306_v22  ;;  %v335_v31 = vadd.f32 %v650_v7, %v307_v23 }
  0x35   : > { %v352_v32 = vmax.f32 %v328_v24, 0.0  ;;  %v353_v33 = vmax.f32 %v329_v25, 0.0  ;;  %v354_v34 = vmax.f32 %v330_v26, 0.0  ;;  %v355_v35 = vmax.f32 %v331_v27, 0.0 }
  0x36   : > { %v356_v36 = vmax.f32 %v332_v28, 0.0  ;;  %v357_v37 = vmax.f32 %v333_v29, 0.0  ;;  %v358_v38 = vmax.f32 %v334_v30, 0.0  ;;  %v359_v39 = vmax.f32 %v335_v31, 0.0 }
  0x37   : > { %376 = vst [vmem:[%s676_s5] sm:$0xff] %v352_v32  ;;  %v280_v40 = vmul.f32 %v625_v61, %v255_v45  ;;  %v281_v43 = vmul.f32 %v625_v61, %v256_v46  ;;  %v282_v44 = vmul.f32 %v625_v61, %v257_v50  ;;  %v283_v57 = vmul.f32 %v625_v61, %v258_v51 }
  0x38   : > { %377 = vst [vmem:[%s676_s5 + $0x8] sm:$0xff] %v353_v33  ;;  %v284_v6 = vmul.f32 %v625_v61, %v259_v52  ;;  %v285_v8 = vmul.f32 %v625_v61, %v260_v53  ;;  %v286_v9 = vmul.f32 %v625_v61, %v261_v58  ;;  %v287_v10 = vmul.f32 %v625_v61, %v262_v59 }
  0x39   : > { %378 = vst [vmem:[%s676_s5 + $0x10] sm:$0xff] %v354_v34  ;;  %v308_v45 = vmul.f32 %v630_v62, %v280_v40  ;;  %v309_v46 = vmul.f32 %v630_v62, %v281_v43  ;;  %v310_v50 = vmul.f32 %v630_v62, %v282_v44  ;;  %v311_v51 = vmul.f32 %v630_v62, %v283_v57 }
  0x3a   : > { %379 = vst [vmem:[%s676_s5 + $0x18] sm:$0xff] %v355_v35  ;;  %v312_v52 = vmul.f32 %v630_v62, %v284_v6  ;;  %v313_v53 = vmul.f32 %v630_v62, %v285_v8  ;;  %v314_v58 = vmul.f32 %v630_v62, %v286_v9  ;;  %v315_v59 = vmul.f32 %v630_v62, %v287_v10 }
  0x3b   : > { %380 = vst [vmem:[%s676_s5 + $0x20] sm:$0xff] %v356_v36  ;;  %v336_v11 = vadd.f32 %v650_v7, %v308_v45  ;;  %v337_v12 = vadd.f32 %v650_v7, %v309_v46  ;;  %v338_v13 = vadd.f32 %v650_v7, %v310_v50  ;;  %v339_v14 = vadd.f32 %v650_v7, %v311_v51 }
  0x3c   : > { %381 = vst [vmem:[%s676_s5 + $0x28] sm:$0xff] %v357_v37  ;;  %v340_v16 = vadd.f32 %v650_v7, %v312_v52  ;;  %v341_v17 = vadd.f32 %v650_v7, %v313_v53  ;;  %v342_v18 = vadd.f32 %v650_v7, %v314_v58  ;;  %v343_v19 = vadd.f32 %v650_v7, %v315_v59 }
  0x3d   : > { %382 = vst [vmem:[%s676_s5 + $0x30] sm:$0xff] %v358_v38  ;;  %v360_v20 = vmax.f32 %v336_v11, 0.0  ;;  %v361_v21 = vmax.f32 %v337_v12, 0.0  ;;  %v362_v22 = vmax.f32 %v338_v13, 0.0  ;;  %v363_v23 = vmax.f32 %v339_v14, 0.0 }
  0x3e   : > { %383 = vst [vmem:[%s676_s5 + $0x38] sm:$0xff] %v359_v39  ;;  %v364_v24 = vmax.f32 %v340_v16, 0.0  ;;  %v365_v25 = vmax.f32 %v341_v17, 0.0  ;;  %v366_v26 = vmax.f32 %v342_v18, 0.0  ;;  %v367_v27 = vmax.f32 %v343_v19, 0.0 }
  0x3f   : > { %384 = vst [vmem:[%s676_s5 + $0x40] sm:$0xff] %v360_v20  ;;  %v288_v28 = vmul.f32 %v625_v61, %v263_v60  ;;  %v289_v29 = vmul.f32 %v625_v61, %v264_v63  ;;  %v290_v30 = vmul.f32 %v625_v61, %v265_v0  ;;  %v291_v31 = vmul.f32 %v625_v61, %v266_v1 }
  0x40   : > { %385 = vst [vmem:[%s676_s5 + $0x48] sm:$0xff] %v361_v21  ;;  %v292_v41 = vmul.f32 %v625_v61, %v267_v2  ;;  %v293_v42 = vmul.f32 %v625_v61, %v268_v3  ;;  %v294_v47 = vmul.f32 %v625_v61, %v269_v4  ;;  %v295_v48 = vmul.f32 %v625_v61, %v270_v5 }
  0x41   : > { %386 = vst [vmem:[%s676_s5 + $0x50] sm:$0xff] %v362_v22  ;;  %v316_v49 = vmul.f32 %v630_v62, %v288_v28  ;;  %v317_v60 = vmul.f32 %v630_v62, %v289_v29  ;;  %v318_v54 = vmul.f32 %v630_v62, %v290_v30  ;;  %v319_v63 = vmul.f32 %v630_v62, %v291_v31 }
  0x42   : > { %387 = vst [vmem:[%s676_s5 + $0x58] sm:$0xff] %v363_v23  ;;  %v320_v55 = vmul.f32 %v630_v62, %v292_v41  ;;  %v321_v0 = vmul.f32 %v630_v62, %v293_v42  ;;  %v322_v15 = vmul.f32 %v630_v62, %v294_v47  ;;  %v323_v56 = vmul.f32 %v630_v62, %v295_v48 }
  0x43   : > { %388 = vst [vmem:[%s676_s5 + $0x60] sm:$0xff] %v364_v24  ;;  %v344_v61 = vadd.f32 %v650_v7, %v316_v49  ;;  %v345_v1 = vadd.f32 %v650_v7, %v317_v60  ;;  %v346_v2 = vadd.f32 %v650_v7, %v318_v54  ;;  %v347_v3 = vadd.f32 %v650_v7, %v319_v63 }
  0x44   : > { %389 = vst [vmem:[%s676_s5 + $0x68] sm:$0xff] %v365_v25  ;;  %v348_v4 = vadd.f32 %v650_v7, %v320_v55  ;;  %v349_v5 = vadd.f32 %v650_v7, %v321_v0  ;;  %v350_v34 = vadd.f32 %v650_v7, %v322_v15  ;;  %v351_v36 = vadd.f32 %v650_v7, %v323_v56 }
  0x45   : > { %390 = vst [vmem:[%s676_s5 + $0x70] sm:$0xff] %v366_v26  ;;  %v368_v62 = vmax.f32 %v344_v61, 0.0  ;;  %v369_v32 = vmax.f32 %v345_v1, 0.0  ;;  %v370_v33 = vmax.f32 %v346_v2, 0.0  ;;  %v371_v35 = vmax.f32 %v347_v3, 0.0 }
  0x46   : > { %391 = vst [vmem:[%s676_s5 + $0x78] sm:$0xff] %v367_v27  ;;  %v372_v37 = vmax.f32 %v348_v4, 0.0  ;;  %v373_v38 = vmax.f32 %v349_v5, 0.0  ;;  %v374_v39 = vmax.f32 %v350_v34, 0.0  ;;  %v375_v40 = vmax.f32 %v351_v36, 0.0 }
  0x47   : > { %392 = vst [vmem:[%s676_s5 + $0x80] sm:$0xff] %v368_v62 }
  0x48   : > { %393 = vst [vmem:[%s676_s5 + $0x88] sm:$0xff] %v369_v32 }
  0x49   : > { %394 = vst [vmem:[%s676_s5 + $0x90] sm:$0xff] %v370_v33 }
  0x4a   : > { %395 = vst [vmem:[%s676_s5 + $0x98] sm:$0xff] %v371_v35 }
  0x4b   : > { %396 = vst [vmem:[%s676_s5 + $0xa0] sm:$0xff] %v372_v37 }
  0x4c   : > { %397 = vst [vmem:[%s676_s5 + $0xa8] sm:$0xff] %v373_v38 }
  0x4d   : > { %398 = vst [vmem:[%s676_s5 + $0xb0] sm:$0xff] %v374_v39 }
  0x4e   : > { %399 = vst [vmem:[%s676_s5 + $0xb8] sm:$0xff] %v375_v40 }
  0x4f PF: > { %s14_s15 = sadd.s32 1, %s483_s15  }
  0x50   : > { %p11_p4 = scmp.ge.s32.totalorder %s14_s15, 4  }
  0x52   :  { %13 = sbr.rel (!%p11_p4) target bundleno = 1 (0x1), region = 66 }

// kernel: upstep_forward.5
= control target key start
LH: loop header
LB: loop body
LE: loop exit
PB: predicated region body
PF: predicated region fallthrough
CT: control target
= control target key end

     0   :  { %s3915_s12 = smov 0   ;;  %s4755_s0 = inlined_call_operand.vmem [shape: bf16[2,264,128], index: 0, kind: input, shape index: {}]   ;;  %s4756_s1 = inlined_call_operand.vmem [shape: bf16[9,128,128], index: 1, kind: input, shape index: {}]   ;;  %s4757_s2 = inlined_call_operand.vmem [shape: f32[1,128], index: 2, kind: input, shape index: {}]   ;;  %s4758_s3 = inlined_call_operand.vmem [shape: bf16[2,232,128], index: 3, kind: output, shape index: {}]  }
   0x1 LB: > { %s2912_s13 = sadd.s32 4294967295, %s3892_s12   ;;  %p2916_p0 = scmp.ge.s32.totalorder %s3892_s12, 1  ;;  %s3892_s12 = sphi %s3915_s12, %s13_s12  }
   0x2   : > { %p137_p1 = scmp.lt.s32.totalorder %s3892_s12, 3 }
   0x4   : > { %p138_p2 = pnand %p2916_p0, %p137_p1 }
   0x6   : > { %141 = sbr.rel (%p138_p2) target bundleno = 693 (0x2b5), region = 32 }
   0xb   : > { %v3633_v0 = vld [vmem:[%s4756_s1 + $0x78] sm:$0xff]  ;;  %p161_p3 = scmp.lt.s32.totalorder %s2912_s13, 1  ;;  %v3632_v1 = vld [vmem:[%s4756_s1 + $0x70] sm:$0xff]  ;;  %v3631_v2 = vld [vmem:[%s4756_s1 + $0x68] sm:$0xff]  ;;  %vm307_vm0 = vsmask.f32 7424 }
   0xc   : > { %486 = vmatpush.bf16.msra.mxu0 %v3633_v0  ;;  %3850 = vmatpush.bf16.msra.mxu1 %v3633_v0  ;;  %v3630_v3 = vld [vmem:[%s4756_s1 + $0x60] sm:$0xff]  ;;  %v3629_v4 = vld [vmem:[%s4756_s1 + $0x58] sm:$0xff]  ;;  %v3628_v11 = vld [vmem:[%s4756_s1 + $0x50] sm:$0xff]  ;;  %vm727_vm1 = vcmask 1046528  }
   0xd   : > { %3852 = vmatpush.bf16.msra.mxu3 %v3633_v0  ;;  %3851 = vmatpush.bf16.msra.mxu2 %v3633_v0  ;;  %s4775_s13 = smov (!%p161_p3, %s2912_s13), 1  ;;  %v3627_v20 = vld [vmem:[%s4756_s1 + $0x48] sm:$0xff]  ;;  %v3626_v31 = vld [vmem:[%s4756_s1 + $0x40] sm:$0xff]  ;;  %v3625_v38 = vld [vmem:[%s4756_s1 + $0x38] sm:$0xff] }
   0xe   : > { %s3874_s20 = smul.u32 132, %s4775_s13  ;;  %v3663_v39 = vld [vmem:[%s4756_s1 + $0xf8] sm:$0xff]  ;;  %v3624_v46 = vld [vmem:[%s4756_s1 + $0x30] sm:$0xff]  ;;  %v3623_v54 = vld [vmem:[%s4756_s1 + $0x28] sm:$0xff] }
   0xf   : > { %v3684_v40 = vld [vmem:[%s4756_s1 + $0x138] sm:$0xff]  ;;  %v3662_v48 = vld [vmem:[%s4756_s1 + $0xf0] sm:$0xff]  ;;  %v3661_v56 = vld [vmem:[%s4756_s1 + $0xe8] sm:$0xff]  ;;  %s3875_s17 = smul.u32 116, %s4775_s13 }
  0x10   : > { %487 = vmatpush.bf16.msra.mxu0 %v3632_v1  ;;  %3853 = vmatpush.bf16.msra.mxu1 %v3632_v1  ;;  %s3941_s25 = scalar_lea.vmem %s4755_s0, %s3874_s20  ;;  %v3641_v47 = vld [vmem:[%s4756_s1 + $0xb8] sm:$0xff]  ;;  %v3683_v49 = vld [vmem:[%s4756_s1 + $0x130] sm:$0xff]  ;;  %v3682_v57 = vld [vmem:[%s4756_s1 + $0x128] sm:$0xff] }
  0x11   : > { %3855 = vmatpush.bf16.msra.mxu3 %v3632_v1  ;;  %3854 = vmatpush.bf16.msra.mxu2 %v3632_v1  ;;  %v3947_v5 = vld [vmem:[%s3941_s25] sm:$0xff]   ;;  %v3953_v7 = vld [vmem:[%s3941_s25 + $0x50] sm:$0xff]  ;;  %v3956_v8 = vld [vmem:[%s3941_s25 + $0x8] sm:$0xff]  ;;  %s4600_s20 = scalar_lea.vmem %s4758_s3, %s3875_s17 }
  0x12   : > { %v3950_v6 = vld [vmem:[%s3941_s25 + $0x20] sm:$0xff]  ;;  %v311_v9 = vshll.u32 %v3947_v5, 16  ;;  %v3960_v10 = vld [vmem:[%s3941_s25 + $0x28] sm:$0xff]  ;;  %v3970_v14 = vld [vmem:[%s3941_s25 + $0x58] sm:$0xff]  ;;  %v388_v15 = vshll.u32 %v3953_v7, 16  ;;  %v309_v16 = vshrl.u32 %v3947_v5, 16 }
  0x13   : > { %v340_v12 = vshll.u32 %v3950_v6, 16  ;;  %v3967_v13 = vld [vmem:[%s3941_s25 + $0x40] sm:$0xff]  ;;  %v316_v18 = vshll.u32 %v3956_v8, 16  ;;  %v348_v19 = vshll.u32 %v3960_v10, 16  ;;  %v344_v22 = vshrl.u32 %v3950_v6, 16  ;;  %v3983_v23 = vld [vmem:[%s3941_s25 + $0x48] sm:$0xff] }
  0x14   : > { %488 = vmatpush.bf16.msra.mxu0 %v3631_v2  ;;  %3856 = vmatpush.bf16.msra.mxu1 %v3631_v2  ;;  %v313_v17 = vrot.slane %v311_v9, 1  ;;  %v372_v24 = vshll.u32 %v3967_v13, 16  ;;  %v3986_v25 = vrot.slane %v388_v15, 1  ;;  %v392_v26 = vshrl.u32 %v3953_v7, 16  ;;  %v4031_v50 = vld [vmem:[%s3941_s25 + $0x10] sm:$0xff]  ;;  %v4038_v53 = vld [vmem:[%s3941_s25 + $0x60] sm:$0xff] }
  0x15   : > { %3858 = vmatpush.bf16.msra.mxu3 %v3631_v2  ;;  %3857 = vmatpush.bf16.msra.mxu2 %v3631_v2  ;;  %v3979_v21 = vrot.slane %v340_v12, 1  ;;  %v396_v27 = vshll.u32 %v3970_v14, 16  ;;  %v3990_v29 = vrot.slane %v316_v18, 1  ;;  %v3992_v30 = vrot.slane %v348_v19, 1  ;;  %v4034_v51 = vld [vmem:[%s3941_s25 + $0x30] sm:$0xff]  ;;  %v3622_v0 = vld [vmem:[%s4756_s1 + $0x20] sm:$0xff] }
  0x16   : > { %v314_v28 = vor.u32 %v313_v17, %v309_v16  ;;  %v3998_v33 = vrot.slane %v372_v24, 1  ;;  %v376_v34 = vshrl.u32 %v3967_v13, 16  ;;  %v380_v35 = vshll.u32 %v3983_v23, 16  ;;  %v3640_v55 = vld [vmem:[%s4756_s1 + $0xb0] sm:$0xff]  ;;  %v3639_v1 = vld [vmem:[%s4756_s1 + $0xa8] sm:$0xff]  ;;  %v3660_v2 = vld [vmem:[%s4756_s1 + $0xe0] sm:$0xff] }
  0x17   : > { %v346_v32 = vor.u32 %v344_v22, %v3979_v21  ;;  %v394_v36 = vor.u32 %v392_v26, %v3986_v25  ;;  %v398_v37 = vrot.slane %v396_v27, 1  ;;  %v320_v58 = vshrl.u32 %v3956_v8, 16  ;;  %v3621_v18 = vld [vmem:[%s4756_s1 + $0x18] sm:$0xff]  ;;  %v3638_v19 = vld [vmem:[%s4756_s1 + $0xa0] sm:$0xff] }
  0x18   : > { %489 = vmatpush.bf16.msra.mxu0 %v3630_v3  ;;  %3859 = vmatpush.bf16.msra.mxu1 %v3630_v3  ;;  %v319_v41 = vsel %vm307_vm0, %v314_v28, %v3990_v29  ;;  %v378_v43 = vor.u32 %v376_v34, %v3998_v33  ;;  %v382_v44 = vrot.slane %v380_v35, 1  ;;  %v324_v59 = vshll.u32 %v4031_v50, 16  ;;  %v3680_v22 = vld [vmem:[%s4756_s1 + $0x118] sm:$0xff] }
  0x19   : > { %3861 = vmatpush.bf16.msra.mxu3 %v3630_v3  ;;  %3860 = vmatpush.bf16.msra.mxu2 %v3630_v3  ;;  %v351_v42 = vsel %vm307_vm0, %v346_v32, %v3992_v30  ;;  %v399_v45 = vsel %vm307_vm0, %v394_v36, %v398_v37  ;;  %v352_v60 = vshrl.u32 %v3960_v10, 16  ;;  %v356_v61 = vshll.u32 %v4034_v51, 16  ;;  %v3681_v3 = vld [vmem:[%s4756_s1 + $0x120] sm:$0xff]  ;;  %v4098_v32 = vld [vmem:[%s3941_s25 + $0x18] sm:$0xff]  ;;  %v3679_v36 = vld [vmem:[%s4756_s1 + $0x110] sm:$0xff] }
  0x1a   : > { %v383_v52 = vsel %vm307_vm0, %v378_v43, %v382_v44  ;;  %v400_v62 = vshrl.u32 %v3970_v14, 16  ;;  %v404_v63 = vshll.u32 %v4038_v53, 16  ;;  %v326_v9 = vrot.slane %v324_v59, 1  ;;  %v4101_v34 = vld [vmem:[%s3941_s25 + $0x38] sm:$0xff] }
  0x1b   : > { %v358_v12 = vrot.slane %v356_v61, 1  ;;  %v384_v15 = vshrl.u32 %v3983_v23, 16  ;;  %v360_v43 = vshrl.u32 %v4034_v51, 16 }
  0x1c   : > { %490 = vmatpush.bf16.msra.mxu0 %v3629_v4  ;;  %3862 = vmatpush.bf16.msra.mxu1 %v3629_v4  ;;  %v402_v16 = vor.u32 %v400_v62, %v398_v37  ;;  %v406_v17 = vrot.slane %v404_v63, 1  ;;  %v4109_v37 = vld [vmem:[%s3941_s25 + $0x68] sm:$0xff]  ;;  %v3634_v63 = vld [vmem:[%s4756_s1 + $0x80] sm:$0xff] }
  0x1d   : > { %3864 = vmatpush.bf16.msra.mxu3 %v3629_v4  ;;  %3863 = vmatpush.bf16.msra.mxu2 %v3629_v4  ;;  %v322_v4 = vor.u32 %v320_v58, %v3990_v29  ;;  %v386_v27 = vor.u32 %v384_v15, %v382_v44  ;;  %v3637_v29 = vld [vmem:[%s4756_s1 + $0x98] sm:$0xff]  ;;  %v364_v44 = vshll.u32 %v4101_v34, 16  ;;  %v362_v58 = vor.u32 %v360_v43, %v358_v12 }
  0x1e   : > { %v407_v28 = vsel %vm307_vm0, %v402_v16, %v406_v17  ;;  %v3735_v16 = vld [vmem:[%s4756_s1 + $0x1f8] sm:$0xff] }
  0x1f   : > { %v327_v24 = vsel %vm307_vm0, %v322_v4, %v326_v9  ;;  %v391_v35 = vsel %vm307_vm0, %v386_v27, %v3986_v25  ;;  %v3657_v25 = vld [vmem:[%s4756_s1 + $0xc8] sm:$0xff]  ;;  %v366_v59 = vrot.slane %v364_v44, 1 }
  0x20   : > { %491 = vmatpush.bf16.msra.mxu0 %v3628_v11  ;;  %3865 = vmatpush.bf16.msra.mxu1 %v3628_v11 }
  0x21   : > { %3867 = vmatpush.bf16.msra.mxu3 %v3628_v11  ;;  %3866 = vmatpush.bf16.msra.mxu2 %v3628_v11  ;;  %v354_v11 = vor.u32 %v352_v60, %v3992_v30  ;;  %v3620_v30 = vld [vmem:[%s4756_s1 + $0x10] sm:$0xff] }
  0x23   : > { %v359_v26 = vsel %vm307_vm0, %v354_v11, %v358_v12 }
  0x24   : > { %492 = vmatpush.bf16.msra.mxu0 %v3627_v20  ;;  %3868 = vmatpush.bf16.msra.mxu1 %v3627_v20 }
  0x25   : > { %3870 = vmatpush.bf16.msra.mxu3 %v3627_v20  ;;  %3869 = vmatpush.bf16.msra.mxu2 %v3627_v20  ;;  %v3659_v20 = vld [vmem:[%s4756_s1 + $0xd8] sm:$0xff] }
  0x28   : > { %493 = vmatpush.bf16.msra.mxu0 %v3626_v31  ;;  %3871 = vmatpush.bf16.msra.mxu1 %v3626_v31 }
  0x29   : > { %3873 = vmatpush.bf16.msra.mxu3 %v3626_v31  ;;  %3872 = vmatpush.bf16.msra.mxu2 %v3626_v31  ;;  %v3658_v31 = vld [vmem:[%s4756_s1 + $0xd0] sm:$0xff] }
  0x2b   : > { %494 = vmatmul.bf16.vlgmr.msra.gmra.mxu0 %v319_v41  ;;  %514 = vmatmul.bf16.vlgmr.msra.gmra.mxu1 %v351_v42  ;;  %v328_v41 = vshrl.u32 %v4031_v50, 16  ;;  %v332_v42 = vshll.u32 %v4098_v32, 16 }
  0x2c   : > { %627 = vmatpush.bf16.msrb.mxu1 %v3625_v38  ;;  %1507 = vmatpush.bf16.msrb.mxu0 %v3684_v40  ;;  %v3636_v38 = vld [vmem:[%s4756_s1 + $0x90] sm:$0xff]  ;;  %v3678_v40 = vld [vmem:[%s4756_s1 + $0x108] sm:$0xff] }
  0x2d   : > { %1103 = vmatpush.bf16.msrb.mxu3 %v3663_v39  ;;  %819 = vmatpush.bf16.msrb.mxu2 %v3641_v47  ;;  %v3619_v39 = vld [vmem:[%s4756_s1 + $0x8] sm:$0xff]  ;;  %v412_v47 = vshll.u32 %v4109_v37, 16 }
  0x2e   : > { %544 = vmatmul.bf16.vlgmr.msra.gmra.mxu3 %v399_v45  ;;  %534 = vmatmul.bf16.vlgmr.msra.gmra.mxu2 %v383_v52  ;;  %v408_v45 = vshrl.u32 %v4038_v53, 16  ;;  %v3618_v52 = vld [vmem:[%s4756_s1] sm:$0xff] }
  0x2f   : > { %v414_v62 = vrot.slane %v412_v47, 1 }
  0x30   : > { %628 = vmatpush.bf16.msrb.mxu1 %v3624_v46  ;;  %1508 = vmatpush.bf16.msrb.mxu0 %v3683_v49  ;;  %v3635_v46 = vld [vmem:[%s4756_s1 + $0x88] sm:$0xff]  ;;  %v3827_v49 = vld [vmem:[%s3941_s25] sm:$0xe]  ;;  %v410_v61 = vor.u32 %v408_v45, %v406_v17  ;;  %v3692_v17 = vld [vmem:[%s4756_s1 + $0x178] sm:$0xff] }
  0x31   : > { %1104 = vmatpush.bf16.msrb.mxu3 %v3662_v48  ;;  %820 = vmatpush.bf16.msrb.mxu2 %v3640_v55  ;;  %v3826_v48 = vld [vmem:[%s3941_s25] sm:$0xf0] }
  0x32   : > { %v3677_v55 = vld [vmem:[%s4756_s1 + $0x100] sm:$0xff]  ;;  %v3828_v60 = vor.u32 %v3827_v49, %v3826_v48  ;;  %v415_v11 = vsel %vm307_vm0, %v410_v61, %v414_v62  ;;  %v3642_v48 = vld [vmem:[%s3941_s25 + $0x8] sm:$0xff] }
  0x34   : > { %629 = vmatpush.bf16.msrb.mxu1 %v3623_v54  ;;  %1509 = vmatpush.bf16.msrb.mxu0 %v3682_v57  ;;  %v3656_v54 = vld [vmem:[%s4756_s1 + $0xc0] sm:$0xff]  ;;  %v334_v57 = vrot.slane %v332_v42, 1  ;;  %v728_v4 = vrot.slane %v3828_v60, 1  ;;  %v3691_v42 = vld [vmem:[%s4756_s1 + $0x170] sm:$0xff] }
  0x35   : > { %1105 = vmatpush.bf16.msrb.mxu3 %v3661_v56  ;;  %821 = vmatpush.bf16.msrb.mxu2 %v3639_v1  ;;  %v330_v56 = vor.u32 %v328_v41, %v326_v9  ;;  %v3714_v1 = vld [vmem:[%s4756_s1 + $0x1b8] sm:$0xff]  ;;  %v729_v9 = vrot.slane %v3956_v8, 1 }
  0x37   : > { %v730_v15 = vsel %vm727_vm1, %v728_v4, %v729_v9 }
  0x38   : > { %630 = vmatpush.bf16.msrb.mxu1 %v3622_v0  ;;  %1510 = vmatpush.bf16.msrb.mxu0 %v3681_v3  ;;  %v216_v0 = vld [vmem:[%s3941_s25 + $0x70] sm:$0x1]  ;;  %v367_v3 = vsel %vm307_vm0, %v362_v58, %v366_v59 }
  0x39   : > { %1106 = vmatpush.bf16.msrb.mxu3 %v3660_v2  ;;  %822 = vmatpush.bf16.msrb.mxu2 %v3638_v19  ;;  %v335_v2 = vsel %vm307_vm0, %v330_v56, %v334_v57  ;;  %v291_v12 = vunpack.c.l.b16 %v216_v0  ;;  %v3742_v56 = vld [vmem:[%s4756_s1 + $0x230] sm:$0xff] }
  0x3b   : > { %499 = vmatmul.bf16.gmra.mxu0 %v327_v24  ;;  %519 = vmatmul.bf16.gmra.mxu1 %v359_v26  ;;  %v4164_v19 = vpack.c.b16 %v291_v12, %v291_v12  ;;  %v416_v24 = vshrl.u32 %v4109_v37, 16  ;;  %v3644_v12 = vld [vmem:[%s3941_s25 + $0x18] sm:$0xff] }
  0x3c   : > { %631 = vmatpush.bf16.msrb.mxu1 %v3621_v18  ;;  %1511 = vmatpush.bf16.msrb.mxu0 %v3680_v22  ;;  %v3743_v18 = vld [vmem:[%s4756_s1 + $0x238] sm:$0xff]  ;;  %v368_v22 = vshrl.u32 %v4101_v34, 16 }
  0x3d   : > { %1107 = vmatpush.bf16.msrb.mxu3 %v3659_v20  ;;  %823 = vmatpush.bf16.msrb.mxu2 %v3637_v29  ;;  %v336_v20 = vshrl.u32 %v4098_v32, 16  ;;  %v420_v26 = vshll.u32 %v4164_v19, 16  ;;  %v418_v29 = vor.u32 %v416_v24, %v414_v62  ;;  %v735_v62 = vrot.slane %v3950_v6, 1 }
  0x3e   : > { %549 = vmatmul.bf16.gmra.mxu3 %v407_v28  ;;  %539 = vmatmul.bf16.gmra.mxu2 %v391_v35  ;;  %v370_v28 = vor.u32 %v368_v22, %v366_v59 }
  0x3f   : > { %v338_v27 = vor.u32 %v336_v20, %v334_v57  ;;  %v3741_v20 = vld [vmem:[%s4756_s1 + $0x228] sm:$0xff] }
  0x40   : > { %632 = vmatpush.bf16.msrb.mxu1 %v3620_v30  ;;  %1512 = vmatpush.bf16.msrb.mxu0 %v3679_v36  ;;  %v422_v30 = vrot.slane %v420_v26, 1  ;;  %v375_v35 = vsel %vm307_vm0, %v370_v28, %v3998_v33  ;;  %v731_v36 = vrot.slane %v4031_v50, 1  ;;  %v3734_v33 = vld [vmem:[%s4756_s1 + $0x1f0] sm:$0xff] }
  0x41   : > { %1108 = vmatpush.bf16.msrb.mxu3 %v3658_v31  ;;  %824 = vmatpush.bf16.msrb.mxu2 %v3636_v38  ;;  %v343_v31 = vsel %vm307_vm0, %v338_v27, %v3979_v21  ;;  %v3713_v21 = vld [vmem:[%s4756_s1 + $0x1b0] sm:$0xff] }
  0x42   : > { %v423_v38 = vsel %vm307_vm0, %v418_v29, %v422_v30  ;;  %v732_v41 = vsel %vm727_vm1, %v729_v9, %v731_v36  ;;  %v739_v29 = vrot.slane %v4034_v51, 1  ;;  %v4241_v30 = vld [vmem:[%s3941_s25 + $0x30] sm:$0xff] }
  0x44   : > { %633 = vmatpush.bf16.msrb.mxu1 %v3619_v39  ;;  %1513 = vmatpush.bf16.msrb.mxu0 %v3678_v40  ;;  %v3829_v39 = vld [vmem:[%s3941_s25 + $0x8] sm:$0xff]  }
  0x45   : > { %1109 = vmatpush.bf16.msrb.mxu3 %v3657_v25  ;;  %825 = vmatpush.bf16.msrb.mxu2 %v3635_v46  ;;  %v4178_v25 = vld [vmem:[%s3941_s25 + $0x10] sm:$0xff]  ;;  %v1332_v40 = vshll.u32 %v3829_v39, 16  ;;  %v1330_v43 = vshrl.u32 %v3829_v39, 16  ;;  %v3689_v39 = vld [vmem:[%s4756_s1 + $0x160] sm:$0xff] }
  0x46   : > { %v1337_v45 = vshll.u32 %v4178_v25, 16  ;;  %v1341_v57 = vshrl.u32 %v4178_v25, 16 }
  0x47   : > { %v1334_v44 = vrot.slane %v1332_v40, 1 }
  0x48   : > { %634 = vmatpush.bf16.msrb.mxu1 %v3618_v52  ;;  %1514 = vmatpush.bf16.msrb.mxu0 %v3677_v55  ;;  %v1339_v47 = vrot.slane %v1337_v45, 1  ;;  %v733_v52 = vrot.slane %v4098_v32, 1  ;;  %v741_v45 = vrot.slane %v4101_v34, 1 }
  0x49   : > { %1110 = vmatpush.bf16.msrb.mxu3 %v3656_v54  ;;  %826 = vmatpush.bf16.msrb.mxu2 %v3634_v63  ;;  %v1335_v46 = vor.u32 %v1334_v44, %v1330_v43  ;;  %v4196_v54 = vld [vmem:[%s3941_s25 + $0x18] sm:$0xff]  ;;  %v4209_v63 = vld [vmem:[%s3941_s25 + $0x20] sm:$0xff]  ;;  %v3646_v43 = vld [vmem:[%s3941_s25 + $0x28] sm:$0xff] }
  0x4a   : > { %v734_v55 = vsel %vm727_vm1, %v731_v36, %v733_v52  ;;  %v1345_v58 = vshll.u32 %v4196_v54, 16  ;;  %v1343_v59 = vor.u32 %v1341_v57, %v1339_v47  ;;  %v736_v0 = vsel %vm727_vm1, %v733_v52, %v735_v62  ;;  %v3732_v36 = vld [vmem:[%s4756_s1 + $0x1e0] sm:$0xff] }
  0x4b   : > { %504 = vmatmul.bf16.gmra.mxu0 %v335_v2  ;;  %524 = vmatmul.bf16.gmra.mxu1 %v367_v3  ;;  %v1340_v49 = vsel %vm307_vm0, %v1335_v46, %v1339_v47  ;;  %v3733_v2 = vld [vmem:[%s4756_s1 + $0x1e8] sm:$0xff]  ;;  %v1349_v3 = vshrl.u32 %v4196_v54, 16  ;;  %v1353_v4 = vshll.u32 %v4209_v63, 16  ;;  %v1357_v22 = vshrl.u32 %v4209_v63, 16  ;;  %v4267_v46 = vld [vmem:[%s3941_s25 + $0x38] sm:$0xff] }
  0x4c   : > { %1726 = vmatpush.bf16.msra.mxu1 %v3692_v17  ;;  %2633 = vmatpush.bf16.msra.mxu0 %v3743_v18  ;;  %v1347_v60 = vrot.slane %v1345_v58, 1  ;;  %v4228_v17 = vld [vmem:[%s3941_s25 + $0x28] sm:$0xff]  ;;  %v742_v47 = vsel %vm727_vm1, %v739_v29, %v741_v45 }
  0x4d   : > { %2010 = vmatpush.bf16.msra.mxu2 %v3714_v1  ;;  %2414 = vmatpush.bf16.msra.mxu3 %v3735_v16  ;;  %v3712_v1 = vld [vmem:[%s4756_s1 + $0x1a8] sm:$0xff]  ;;  %v737_v16 = vrot.slane %v3960_v10, 1  ;;  %v1361_v24 = vshll.u32 %v4228_v17, 16 }
  0x4e   : > { %554 = vmatmul.bf16.gmra.mxu3 %v415_v11  ;;  %827 = vmatmul.bf16.vlgmr.msrb.gmra.mxu2 %v730_v15  ;;  %v1348_v61 = vsel %vm307_vm0, %v1343_v59, %v1347_v60  ;;  %v1351_v9 = vor.u32 %v1349_v3, %v1347_v60  ;;  %v1355_v11 = vrot.slane %v1353_v4, 1  ;;  %v3731_v4 = vld [vmem:[%s4756_s1 + $0x1d8] sm:$0xff] }
  0x4f   : > { %v738_v18 = vsel %vm727_vm1, %v735_v62, %v737_v16  ;;  %v1363_v27 = vrot.slane %v1361_v24, 1 }
  0x50   : > { %1727 = vmatpush.bf16.msra.mxu1 %v3691_v42  ;;  %2634 = vmatpush.bf16.msra.mxu0 %v3742_v56  ;;  %v1356_v15 = vsel %vm307_vm0, %v1351_v9, %v1355_v11  ;;  %v1359_v26 = vor.u32 %v1357_v22, %v1355_v11  ;;  %v1377_v56 = vshll.u32 %v4267_v46, 16  ;;  %v3688_v9 = vld [vmem:[%s4756_s1 + $0x158] sm:$0xff] }
  0x51   : > { %2011 = vmatpush.bf16.msra.mxu2 %v3713_v21  ;;  %2415 = vmatpush.bf16.msra.mxu3 %v3734_v33  ;;  %v3740_v21 = vld [vmem:[%s4756_s1 + $0x220] sm:$0xff] }
  0x52   : > { %v1364_v28 = vsel %vm307_vm0, %v1359_v26, %v1363_v27  ;;  %v1379_v58 = vrot.slane %v1377_v56, 1 }
  0x54   : > { %2635 = vmatpush.bf16.msra.mxu0 %v3741_v20 }
  0x55   : > { %2012 = vmatpush.bf16.msra.mxu2 %v3712_v1  ;;  %2416 = vmatpush.bf16.msra.mxu3 %v3733_v2  ;;  %v3710_v1 = vld [vmem:[%s4756_s1 + $0x198] sm:$0xff] }
  0x58   : > { %2636 = vmatpush.bf16.msra.mxu0 %v3740_v21 }
  0x59   : > { %2417 = vmatpush.bf16.msra.mxu3 %v3732_v36  ;;  %v4331_v36 = vld [vmem:[%s3941_s25 + $0x48] sm:$0xff] }
  0x5a   : > { %4762 = vst [vmem:[#allocation2_spill] sm:$0xff] %v4331_v36  ;;  %v1393_v21 = vshll.u32 %v4331_v36, 16 }
  0x5b   : > { %509 = vmatmul.bf16.gmra.mxu0 %v343_v31  ;;  %529 = vmatmul.bf16.gmra.mxu1 %v375_v35  ;;  %v740_v31 = vsel %vm727_vm1, %v737_v16, %v739_v29  ;;  %v3711_v35 = vld [vmem:[%s4756_s1 + $0x1a0] sm:$0xff] }
  0x5c   : > { %2013 = vmatpush.bf16.msra.mxu2 %v3711_v35 }
  0x5d   : > { %2418 = vmatpush.bf16.msra.mxu3 %v3731_v4 }
  0x5e   : > { %559 = vmatmul.bf16.gmra.mxu3 %v423_v38  ;;  %832 = vmatmul.bf16.gmra.mxu2 %v732_v41  ;;  %v1365_v38 = vshrl.u32 %v4228_v17, 16 }
  0x60   : > { %v1367_v40 = vor.u32 %v1365_v38, %v1363_v27  ;;  %2014 = vmatpush.bf16.msra.mxu2 %v3710_v1 }
  0x6b   : > { %635 = vmatmul.bf16.vlgmr.msrb.gmra.mxu1 %v3947_v5  ;;  %1515 = vmatmul.bf16.vlgmr.msrb.gmra.mxu0 %v1340_v49  ;;  %v3643_v5 = vld [vmem:[%s3941_s25 + $0x10] sm:$0xff] }
  0x6e   : > { %1111 = vmatmul.bf16.vlgmr.msrb.gmra.mxu3 %v3642_v48  ;;  %837 = vmatmul.bf16.gmra.mxu2 %v734_v55  ;;  %v1373_v55 = vshrl.u32 %v4241_v30, 16 }
  0x7b   : > { %640 = vmatmul.bf16.gmra.mxu1 %v3956_v8  ;;  %1520 = vmatmul.bf16.gmra.mxu0 %v1348_v61  ;;  %v3690_v8 = vld [vmem:[%s4756_s1 + $0x168] sm:$0xff]  ;;  %v3647_v61 = vld [vmem:[%s3941_s25 + $0x30] sm:$0xff] }
  0x7c   : > { %1728 = vmatpush.bf16.msra.mxu1 %v3690_v8  ;;  %v4296_v8 = vld [vmem:[%s3941_s25 + $0x40] sm:$0xff] }
  0x7d   : > { %v1385_v16 = vshll.u32 %v4296_v8, 16 }
  0x7e   : > { %1116 = vmatmul.bf16.gmra.mxu3 %v3643_v5  ;;  %842 = vmatmul.bf16.gmra.mxu2 %v736_v0  ;;  %v743_v0 = vrot.slane %v3967_v13, 1 }
  0x7f   : > { %v1387_v24 = vrot.slane %v1385_v16, 1 }
  0x80   : > { %1729 = vmatpush.bf16.msra.mxu1 %v3689_v39  ;;  %v744_v3 = vsel %vm727_vm1, %v741_v45, %v743_v0  ;;  %v1395_v45 = vrot.slane %v1393_v21, 1  ;;  %v3650_v21 = vld [vmem:[%s3941_s25 + $0x48] sm:$0xff] }
  0x84   : > { %1730 = vmatpush.bf16.msra.mxu1 %v3688_v9 }
  0x8b   : > { %645 = vmatmul.bf16.gmra.mxu1 %v4031_v50  ;;  %1525 = vmatmul.bf16.gmra.mxu0 %v1356_v15  ;;  %v3645_v50 = vld [vmem:[%s3941_s25 + $0x20] sm:$0xff]  ;;  %v1381_v15 = vshrl.u32 %v4267_v46, 16 }
  0x8d   : > { %v1383_v22 = vor.u32 %v1381_v15, %v1379_v58 }
  0x8e   : > { %1121 = vmatmul.bf16.gmra.mxu3 %v3644_v12  ;;  %847 = vmatmul.bf16.gmra.mxu2 %v738_v18  ;;  %v3739_v18 = vld [vmem:[%s4756_s1 + $0x218] sm:$0xff] }
  0x8f   : > { %2637 = vmatpush.bf16.msra.mxu0 %v3739_v18  ;;  %v1388_v29 = vsel %vm307_vm0, %v1383_v22, %v1387_v24  ;;  %v1397_v18 = vshrl.u32 %v4331_v36, 16  ;;  %v751_v36 = vrot.slane %v4038_v53, 1 }
  0x9b   : > { %650 = vmatmul.bf16.gmra.mxu1 %v4098_v32  ;;  %1530 = vmatmul.bf16.gmra.mxu0 %v1364_v28  ;;  %v1369_v32 = vshll.u32 %v4241_v30, 16  ;;  %v3648_v28 = vld [vmem:[%s3941_s25 + $0x38] sm:$0xff] }
  0x9d   : > { %v1371_v41 = vrot.slane %v1369_v32, 1 }
  0x9e   : > { %1126 = vmatmul.bf16.gmra.mxu3 %v3645_v50  ;;  %852 = vmatmul.bf16.gmra.mxu2 %v740_v31  ;;  %v745_v31 = vrot.slane %v3983_v23, 1 }
  0x9f   : > { %v1372_v44 = vsel %vm307_vm0, %v1367_v40, %v1371_v41  ;;  %v1375_v57 = vor.u32 %v1373_v55, %v1371_v41  ;;  %v1389_v41 = vshrl.u32 %v4296_v8, 16 }
  0xa0   : > { %v746_v38 = vsel %vm727_vm1, %v743_v0, %v745_v31  ;;  %v3687_v0 = vld [vmem:[%s4756_s1 + $0x150] sm:$0xff] }
  0xa1   : > { %v1380_v62 = vsel %vm307_vm0, %v1375_v57, %v1379_v58  ;;  %v3649_v57 = vld [vmem:[%s3941_s25 + $0x40] sm:$0xff]  ;;  %1731 = vmatpush.bf16.msra.mxu1 %v3687_v0  ;;  %v4384_v0 = vld [vmem:[%s3941_s25 + $0x58] sm:$0xff] }
  0xa8   : > { %v4258_v33 = vpop.f32.mrf.mxu0  ;;  %v4260_v42 = vpop.f32.mrf.mxu1 }
  0xab   : > { %655 = vmatmul.bf16.gmra.mxu1 %v3950_v6  ;;  %1535 = vmatmul.bf16.gmra.mxu0 %v1372_v44  ;;  %v1391_v44 = vor.u32 %v1389_v41, %v1387_v24 }
  0xad   : > { %v1396_v58 = vsel %vm307_vm0, %v1391_v44, %v1395_v45  ;;  %v749_v44 = vrot.slane %v3970_v14, 1 }
  0xae   : > { %1131 = vmatmul.bf16.gmra.mxu3 %v3646_v43  ;;  %857 = vmatmul.bf16.gmra.mxu2 %v742_v47 }
  0xb0   : > { %v4272_v49 = vpop.f32.mrf.mxu0  ;;  %v4274_v52 = vpop.f32.mrf.mxu1 }
  0xb1   : > { %v4270_v48 = vpop.f32.mrf.mxu3  ;;  %v4278_v6 = vpop.f32.mrf.mxu2 }
  0xb8   : > { %v4282_v60 = vpop.f32.mrf.mxu0  ;;  %v4284_v5 = vpop.f32.mrf.mxu1 }
  0xb9   : > { %v4280_v59 = vpop.f32.mrf.mxu3  ;;  %v4292_v2 = vpop.f32.mrf.mxu2 }
  0xbb   : > { %660 = vmatmul.bf16.gmra.mxu1 %v3960_v10  ;;  %1540 = vmatmul.bf16.gmra.mxu0 %v1380_v62  ;;  %v3730_v62 = vld [vmem:[%s4756_s1 + $0x1d0] sm:$0xff] }
  0xbc   : > { %2419 = vmatpush.bf16.msra.mxu3 %v3730_v62 }
  0xbe   : > { %1136 = vmatmul.bf16.gmra.mxu3 %v3647_v61  ;;  %862 = vmatmul.bf16.gmra.mxu2 %v744_v3  ;;  %v747_v61 = vrot.slane %v3953_v7, 1  ;;  %v4362_v3 = vld [vmem:[%s3941_s25 + $0x50] sm:$0xff] }
  0xbf   : > { %4764 = vst [vmem:[#allocation4_spill] sm:$0xff] %v4362_v3  ;;  %v1401_v22 = vshll.u32 %v4362_v3, 16 }
  0xc0   : > { %v4307_v10 = vpop.f32.mrf.mxu0  ;;  %v4309_v12 = vpop.f32.mrf.mxu1  ;;  %v748_v4 = vsel %vm727_vm1, %v745_v31, %v747_v61 }
  0xc1   : > { %v4305_v11 = vpop.f32.mrf.mxu3  ;;  %v4316_v20 = vpop.f32.mrf.mxu2 }
  0xc8   : > { %v4320_v27 = vpop.f32.mrf.mxu0  ;;  %v4322_v50 = vpop.f32.mrf.mxu1 }
  0xc9   : > { %v4318_v26 = vpop.f32.mrf.mxu3  ;;  %v4327_v35 = vpop.f32.mrf.mxu2 }
  0xcb   : > { %665 = vmatmul.bf16.gmra.mxu1 %v4034_v51  ;;  %1545 = vmatmul.bf16.gmra.mxu0 %v1388_v29  ;;  %v3709_v51 = vld [vmem:[%s4756_s1 + $0x190] sm:$0xff]  ;;  %v1403_v29 = vrot.slane %v1401_v22, 1 }
  0xcc   : > { %2015 = vmatpush.bf16.msra.mxu2 %v3709_v51 }
  0xce   : > { %1141 = vmatmul.bf16.gmra.mxu3 %v3648_v28  ;;  %867 = vmatmul.bf16.gmra.mxu2 %v746_v38  ;;  %v1399_v28 = vor.u32 %v1397_v18, %v1395_v45  ;;  %v750_v45 = vsel %vm727_vm1, %v747_v61, %v749_v44  ;;  %v3686_v61 = vld [vmem:[%s4756_s1 + $0x148] sm:$0xff] }
  0xcf   : > { %1732 = vmatpush.bf16.msra.mxu1 %v3686_v61 }
  0xd0   : > { %v4336_v39 = vpop.f32.mrf.mxu0  ;;  %v4338_v40 = vpop.f32.mrf.mxu1  ;;  %v1404_v51 = vsel %vm307_vm0, %v1399_v28, %v1403_v29  ;;  %v1405_v28 = vshrl.u32 %v4362_v3, 16  ;;  %v3651_v3 = vld [vmem:[%s3941_s25 + $0x50] sm:$0xff] }
  0xd1   : > { %v4334_v32 = vpop.f32.mrf.mxu3  ;;  %v828_v43 = vpop.f32.mrf.mxu2 }
  0xd8   : > { %v4347_v55 = vpop.f32.mrf.mxu0  ;;  %v4349_v56 = vpop.f32.mrf.mxu1 }
  0xd9   : > { %v4345_v47 = vpop.f32.mrf.mxu3  ;;  %v830_v1 = vpop.f32.mrf.mxu2 }
  0xda   : > { %4763 = vst [vmem:[#allocation3_spill] sm:$0xff] %v4345_v47 }
  0xdb   : > { %670 = vmatmul.bf16.gmra.mxu1 %v4101_v34  ;;  %1550 = vmatmul.bf16.gmra.mxu0 %v1396_v58  ;;  %v3738_v34 = vld [vmem:[%s4756_s1 + $0x210] sm:$0xff] }
  0xdc   : > { %2638 = vmatpush.bf16.msra.mxu0 %v3738_v34 }
  0xde   : > { %1146 = vmatmul.bf16.gmra.mxu3 %v3649_v57  ;;  %872 = vmatmul.bf16.gmra.mxu2 %v748_v4 }
  0xe0   : > { %v4367_v15 = vpop.f32.mrf.mxu0  ;;  %v4369_v16 = vpop.f32.mrf.mxu1 }
  0xe1   : > { %v4365_v9 = vpop.f32.mrf.mxu3  ;;  %v833_v24 = vpop.f32.mrf.mxu2 }
  0xe2   : > { %4765 = vst [vmem:[#allocation5_spill] sm:$0xff] %v4365_v9 }
  0xe8   : > { %v636_v38 = vpop.f32.mrf.mxu1  ;;  %v1516_v41 = vpop.f32.mrf.mxu0 }
  0xe9   : > { %v4376_v31 = vpop.f32.mrf.mxu3  ;;  %v637_v57 = vadd.f32 %v636_v38, %v4258_v33  ;;  %v835_v58 = vpop.f32.mrf.mxu2 }
  0xea   : > { %4766 = vst [vmem:[#allocation6_spill] sm:$0xff] %v4376_v31  ;;  %v1409_v31 = vshll.u32 %v4384_v0, 16 }
  0xeb   : > { %675 = vmatmul.bf16.gmra.mxu1 %v3967_v13  ;;  %1555 = vmatmul.bf16.gmra.mxu0 %v1404_v51  ;;  %v898_v62 = vadd.f32 %v828_v43, %v637_v57  ;;  %v3708_v13 = vld [vmem:[%s4756_s1 + $0x188] sm:$0xff] }
  0xec   : > { %v3729_v43 = vld [vmem:[%s4756_s1 + $0x1c8] sm:$0xff]  ;;  %2016 = vmatpush.bf16.msra.mxu2 %v3708_v13  ;;  %v1411_v57 = vrot.slane %v1409_v31, 1  ;;  %v752_v31 = vsel %vm727_vm1, %v749_v44, %v751_v36 }
  0xed   : > { %2420 = vmatpush.bf16.msra.mxu3 %v3729_v43 }
  0xee   : > { %1151 = vmatmul.bf16.gmra.mxu3 %v3650_v21  ;;  %877 = vmatmul.bf16.gmra.mxu2 %v750_v45 }
  0xf0   : > { %v638_v22 = vpop.f32.mrf.mxu1  ;;  %v1518_v34 = vpop.f32.mrf.mxu0 }
  0xf1   : > { %v1112_v4 = vpop.f32.mrf.mxu3  ;;  %v639_v33 = vadd.f32 %v638_v22, %v4272_v49  ;;  %v838_v38 = vpop.f32.mrf.mxu2  ;;  %v1407_v49 = vor.u32 %v1405_v28, %v1403_v29  ;;  %v4409_v29 = vld [vmem:[%s3941_s25 + $0x60] sm:$0xff]  ;;  %v3737_v28 = vld [vmem:[%s4756_s1 + $0x208] sm:$0xff] }
  0xf2   : > { %v1182_v18 = vadd.f32 %v1112_v4, %v898_v62  ;;  %2639 = vmatpush.bf16.msra.mxu0 %v3737_v28 }
  0xf3   : > { %v899_v51 = vadd.f32 %v830_v1, %v639_v33  ;;  %v1412_v9 = vsel %vm307_vm0, %v1407_v49, %v1411_v57 }
  0xf4   : > { %v4399_v21 = vadd.f32 %v1516_v41, %v1182_v18 }
  0xf8   : > { %v641_v4 = vpop.f32.mrf.mxu1  ;;  %v1521_v22 = vpop.f32.mrf.mxu0 }
  0xf9   : > { %v1114_v62 = vpop.f32.mrf.mxu3  ;;  %v642_v47 = vadd.f32 %v641_v4, %v4282_v60  ;;  %v840_v41 = vpop.f32.mrf.mxu2  ;;  %v3652_v4 = vld [vmem:[%s3941_s25 + $0x58] sm:$0xff] }
  0xfa   : > { %v1183_v45 = vadd.f32 %v1114_v62, %v899_v51 }
  0xfb   : > { %680 = vmatmul.bf16.gmra.mxu1 %v3983_v23  ;;  %1560 = vmatmul.bf16.gmra.mxu0 %v1412_v9  ;;  %v900_v1 = vadd.f32 %v833_v24, %v642_v47  ;;  %v1413_v23 = vshrl.u32 %v4384_v0, 16  ;;  %v1417_v47 = vshll.u32 %v4409_v29, 16 }
  0xfc   : > { %v4405_v18 = vadd.f32 %v1518_v34, %v1183_v45 }
  0xfd   : > { %v1415_v43 = vor.u32 %v1413_v23, %v1411_v57  ;;  %v1419_v61 = vrot.slane %v1417_v47, 1  ;;  %v4428_v57 = vld [vmem:[%s3941_s25 + $0x68] sm:$0xff]  ;;  %v1421_v47 = vshrl.u32 %v4409_v29, 16 }
  0xfe   : > { %1156 = vmatmul.bf16.gmra.mxu3 %v3651_v3  ;;  %882 = vmatmul.bf16.gmra.mxu2 %v752_v31  ;;  %v753_v31 = vrot.slane %v4109_v37, 1 }
 0x100   : > { %v643_v34 = vpop.f32.mrf.mxu1  ;;  %v1523_v13 = vpop.f32.mrf.mxu0 }
 0x101   : > { %v1117_v33 = vpop.f32.mrf.mxu3  ;;  %v644_v3 = vadd.f32 %v643_v34, %v4307_v10  ;;  %v843_v9 = vpop.f32.mrf.mxu2 }
 0x102   : > { %v1184_v60 = vadd.f32 %v1117_v33, %v900_v1  ;;  %v1420_v1 = vsel %vm307_vm0, %v1415_v43, %v1419_v61 }
 0x103   : > { %v901_v44 = vadd.f32 %v835_v58, %v644_v3  ;;  %v3685_v3 = vld [vmem:[%s4756_s1 + $0x140] sm:$0xff] }
 0x104   : > { %v4418_v24 = vadd.f32 %v1521_v22, %v1184_v60  ;;  %v754_v22 = vsel %vm727_vm1, %v751_v36, %v753_v31  ;;  %v3707_v60 = vld [vmem:[%s4756_s1 + $0x180] sm:$0xff]  ;;  %1733 = vmatpush.bf16.msra.mxu1 %v3685_v3 }
 0x105   : > { %2017 = vmatpush.bf16.msra.mxu2 %v3707_v60  ;;  %v755_v60 = vrot.slane %v4164_v19, 1 }
 0x107   : > { %v756_v19 = vsel %vm727_vm1, %v753_v31, %v755_v60  ;;  %v1238_v31 = vld [vmem:[%s3941_s25 + $0x78] sm:$0x1]  ;;  %v3654_v60 = vld [vmem:[%s3941_s25 + $0x68] sm:$0xff] }
 0x108   : > { %v646_v62 = vpop.f32.mrf.mxu1  ;;  %v1526_v45 = vpop.f32.mrf.mxu0 }
 0x109   : > { %v1119_v51 = vpop.f32.mrf.mxu3  ;;  %v647_v28 = vadd.f32 %v646_v62, %v4320_v27  ;;  %v845_v33 = vpop.f32.mrf.mxu2 }
 0x10a   : > { %v1185_v49 = vadd.f32 %v1119_v51, %v901_v44 }
 0x10b   : > { %685 = vmatmul.bf16.gmra.mxu1 %v3953_v7  ;;  %1565 = vmatmul.bf16.gmra.mxu0 %v1420_v1  ;;  %v902_v58 = vadd.f32 %v838_v38, %v647_v28  ;;  %v1425_v7 = vshll.u32 %v4428_v57, 16  ;;  %v3728_v38 = vld [vmem:[%s4756_s1 + $0x1c0] sm:$0xff] }
 0x10c   : > { %v4424_v10 = vadd.f32 %v1523_v13, %v1185_v49  ;;  %2421 = vmatpush.bf16.msra.mxu3 %v3728_v38  ;;  %v1423_v49 = vor.u32 %v1421_v47, %v1419_v61 }
 0x10d   : > { %v1427_v62 = vrot.slane %v1425_v7, 1 }
 0x10e   : > { %1161 = vmatmul.bf16.gmra.mxu3 %v3652_v4  ;;  %887 = vmatmul.bf16.gmra.mxu2 %v754_v22  ;;  %v3653_v22 = vld [vmem:[%s3941_s25 + $0x60] sm:$0xff] }
 0x110   : > { %v648_v23 = vpop.f32.mrf.mxu1  ;;  %v1528_v13 = vpop.f32.mrf.mxu0 }
 0x111   : > { %v1122_v34 = vpop.f32.mrf.mxu3  ;;  %v649_v36 = vadd.f32 %v648_v23, %v4336_v39  ;;  %v848_v44 = vpop.f32.mrf.mxu2  ;;  %v1428_v39 = vsel %vm307_vm0, %v1423_v49, %v1427_v62  ;;  %v4456_v23 = vld [vmem:[%s3941_s25 + $0x70] sm:$0xff] }
 0x112   : > { %v1186_v27 = vadd.f32 %v1122_v34, %v902_v58  ;;  %v3736_v34 = vld [vmem:[%s4756_s1 + $0x200] sm:$0xff] }
 0x113   : > { %v903_v51 = vadd.f32 %v840_v41, %v649_v36  ;;  %2640 = vmatpush.bf16.msra.mxu0 %v3736_v34  ;;  %v1429_v36 = vshrl.u32 %v4428_v57, 16 }
 0x114   : > { %v4443_v43 = vadd.f32 %v1526_v45, %v1186_v27 }
 0x115   : > { %v1431_v49 = vor.u32 %v1429_v36, %v1427_v62  ;;  %v3693_v62 = vld [vmem:[%s3941_s25 + $0x10] sm:$0xff] }
 0x118   : > { %v651_v28 = vpop.f32.mrf.mxu1  ;;  %v1531_v58 = vpop.f32.mrf.mxu0 }
 0x119   : > { %v1124_v4 = vpop.f32.mrf.mxu3  ;;  %v652_v45 = vadd.f32 %v651_v28, %v4347_v55  ;;  %v850_v41 = vpop.f32.mrf.mxu2 }
 0x11a   : > { %v1187_v1 = vadd.f32 %v1124_v4, %v903_v51 }
 0x11b   : > { %690 = vmatmul.bf16.gmra.mxu1 %v3970_v14  ;;  %1570 = vmatmul.bf16.gmra.mxu0 %v1428_v39  ;;  %v904_v27 = vadd.f32 %v843_v9, %v652_v45  ;;  %v1313_v45 = vunpack.c.l.b16 %v1238_v31 }
 0x11c   : > { %v4452_v61 = vadd.f32 %v1528_v13, %v1187_v1  ;;  %v1433_v13 = vshll.u32 %v4456_v23, 16 }
 0x11e   : > { %1166 = vmatmul.bf16.gmra.mxu3 %v3653_v22  ;;  %892 = vmatmul.bf16.gmra.mxu2 %v756_v19  ;;  %v1435_v4 = vrot.slane %v1433_v13, 1 }
 0x120   : > { %v653_v38 = vpop.f32.mrf.mxu1  ;;  %v1533_v55 = vpop.f32.mrf.mxu0  ;;  %v1436_v34 = vsel %vm307_vm0, %v1431_v49, %v1435_v4 }
 0x121   : > { %v1127_v47 = vpop.f32.mrf.mxu3  ;;  %v654_v14 = vadd.f32 %v653_v38, %v4367_v15  ;;  %v853_v3 = vpop.f32.mrf.mxu2 }
 0x122   : > { %v1188_v7 = vadd.f32 %v1127_v47, %v904_v27 }
 0x123   : > { %v905_v51 = vadd.f32 %v845_v33, %v654_v14 }
 0x124   : > { %v4462_v9 = vadd.f32 %v1531_v58, %v1188_v7  ;;  %v4472_v58 = vpack.c.b16 %v1313_v45, %v1313_v45 }
 0x126   : > { %4767 = vst [vmem:[#allocation7_spill] sm:$0xff] %v4472_v58 }
 0x128   : > { %v656_v22 = vpop.f32.mrf.mxu1  ;;  %v1536_v39 = vpop.f32.mrf.mxu0 }
 0x129   : > { %v1129_v1 = vpop.f32.mrf.mxu3  ;;  %v657_v27 = vadd.f32 %v656_v22, %v4260_v42  ;;  %v855_v19 = vpop.f32.mrf.mxu2  ;;  %v1437_v42 = vshrl.u32 %v4456_v23, 16 }
 0x12a   : > { %v1189_v28 = vadd.f32 %v1129_v1, %v905_v51 }
 0x12b   : > { %695 = vmatmul.bf16.gmra.mxu1 %v4038_v53  ;;  %1575 = vmatmul.bf16.gmra.mxu0 %v1436_v34  ;;  %v906_v33 = vadd.f32 %v848_v44, %v657_v27  ;;  %v1439_v51 = vor.u32 %v1437_v42, %v1435_v4  ;;  %v3694_v27 = vld [vmem:[%s3941_s25 + $0x18] sm:$0xff]  ;;  %v3835_v42 = vld [vmem:[%s3941_s25 + $0x10] sm:$0xe] }
 0x12c   : > { %v4468_v15 = vadd.f32 %v1533_v55, %v1189_v28  ;;  %v1441_v55 = vshll.u32 %v4472_v58, 16 }
 0x12e   : > { %1171 = vmatmul.bf16.gmra.mxu3 %v3654_v60  ;;  %2018 = vmatmul.bf16.vlgmr.msra.gmra.mxu2 %v3693_v62  ;;  %v1443_v49 = vrot.slane %v1441_v55, 1  ;;  %v3655_v60 = vld [vmem:[%s3941_s25 + $0x70] sm:$0xff]  ;;  %v4489_v62 = vld [vmem:[%s3941_s25 + $0x18] sm:$0xff] }
 0x130   : > { %v658_v38 = vpop.f32.mrf.mxu1  ;;  %v1538_v36 = vpop.f32.mrf.mxu0  ;;  %v1444_v34 = vsel %vm307_vm0, %v1439_v51, %v1443_v49 }
 0x131   : > { %v1132_v47 = vpop.f32.mrf.mxu3  ;;  %v659_v13 = vadd.f32 %v658_v38, %v4274_v52  ;;  %v858_v53 = vpop.f32.mrf.mxu2  ;;  %v3834_v38 = vld [vmem:[%s3941_s25 + $0x10] sm:$0xf0] }
 0x132   : > { %v1190_v7 = vadd.f32 %v1132_v47, %v906_v33  ;;  %v3830_v33 = vld [vmem:[%s3941_s25 + $0x8] sm:$0xf0]  ;;  %v3836_v51 = vor.u32 %v3835_v42, %v3834_v38 }
 0x133   : > { %v907_v44 = vadd.f32 %v850_v41, %v659_v13 }
 0x134   : > { %v4477_v14 = vadd.f32 %v1536_v39, %v1190_v7  ;;  %v3833_v39 = vld [vmem:[%s3941_s25 + $0x10] sm:$0xff]   ;;  %v3831_v7 = vld [vmem:[%s3941_s25 + $0x8] sm:$0xe]  ;;  %v2542_v58 = vrot.slane %v3836_v51, 1 }
 0x135   : > { %v2239_v47 = vshll.u32 %v3833_v39, 16  ;;  %v2237_v49 = vshrl.u32 %v3833_v39, 16 }
 0x138   : > { %v661_v28 = vpop.f32.mrf.mxu1  ;;  %v1541_v22 = vpop.f32.mrf.mxu0 }
 0x139   : > { %v1134_v31 = vpop.f32.mrf.mxu3  ;;  %v662_v52 = vadd.f32 %v661_v28, %v4284_v5  ;;  %v860_v45 = vpop.f32.mrf.mxu2 }
 0x13a   : > { %v1191_v1 = vadd.f32 %v1134_v31, %v907_v44  ;;  %v2244_v31 = vshll.u32 %v4489_v62, 16 }
 0x13b   : > { %700 = vmatmul.bf16.gmra.mxu1 %v4109_v37  ;;  %1580 = vmatmul.bf16.gmra.mxu0 %v1444_v34  ;;  %v908_v4 = vadd.f32 %v853_v3, %v662_v52  ;;  %v2241_v3 = vrot.slane %v2239_v47, 1  ;;  %v1636_v52 = vrot.slane %v4178_v25, 1 }
 0x13c   : > { %v4483_v41 = vadd.f32 %v1538_v36, %v1191_v1  ;;  %v3832_v36 = vor.u32 %v3831_v7, %v3830_v33  ;;  %v2246_v33 = vrot.slane %v2244_v31, 1 }
 0x13e   : > { %1176 = vmatmul.bf16.gmra.mxu3 %v3655_v60  ;;  %2023 = vmatmul.bf16.gmra.mxu2 %v3694_v27  ;;  %v1635_v34 = vrot.slane %v3832_v36, 1  ;;  %v2242_v27 = vor.u32 %v2241_v3, %v2237_v49  ;;  %v3716_v36 = vld [vmem:[%s3941_s25 + $0x20] sm:$0xff] }
 0x13f   : > { %v2252_v31 = vshll.u32 %v3716_v36, 16 }
 0x140   : > { %v663_v13 = vpop.f32.mrf.mxu1  ;;  %v1543_v44 = vpop.f32.mrf.mxu0  ;;  %v1637_v38 = vsel %vm727_vm1, %v1635_v34, %v1636_v52  ;;  %v2247_v42 = vsel %vm307_vm0, %v2242_v27, %v2246_v33  ;;  %v1638_v27 = vrot.slane %v4196_v54, 1 }
 0x141   : > { %v1137_v55 = vpop.f32.mrf.mxu3  ;;  %v664_v37 = vadd.f32 %v663_v13, %v4309_v12  ;;  %v863_v1 = vpop.f32.mrf.mxu2  ;;  %v3695_v13 = vld [vmem:[%s3941_s25 + $0x20] sm:$0xff] }
 0x142   : > { %v1192_v5 = vadd.f32 %v1137_v55, %v908_v4  ;;  %v2543_v4 = vrot.slane %v4489_v62, 1 }
 0x143   : > { %v909_v60 = vadd.f32 %v855_v19, %v664_v37 }
 0x144   : > { %v4496_v28 = vadd.f32 %v1541_v22, %v1192_v5  ;;  %v2544_v22 = vsel %vm727_vm1, %v2542_v58, %v2543_v4 }
 0x148   : > { %v666_v39 = vpop.f32.mrf.mxu1  ;;  %v1546_v47 = vpop.f32.mrf.mxu0 }
 0x149   : > { %v1139_v7 = vpop.f32.mrf.mxu3  ;;  %v667_v19 = vadd.f32 %v666_v39, %v4322_v50  ;;  %v865_v25 = vpop.f32.mrf.mxu2  ;;  %v2248_v50 = vshrl.u32 %v4489_v62, 16 }
 0x14a   : > { %v1193_v12 = vadd.f32 %v1139_v7, %v909_v60 }
 0x14b   : > { %1734 = vmatmul.bf16.vlgmr.msra.gmra.mxu1 %v1637_v38  ;;  %2641 = vmatmul.bf16.vlgmr.msra.gmra.mxu0 %v2544_v22  ;;  %v910_v5 = vadd.f32 %v858_v53, %v667_v19  ;;  %v2545_v53 = vrot.slane %v3716_v36, 1  ;;  %v2250_v7 = vor.u32 %v2248_v50, %v2246_v33  ;;  %v3696_v33 = vld [vmem:[%s3941_s25 + $0x28] sm:$0xff] }
 0x14c   : > { %v4504_v55 = vadd.f32 %v1543_v44, %v1193_v12  ;;  %v2254_v12 = vrot.slane %v2252_v31, 1 }
 0x14d   : > { %v2546_v62 = vsel %vm727_vm1, %v2543_v4, %v2545_v53 }
 0x14e   : > { %2422 = vmatmul.bf16.vlgmr.msra.gmra.mxu3 %v2247_v42  ;;  %2028 = vmatmul.bf16.gmra.mxu2 %v3695_v13  ;;  %v3717_v13 = vld [vmem:[%s3941_s25 + $0x28] sm:$0xff] }
 0x150   : > { %v668_v49 = vpop.f32.mrf.mxu1  ;;  %v1548_v3 = vpop.f32.mrf.mxu0 }
 0x151   : > { %v1142_v51 = vpop.f32.mrf.mxu3  ;;  %v669_v58 = vadd.f32 %v668_v49, %v4338_v40  ;;  %v868_v60 = vpop.f32.mrf.mxu2  ;;  %v1639_v40 = vsel %vm727_vm1, %v1636_v52, %v1638_v27 }
 0x152   : > { %v1194_v37 = vadd.f32 %v1142_v51, %v910_v5 }
 0x153   : > { %v911_v44 = vadd.f32 %v860_v45, %v669_v58  ;;  %v2256_v58 = vshrl.u32 %v3716_v36, 16 }
 0x154   : > { %v4510_v34 = vadd.f32 %v1546_v47, %v1194_v37  ;;  %v2255_v47 = vsel %vm307_vm0, %v2250_v7, %v2254_v12  ;;  %v2547_v7 = vrot.slane %v3717_v13, 1 }
 0x158   : > { %v671_v22 = vpop.f32.mrf.mxu1  ;;  %v1551_v19 = vpop.f32.mrf.mxu0 }
 0x159   : > { %v1144_v39 = vpop.f32.mrf.mxu3  ;;  %v672_v42 = vadd.f32 %v671_v22, %v4349_v56  ;;  %v870_v45 = vpop.f32.mrf.mxu2  ;;  %v2260_v56 = vshll.u32 %v3717_v13, 16 }
 0x15a   : > { %v1195_v38 = vadd.f32 %v1144_v39, %v911_v44  ;;  %v1640_v44 = vrot.slane %v4209_v63, 1 }
 0x15b   : > { %1739 = vmatmul.bf16.gmra.mxu1 %v1639_v40  ;;  %2646 = vmatmul.bf16.gmra.mxu0 %v2546_v62  ;;  %v912_v54 = vadd.f32 %v863_v1, %v672_v42  ;;  %v2258_v1 = vor.u32 %v2256_v58, %v2254_v12  ;;  %v2262_v39 = vrot.slane %v2260_v56, 1  ;;  %v3697_v12 = vld [vmem:[%s3941_s25 + $0x30] sm:$0xff]  ;;  %v1642_v56 = vrot.slane %v4228_v17, 1 }
 0x15c   : > { %v4517_v5 = vadd.f32 %v1548_v3, %v1195_v38  ;;  %v1641_v42 = vsel %vm727_vm1, %v1638_v27, %v1640_v44 }
 0x15e   : > { %2427 = vmatmul.bf16.gmra.mxu3 %v2255_v47  ;;  %2033 = vmatmul.bf16.gmra.mxu2 %v3696_v33 }
 0x160   : > { %v673_v49 = vpop.f32.mrf.mxu1  ;;  %v1553_v52 = vpop.f32.mrf.mxu0 }
 0x161   : > { %v1147_v51 = vpop.f32.mrf.mxu3  ;;  %v674_v4 = vadd.f32 %v673_v49, %v4369_v16  ;;  %v873_v50 = vpop.f32.mrf.mxu2  ;;  %v2548_v16 = vsel %vm727_vm1, %v2545_v53, %v2547_v7  ;;  %v2264_v49 = vshrl.u32 %v3717_v13, 16 }
 0x162   : > { %v1196_v37 = vadd.f32 %v1147_v51, %v912_v54  ;;  %v3718_v54 = vld [vmem:[%s3941_s25 + $0x30] sm:$0xff] }
 0x163   : > { %v913_v3 = vadd.f32 %v865_v25, %v674_v4 }
 0x164   : > { %v4522_v31 = vadd.f32 %v1551_v19, %v1196_v37  ;;  %v2263_v19 = vsel %vm307_vm0, %v2258_v1, %v2262_v39 }
 0x168   : > { %v676_v40 = vpop.f32.mrf.mxu1  ;;  %v1556_v62 = vpop.f32.mrf.mxu0 }
 0x169   : > { %v1149_v38 = vpop.f32.mrf.mxu3  ;;  %v677_v36 = vadd.f32 %v676_v40, %v4278_v6  ;;  %v875_v25 = vpop.f32.mrf.mxu2  ;;  %v2268_v6 = vshll.u32 %v3718_v54, 16 }
 0x16a   : > { %v1197_v22 = vadd.f32 %v1149_v38, %v913_v3  ;;  %v2549_v3 = vrot.slane %v3718_v54, 1 }
 0x16b   : > { %1744 = vmatmul.bf16.gmra.mxu1 %v1641_v42  ;;  %2651 = vmatmul.bf16.gmra.mxu0 %v2548_v16  ;;  %v914_v63 = vadd.f32 %v868_v60, %v677_v36  ;;  %v2266_v60 = vor.u32 %v2264_v49, %v2262_v39  ;;  %v2270_v1 = vrot.slane %v2268_v6, 1  ;;  %v1643_v16 = vsel %vm727_vm1, %v1640_v44, %v1642_v56  ;;  %v3698_v39 = vld [vmem:[%s3941_s25 + $0x38] sm:$0xff] }
 0x16c   : > { %v4529_v47 = vadd.f32 %v1553_v52, %v1197_v22  ;;  %v1644_v49 = vrot.slane %v4241_v30, 1 }
 0x16e   : > { %2432 = vmatmul.bf16.gmra.mxu3 %v2263_v19  ;;  %2038 = vmatmul.bf16.gmra.mxu2 %v3697_v12  ;;  %v3719_v19 = vld [vmem:[%s3941_s25 + $0x38] sm:$0xff] }
 0x16f   : > { %v2551_v6 = vrot.slane %v3719_v19, 1 }
 0x170   : > { %v678_v37 = vpop.f32.mrf.mxu1  ;;  %v1558_v27 = vpop.f32.mrf.mxu0 }
 0x171   : > { %v1152_v33 = vpop.f32.mrf.mxu3  ;;  %v679_v53 = vadd.f32 %v678_v37, %v4292_v2  ;;  %v878_v4 = vpop.f32.mrf.mxu2  ;;  %v2550_v2 = vsel %vm727_vm1, %v2547_v7, %v2549_v3 }
 0x172   : > { %v1198_v51 = vadd.f32 %v1152_v33, %v914_v63 }
 0x173   : > { %v915_v52 = vadd.f32 %v870_v45, %v679_v53 }
 0x174   : > { %v4534_v58 = vadd.f32 %v1556_v62, %v1198_v51  ;;  %v2271_v62 = vsel %vm307_vm0, %v2266_v60, %v2270_v1  ;;  %v2272_v51 = vshrl.u32 %v3718_v54, 16 }
 0x178   : > { %v681_v40 = vpop.f32.mrf.mxu1  ;;  %v1561_v42 = vpop.f32.mrf.mxu0 }
 0x179   : > { %v1154_v38 = vpop.f32.mrf.mxu3  ;;  %v682_v13 = vadd.f32 %v681_v40, %v4316_v20  ;;  %v880_v45 = vpop.f32.mrf.mxu2  ;;  %v2276_v20 = vshll.u32 %v3719_v19, 16 }
 0x17a   : > { %v1199_v22 = vadd.f32 %v1154_v38, %v915_v52 }
 0x17b   : > { %1749 = vmatmul.bf16.gmra.mxu1 %v1643_v16  ;;  %2656 = vmatmul.bf16.gmra.mxu0 %v2550_v2  ;;  %v916_v17 = vadd.f32 %v873_v50, %v682_v13  ;;  %v2274_v50 = vor.u32 %v2272_v51, %v2270_v1  ;;  %v2278_v52 = vrot.slane %v2276_v20, 1  ;;  %v1645_v16 = vsel %vm727_vm1, %v1642_v56, %v1644_v49  ;;  %v3699_v1 = vld [vmem:[%s3941_s25 + $0x40] sm:$0xff] }
 0x17c   : > { %v4541_v36 = vadd.f32 %v1558_v27, %v1199_v22  ;;  %v3720_v13 = vld [vmem:[%s3941_s25 + $0x40] sm:$0xff] }
 0x17d   : > { %v2553_v51 = vrot.slane %v3720_v13, 1 }
 0x17e   : > { %2437 = vmatmul.bf16.gmra.mxu3 %v2271_v62  ;;  %2043 = vmatmul.bf16.gmra.mxu2 %v3698_v39 }
 0x180   : > { %v683_v33 = vpop.f32.mrf.mxu1  ;;  %v1563_v44 = vpop.f32.mrf.mxu0 }
 0x181   : > { %v1157_v63 = vpop.f32.mrf.mxu3  ;;  %v684_v7 = vadd.f32 %v683_v33, %v4327_v35  ;;  %v883_v37 = vpop.f32.mrf.mxu2  ;;  %v2552_v35 = vsel %vm727_vm1, %v2549_v3, %v2551_v6 }
 0x182   : > { %v1200_v12 = vadd.f32 %v1157_v63, %v916_v17  ;;  %v2280_v63 = vshrl.u32 %v3719_v19, 16 }
 0x183   : > { %v917_v27 = vadd.f32 %v875_v25, %v684_v7  ;;  %v1646_v7 = vrot.slane %v4267_v46, 1 }
 0x184   : > { %v4546_v53 = vadd.f32 %v1561_v42, %v1200_v12  ;;  %v2279_v42 = vsel %vm307_vm0, %v2274_v50, %v2278_v52 }
 0x188   : > { %v686_v22 = vpop.f32.mrf.mxu1  ;;  %v1566_v40 = vpop.f32.mrf.mxu0 }
 0x189   : > { %v1159_v60 = vpop.f32.mrf.mxu3  ;;  %v687_v54 = vadd.f32 %v686_v22, %v4270_v48  ;;  %v885_v25 = vpop.f32.mrf.mxu2  ;;  %v2284_v48 = vshll.u32 %v3720_v13, 16  ;;  %v1647_v22 = vsel %vm727_vm1, %v1644_v49, %v1646_v7 }
 0x18a   : > { %v1201_v38 = vadd.f32 %v1159_v60, %v917_v27 }
 0x18b   : > { %1754 = vmatmul.bf16.gmra.mxu1 %v1645_v16  ;;  %2661 = vmatmul.bf16.gmra.mxu0 %v2552_v35  ;;  %v918_v30 = vadd.f32 %v878_v4, %v687_v54  ;;  %v2282_v4 = vor.u32 %v2280_v63, %v2278_v52  ;;  %v2286_v20 = vrot.slane %v2284_v48, 1  ;;  %v3700_v52 = vld [vmem:[%s3941_s25 + $0x48] sm:$0xff] }
 0x18c   : > { %v4553_v2 = vadd.f32 %v1563_v44, %v1201_v38  ;;  %v3721_v35 = vld [vmem:[%s3941_s25 + $0x48] sm:$0xff] }
 0x18e   : > { %2442 = vmatmul.bf16.gmra.mxu3 %v2279_v42  ;;  %2048 = vmatmul.bf16.gmra.mxu2 %v3699_v1  ;;  %v2288_v1 = vshrl.u32 %v3720_v13, 16 }
 0x190   : > { %v688_v39 = vpop.f32.mrf.mxu1  ;;  %v1568_v56 = vpop.f32.mrf.mxu0 }
 0x191   : > { %v1162_v62 = vpop.f32.mrf.mxu3  ;;  %v689_v3 = vadd.f32 %v688_v39, %v4280_v59  ;;  %v888_v12 = vpop.f32.mrf.mxu2  ;;  %v2554_v59 = vsel %vm727_vm1, %v2551_v6, %v2553_v51 }
 0x192   : > { %v1202_v17 = vadd.f32 %v1162_v62, %v918_v30 }
 0x193   : > { %v919_v44 = vadd.f32 %v880_v45, %v689_v3  ;;  %v2555_v3 = vrot.slane %v3721_v35, 1 }
 0x194   : > { %v4558_v33 = vadd.f32 %v1566_v40, %v1202_v17  ;;  %v2287_v40 = vsel %vm307_vm0, %v2282_v4, %v2286_v20 }
 0x198   : > { %v691_v60 = vpop.f32.mrf.mxu1  ;;  %v1571_v38 = vpop.f32.mrf.mxu0 }
 0x199   : > { %v1164_v27 = vpop.f32.mrf.mxu3  ;;  %v692_v19 = vadd.f32 %v691_v60, %v4305_v11  ;;  %v890_v45 = vpop.f32.mrf.mxu2  ;;  %v2292_v11 = vshll.u32 %v3721_v35, 16 }
 0x19a   : > { %v1203_v50 = vadd.f32 %v1164_v27, %v919_v44 }
 0x19b   : > { %1759 = vmatmul.bf16.gmra.mxu1 %v1647_v22  ;;  %2666 = vmatmul.bf16.gmra.mxu0 %v2554_v59  ;;  %v920_v46 = vadd.f32 %v883_v37, %v692_v19  ;;  %v2290_v37 = vor.u32 %v2288_v1, %v2286_v20  ;;  %v2294_v63 = vrot.slane %v2292_v11, 1  ;;  %v3701_v20 = vld [vmem:[%s3941_s25 + $0x50] sm:$0xff] }
 0x19c   : > { %v4565_v16 = vadd.f32 %v1568_v56, %v1203_v50  ;;  %v1648_v56 = vrot.slane %v4296_v8, 1  ;;  %v3722_v22 = vld [vmem:[%s3941_s25 + $0x50] sm:$0xff] }
 0x19d   : > { %v2295_v60 = vsel %vm307_vm0, %v2290_v37, %v2294_v63  ;;  %v2557_v1 = vrot.slane %v3722_v22, 1 }
 0x19e   : > { %2447 = vmatmul.bf16.gmra.mxu3 %v2287_v40  ;;  %2053 = vmatmul.bf16.gmra.mxu2 %v3700_v52  ;;  %v1649_v50 = vsel %vm727_vm1, %v1646_v7, %v1648_v56  ;;  %v2296_v52 = vshrl.u32 %v3721_v35, 16 }
 0x19f   : > { %v2558_v35 = vsel %vm727_vm1, %v2555_v3, %v2557_v1 }
 0x1a0   : > { %v693_v30 = vpop.f32.mrf.mxu1  ;;  %v1573_v49 = vpop.f32.mrf.mxu0 }
 0x1a1   : > { %v1167_v54 = vpop.f32.mrf.mxu3  ;;  %v694_v6 = vadd.f32 %v693_v30, %v4318_v26  ;;  %v893_v62 = vpop.f32.mrf.mxu2  ;;  %v2556_v26 = vsel %vm727_vm1, %v2553_v51, %v2555_v3  ;;  %v4771_v3 = vld [vmem:[#allocation6_spill] sm:$0xff] }
 0x1a2   : > { %v1204_v42 = vadd.f32 %v1167_v54, %v920_v46  ;;  %v4768_v46 = vld [vmem:[#allocation3_spill] sm:$0xff] }
 0x1a3   : > { %v921_v39 = vadd.f32 %v885_v25, %v694_v6 }
 0x1a4   : > { %v4570_v17 = vadd.f32 %v1571_v38, %v1204_v42 }
 0x1a8   : > { %v696_v4 = vpop.f32.mrf.mxu1  ;;  %v1576_v27 = vpop.f32.mrf.mxu0 }
 0x1a9   : > { %v1169_v48 = vpop.f32.mrf.mxu3  ;;  %v697_v13 = vadd.f32 %v696_v4, %v4334_v32  ;;  %v895_v25 = vpop.f32.mrf.mxu2  ;;  %v2300_v32 = vshll.u32 %v3722_v22, 16 }
 0x1aa   : > { %v1205_v44 = vadd.f32 %v1169_v48, %v921_v39 }
 0x1ab   : > { %1764 = vmatmul.bf16.gmra.mxu1 %v1649_v50  ;;  %2671 = vmatmul.bf16.gmra.mxu0 %v2556_v26  ;;  %v922_v8 = vadd.f32 %v888_v12, %v697_v13  ;;  %v2298_v12 = vor.u32 %v2296_v52, %v2294_v63  ;;  %v2302_v11 = vrot.slane %v2300_v32, 1  ;;  %v4770_v50 = vld [vmem:[#allocation5_spill] sm:$0xff]  ;;  %v3894_v32 = vmov 0  }
 0x1ac   : > { %v4577_v38 = vadd.f32 %v1573_v49, %v1205_v44  ;;  %v4769_v49 = vld [vmem:[#allocation2_spill] sm:$0xff]  ;;  %2856 = vst [vmem:[%s4600_s20 + $0x70] sm:$0xf] %v3894_v32 }
 0x1ad   : > { %v1650_v6 = vrot.slane %v4769_v49, 1 }
 0x1ae   : > { %2452 = vmatmul.bf16.gmra.mxu3 %v2295_v60  ;;  %2058 = vmatmul.bf16.gmra.mxu2 %v3701_v20  ;;  %v3702_v60 = vld [vmem:[%s3941_s25 + $0x58] sm:$0xff] }
 0x1af   : > { %v1651_v4 = vsel %vm727_vm1, %v1648_v56, %v1650_v6 }
 0x1b0   : > { %v698_v40 = vpop.f32.mrf.mxu1  ;;  %v1578_v7 = vpop.f32.mrf.mxu0 }
 0x1b1   : > { %v1172_v59 = vpop.f32.mrf.mxu3  ;;  %v699_v51 = vadd.f32 %v698_v40, %v4768_v46  ;;  %v2019_v54 = vpop.f32.mrf.mxu2  ;;  %v2304_v46 = vshrl.u32 %v3722_v22, 16 }
 0x1b2   : > { %v1206_v19 = vadd.f32 %v1172_v59, %v922_v8  ;;  %v3723_v8 = vld [vmem:[%s3941_s25 + $0x58] sm:$0xff] }
 0x1b3   : > { %v923_v30 = vadd.f32 %v890_v45, %v699_v51  ;;  %v2303_v45 = vsel %vm307_vm0, %v2298_v12, %v2302_v11  ;;  %v2308_v51 = vshll.u32 %v3723_v8, 16  ;;  %v2559_v12 = vrot.slane %v3723_v8, 1 }
 0x1b4   : > { %v4582_v42 = vadd.f32 %v1576_v27, %v1206_v19 }
 0x1b5   : > { %v2310_v22 = vrot.slane %v2308_v51, 1 }
 0x1b8   : > { %v701_v48 = vpop.f32.mrf.mxu1  ;;  %v1581_v44 = vpop.f32.mrf.mxu0 }
 0x1b9   : > { %v1174_v39 = vpop.f32.mrf.mxu3  ;;  %v702_v27 = vadd.f32 %v701_v48, %v4770_v50  ;;  %v2021_v26 = vpop.f32.mrf.mxu2 }
 0x1ba   : > { %v1207_v37 = vadd.f32 %v1174_v39, %v923_v30  ;;  %v4772_v30 = vld [vmem:[#allocation4_spill] sm:$0xff]  ;;  %v2306_v39 = vor.u32 %v2304_v46, %v2302_v11 }
 0x1bb   : > { %1769 = vmatmul.bf16.gmra.mxu1 %v1651_v4  ;;  %2676 = vmatmul.bf16.gmra.mxu0 %v2558_v35  ;;  %v924_v63 = vadd.f32 %v893_v62, %v702_v27  ;;  %v1652_v49 = vrot.slane %v4772_v30, 1  ;;  %v2560_v27 = vsel %vm727_vm1, %v2557_v1, %v2559_v12 }
 0x1bc   : > { %v4589_v13 = vadd.f32 %v1578_v7, %v1207_v37 }
 0x1bd   : > { %v1653_v50 = vsel %vm727_vm1, %v1650_v6, %v1652_v49  ;;  %v2312_v6 = vshrl.u32 %v3723_v8, 16 }
 0x1be   : > { %2457 = vmatmul.bf16.gmra.mxu3 %v2303_v45  ;;  %2063 = vmatmul.bf16.gmra.mxu2 %v3702_v60  ;;  %v3724_v60 = vld [vmem:[%s3941_s25 + $0x60] sm:$0xff] }
 0x1bf   : > { %v2314_v32 = vor.u32 %v2312_v6, %v2310_v22 }
 0x1c0   : > { %v703_v56 = vpop.f32.mrf.mxu1  ;;  %v1583_v19 = vpop.f32.mrf.mxu0 }
 0x1c1   : > { %v1177_v20 = vpop.f32.mrf.mxu3  ;;  %v704_v40 = vadd.f32 %v703_v56, %v4771_v3  ;;  %v4595_v52 = vpop.f32.mrf.mxu2 }
 0x1c2   : > { %v1208_v59 = vadd.f32 %v1177_v20, %v924_v63  ;;  %v3703_v63 = vld [vmem:[%s3941_s25 + $0x60] sm:$0xff] }
 0x1c3   : > { %v925_v7 = vadd.f32 %v895_v25, %v704_v40  ;;  %v2316_v40 = vshll.u32 %v3724_v60, 16 }
 0x1c4   : > { %v4602_v62 = vadd.f32 %v1581_v44, %v1208_v59  ;;  %v2311_v44 = vsel %vm307_vm0, %v2306_v39, %v2310_v22 }
 0x1c5   : > { %v2318_v30 = vrot.slane %v2316_v40, 1  ;;  %v2320_v40 = vshrl.u32 %v3724_v60, 16 }
 0x1c7   : > { %v2319_v22 = vsel %vm307_vm0, %v2314_v32, %v2318_v30 }
 0x1c8   : > { %v1735_v4 = vpop.f32.mrf.mxu1  ;;  %v2642_v35 = vpop.f32.mrf.mxu0 }
 0x1c9   : > { %v1179_v37 = vpop.f32.mrf.mxu3  ;;  %v2026_v25 = vpop.f32.mrf.mxu2  ;;  %v1805_v11 = vadd.f32 %v1735_v4, %v4399_v21 }
 0x1ca   : > { %v1209_v48 = vadd.f32 %v1179_v37, %v925_v7  ;;  %v2561_v7 = vrot.slane %v3724_v60, 1 }
 0x1cb   : > { %1774 = vmatmul.bf16.gmra.mxu1 %v1653_v50  ;;  %2681 = vmatmul.bf16.gmra.mxu0 %v2560_v27  ;;  %v2089_v59 = vadd.f32 %v2019_v54, %v1805_v11  ;;  %v4621_v54 = vld [vmem:[%s4757_s2] ss:$0 sm:$0xff]  ;;  %v4633_v11 = vld [vmem:[%s3941_s25 + $0x68] sm:$0xff] }
 0x1cc   : > { %v4609_v45 = vadd.f32 %v1583_v19, %v1209_v48  ;;  %v1654_v19 = vrot.slane %v4384_v0, 1  ;;  %v2562_v0 = vsel %vm727_vm1, %v2559_v12, %v2561_v7 }
 0x1ce   : > { %2462 = vmatmul.bf16.gmra.mxu3 %v2311_v44  ;;  %2068 = vmatmul.bf16.gmra.mxu2 %v3703_v63  ;;  %v1655_v4 = vsel %vm727_vm1, %v1652_v49, %v1654_v19 }
 0x1d0   : > { %v1737_v56 = vpop.f32.mrf.mxu1  ;;  %v2644_v3 = vpop.f32.mrf.mxu0 }
 0x1d1   : > { %v2423_v20 = vpop.f32.mrf.mxu3  ;;  %v1806_v46 = vadd.f32 %v1737_v56, %v4405_v18  ;;  %v4615_v51 = vpop.f32.mrf.mxu2 }
 0x1d2   : > { %v2493_v1 = vadd.f32 %v2423_v20, %v2089_v59 }
 0x1d3   : > { %v2090_v39 = vadd.f32 %v2021_v26, %v1806_v46  ;;  %v3704_v26 = vld [vmem:[%s3941_s25 + $0x68] sm:$0xff] }
 0x1d4   : > { %v2712_v21 = vadd.f32 %v2642_v35, %v2493_v1  ;;  %v2324_v1 = vshll.u32 %v4633_v11, 16 }
 0x1d6   : > { %v2744_v50 = vadd.f32 %v4621_v54, %v2712_v21  ;;  %v1656_v21 = vrot.slane %v4409_v29, 1 }
 0x1d8   : > { %v1740_v48 = vpop.f32.mrf.mxu1  ;;  %v2647_v18 = vpop.f32.mrf.mxu0  ;;  %v2772_v49 = vmax.f32 %v2744_v50, 0.0  ;;  %v1657_v50 = vsel %vm727_vm1, %v1654_v19, %v1656_v21 }
 0x1d9   : > { %v2425_v8 = vpop.f32.mrf.mxu3  ;;  %v4627_v27 = vpop.f32.mrf.mxu2  ;;  %v1807_v63 = vadd.f32 %v1740_v48, %v4418_v24 }
 0x1da   : > { %v2494_v37 = vadd.f32 %v2425_v8, %v2090_v39  ;;  %v2563_v39 = vrot.slane %v4633_v11, 1  ;;  %v2322_v8 = vor.u32 %v2320_v40, %v2318_v30 }
 0x1db   : > { %1779 = vmatmul.bf16.gmra.mxu1 %v1655_v4  ;;  %2686 = vmatmul.bf16.gmra.mxu0 %v2562_v0  ;;  %v2091_v56 = vadd.f32 %v4595_v52, %v1807_v63  ;;  %v4653_v63 = vld [vmem:[%s3941_s25 + $0x70] sm:$0xff] }
 0x1dc   : > { %v2713_v35 = vadd.f32 %v2644_v3, %v2494_v37  ;;  %v2326_v37 = vrot.slane %v2324_v1, 1 }
 0x1de   : > { %v2745_v44 = vadd.f32 %v4621_v54, %v2713_v35  ;;  %2467 = vmatmul.bf16.gmra.mxu3 %v2319_v22  ;;  %2073 = vmatmul.bf16.gmra.mxu2 %v3704_v26  ;;  %v2327_v35 = vsel %vm307_vm0, %v2322_v8, %v2326_v37 }
 0x1e0   : > { %v2773_v12 = vmax.f32 %v2745_v44, 0.0  ;;  %v1742_v3 = vpop.f32.mrf.mxu1  ;;  %v2649_v6 = vpop.f32.mrf.mxu0 }
 0x1e1   : > { %v2428_v20 = vpop.f32.mrf.mxu3  ;;  %v1808_v32 = vadd.f32 %v1742_v3, %v4424_v10  ;;  %v4639_v24 = vpop.f32.mrf.mxu2  ;;  %v2564_v10 = vsel %vm727_vm1, %v2561_v7, %v2563_v39  ;;  %v2328_v3 = vshrl.u32 %v4633_v11, 16 }
 0x1e2   : > { %v3759_v59 = vpack.c.bf16 %v2773_v12, %v2772_v49  ;;  %v2495_v46 = vadd.f32 %v2428_v20, %v2091_v56 }
 0x1e3   : > { %v2092_v52 = vadd.f32 %v2026_v25, %v1808_v32  ;;  %v3705_v25 = vld [vmem:[%s3941_s25 + $0x70] sm:$0xff]  ;;  %v2565_v32 = vrot.slane %v4653_v63, 1  ;;  %v2330_v8 = vor.u32 %v2328_v3, %v2326_v37 }
 0x1e4   : > { %3760 = vst [vmem:[%s4600_s20] sm:$0xff] %v3759_v59   ;;  %v2714_v48 = vadd.f32 %v2647_v18, %v2495_v46  ;;  %v1658_v46 = vrot.slane %v4428_v57, 1 }
 0x1e6   : > { %v2746_v29 = vadd.f32 %v4621_v54, %v2714_v48 }
 0x1e8   : > { %v1745_v0 = vpop.f32.mrf.mxu1  ;;  %v2652_v22 = vpop.f32.mrf.mxu0  ;;  %v2774_v19 = vmax.f32 %v2746_v29, 0.0 }
 0x1e9   : > { %v2430_v4 = vpop.f32.mrf.mxu3  ;;  %v4647_v44 = vpop.f32.mrf.mxu2  ;;  %v1809_v18 = vadd.f32 %v1745_v0, %v4443_v43 }
 0x1ea   : > { %v2496_v60 = vadd.f32 %v2430_v4, %v2092_v52 }
 0x1eb   : > { %1784 = vmatmul.bf16.gmra.mxu1 %v1657_v50  ;;  %2691 = vmatmul.bf16.gmra.mxu0 %v2564_v10  ;;  %v2093_v20 = vadd.f32 %v4615_v51, %v1809_v18  ;;  %v1659_v50 = vsel %vm727_vm1, %v1656_v21, %v1658_v46 }
 0x1ec   : > { %v2715_v26 = vadd.f32 %v2649_v6, %v2496_v60  ;;  %v2332_v6 = vshll.u32 %v4653_v63, 16 }
 0x1ee   : > { %v2747_v30 = vadd.f32 %v4621_v54, %v2715_v26  ;;  %2472 = vmatmul.bf16.gmra.mxu3 %v2327_v35  ;;  %2078 = vmatmul.bf16.gmra.mxu2 %v3705_v25  ;;  %v2334_v48 = vrot.slane %v2332_v6, 1  ;;  %v4675_v26 = vld [vmem:[%s3941_s25 + $0x78] sm:$0xff] }
 0x1ef   : > { %v2567_v3 = vrot.slane %v4675_v26, 1 }
 0x1f0   : > { %v2775_v7 = vmax.f32 %v2747_v30, 0.0  ;;  %v1747_v59 = vpop.f32.mrf.mxu1  ;;  %v2654_v56 = vpop.f32.mrf.mxu0  ;;  %v2335_v10 = vsel %vm307_vm0, %v2330_v8, %v2334_v48  ;;  %v2145_v8 = vld [vmem:[%s3941_s25 + $0x80] sm:$0x1] }
 0x1f1   : > { %v2433_v49 = vpop.f32.mrf.mxu3  ;;  %v1810_v43 = vadd.f32 %v1747_v59, %v4452_v61  ;;  %v4660_v1 = vpop.f32.mrf.mxu2  ;;  %v2566_v61 = vsel %vm727_vm1, %v2563_v39, %v2565_v32 }
 0x1f2   : > { %v3764_v12 = vpack.c.bf16 %v2775_v7, %v2774_v19  ;;  %v2497_v40 = vadd.f32 %v2433_v49, %v2093_v20  ;;  %v2336_v49 = vshrl.u32 %v4653_v63, 16 }
 0x1f3   : > { %v2094_v52 = vadd.f32 %v4627_v27, %v1810_v43  ;;  %v3706_v27 = vld [vmem:[%s3941_s25 + $0x78] sm:$0xff] }
 0x1f4   : > { %3837 = vst [vmem:[%s4600_s20 + $0x8] sm:$0xff] %v3764_v12   ;;  %v2716_v51 = vadd.f32 %v2652_v22, %v2497_v40  ;;  %v2340_v12 = vshll.u32 %v4675_v26, 16  ;;  %v2338_v6 = vor.u32 %v2336_v49, %v2334_v48 }
 0x1f6   : > { %v2748_v57 = vadd.f32 %v4621_v54, %v2716_v51  ;;  %v2342_v40 = vrot.slane %v2340_v12, 1 }
 0x1f8   : > { %v1750_v60 = vpop.f32.mrf.mxu1  ;;  %v2657_v0 = vpop.f32.mrf.mxu0  ;;  %v2776_v21 = vmax.f32 %v2748_v57, 0.0 }
 0x1f9   : > { %v2435_v4 = vpop.f32.mrf.mxu3  ;;  %v4669_v37 = vpop.f32.mrf.mxu2  ;;  %v1811_v29 = vadd.f32 %v1750_v60, %v4462_v9  ;;  %v2343_v60 = vsel %vm307_vm0, %v2338_v6, %v2342_v40 }
 0x1fa   : > { %v2498_v11 = vadd.f32 %v2435_v4, %v2094_v52 }
 0x1fb   : > { %1789 = vmatmul.bf16.gmra.mxu1 %v1659_v50  ;;  %2696 = vmatmul.bf16.gmra.mxu0 %v2566_v61  ;;  %v2095_v18 = vadd.f32 %v4639_v24, %v1811_v29  ;;  %v2220_v50 = vunpack.c.l.b16 %v2145_v8 }
 0x1fc   : > { %v2717_v35 = vadd.f32 %v2654_v56, %v2498_v11  ;;  %v1660_v56 = vrot.slane %v4456_v23, 1 }
 0x1fe   : > { %v2749_v22 = vadd.f32 %v4621_v54, %v2717_v35  ;;  %2477 = vmatmul.bf16.gmra.mxu3 %v2335_v10  ;;  %2083 = vmatmul.bf16.gmra.mxu2 %v3706_v27  ;;  %v1661_v11 = vsel %vm727_vm1, %v1658_v46, %v1660_v56  ;;  %v2235_v10 = vpack.c.b16 %v2220_v50, %v2220_v50 }
 0x200   : > { %v2777_v39 = vmax.f32 %v2749_v22, 0.0  ;;  %v1752_v19 = vpop.f32.mrf.mxu1  ;;  %v2659_v7 = vpop.f32.mrf.mxu0 }
 0x201   : > { %v2438_v25 = vpop.f32.mrf.mxu3  ;;  %v1812_v9 = vadd.f32 %v1752_v19, %v4468_v15  ;;  %v4682_v59 = vpop.f32.mrf.mxu2  ;;  %v2568_v15 = vsel %vm727_vm1, %v2565_v32, %v2567_v3  ;;  %v4773_v19 = vld [vmem:[#allocation7_spill] sm:$0xff] }
 0x202   : > { %v3769_v30 = vpack.c.bf16 %v2777_v39, %v2776_v21  ;;  %v2499_v20 = vadd.f32 %v2438_v25, %v2095_v18  ;;  %v2344_v21 = vshrl.u32 %v4675_v26, 16  ;;  %v2348_v39 = vshll.u32 %v2235_v10, 16 }
 0x203   : > { %v2096_v24 = vadd.f32 %v4647_v44, %v1812_v9 }
 0x204   : > { %3838 = vst [vmem:[%s4600_s20 + $0x10] sm:$0xff] %v3769_v30   ;;  %v2718_v43 = vadd.f32 %v2657_v0, %v2499_v20  ;;  %v2346_v49 = vor.u32 %v2344_v21, %v2342_v40  ;;  %v2350_v12 = vrot.slane %v2348_v39, 1 }
 0x206   : > { %v2750_v23 = vadd.f32 %v4621_v54, %v2718_v43 }
 0x208   : > { %v1755_v52 = vpop.f32.mrf.mxu1  ;;  %v2662_v4 = vpop.f32.mrf.mxu0  ;;  %v2778_v57 = vmax.f32 %v2750_v23, 0.0 }
 0x209   : > { %v2440_v51 = vpop.f32.mrf.mxu3  ;;  %v2046_v48 = vpop.f32.mrf.mxu2  ;;  %v1813_v0 = vadd.f32 %v1755_v52, %v4477_v14  ;;  %v1662_v14 = vrot.slane %v4773_v19, 1 }
 0x20a   : > { %v2500_v63 = vadd.f32 %v2440_v51, %v2096_v24  ;;  %v2351_v51 = vsel %vm307_vm0, %v2346_v49, %v2350_v12 }
 0x20b   : > { %1794 = vmatmul.bf16.gmra.mxu1 %v1661_v11  ;;  %2701 = vmatmul.bf16.gmra.mxu0 %v2568_v15  ;;  %v2097_v27 = vadd.f32 %v4660_v1, %v1813_v0  ;;  %v1663_v26 = vsel %vm727_vm1, %v1660_v56, %v1662_v14 }
 0x20c   : > { %v2719_v61 = vadd.f32 %v2659_v7, %v2500_v63  ;;  %v2569_v7 = vrot.slane %v2235_v10, 1 }
 0x20e   : > { %v2751_v44 = vadd.f32 %v4621_v54, %v2719_v61  ;;  %2482 = vmatmul.bf16.gmra.mxu3 %v2343_v60  ;;  %v2570_v8 = vsel %vm727_vm1, %v2567_v3, %v2569_v7 }
 0x210   : > { %v2779_v46 = vmax.f32 %v2751_v44, 0.0  ;;  %v1757_v22 = vpop.f32.mrf.mxu1  ;;  %v2664_v29 = vpop.f32.mrf.mxu0 }
 0x211   : > { %v2443_v35 = vpop.f32.mrf.mxu3  ;;  %v1814_v30 = vadd.f32 %v1757_v22, %v4483_v41  ;;  %v2049_v18 = vpop.f32.mrf.mxu2 }
 0x212   : > { %v3774_v32 = vpack.c.bf16 %v2779_v46, %v2778_v57  ;;  %v2501_v25 = vadd.f32 %v2443_v35, %v2097_v27 }
 0x213   : > { %v2098_v9 = vadd.f32 %v4669_v37, %v1814_v30 }
 0x214   : > { %3839 = vst [vmem:[%s4600_s20 + $0x18] sm:$0xff] %v3774_v32   ;;  %v2720_v20 = vadd.f32 %v2662_v4, %v2501_v25 }
 0x216   : > { %v2752_v41 = vadd.f32 %v4621_v54, %v2720_v20 }
 0x218   : > { %v1760_v43 = vpop.f32.mrf.mxu1  ;;  %v2667_v24 = vpop.f32.mrf.mxu0  ;;  %v2780_v4 = vmax.f32 %v2752_v41, 0.0 }
 0x219   : > { %v2445_v6 = vpop.f32.mrf.mxu3  ;;  %v2051_v52 = vpop.f32.mrf.mxu2  ;;  %v1815_v37 = vadd.f32 %v1760_v43, %v4496_v28 }
 0x21a   : > { %v2502_v1 = vadd.f32 %v2445_v6, %v2098_v9 }
 0x21b   : > { %1799 = vmatmul.bf16.gmra.mxu1 %v1663_v26  ;;  %2706 = vmatmul.bf16.gmra.mxu0 %v2570_v8  ;;  %v2099_v3 = vadd.f32 %v4682_v59, %v1815_v37 }
 0x21c   : > { %v2721_v63 = vadd.f32 %v2664_v29, %v2502_v1 }
 0x21e   : > { %v2753_v40 = vadd.f32 %v4621_v54, %v2721_v63  ;;  %2487 = vmatmul.bf16.gmra.mxu3 %v2351_v51 }
 0x220   : > { %v2781_v11 = vmax.f32 %v2753_v40, 0.0  ;;  %v1762_v60 = vpop.f32.mrf.mxu1  ;;  %v2669_v50 = vpop.f32.mrf.mxu0 }
 0x221   : > { %v2448_v15 = vpop.f32.mrf.mxu3  ;;  %v1816_v61 = vadd.f32 %v1762_v60, %v4504_v55  ;;  %v2054_v44 = vpop.f32.mrf.mxu2 }
 0x222   : > { %v3779_v56 = vpack.c.bf16 %v2781_v11, %v2780_v4  ;;  %v2503_v23 = vadd.f32 %v2448_v15, %v2099_v3 }
 0x223   : > { %v2100_v10 = vadd.f32 %v2046_v48, %v1816_v61 }
 0x224   : > { %3840 = vst [vmem:[%s4600_s20 + $0x20] sm:$0xff] %v3779_v56   ;;  %v2722_v0 = vadd.f32 %v2667_v24, %v2503_v23 }
 0x226   : > { %v2754_v32 = vadd.f32 %v4621_v54, %v2722_v0 }
 0x228   : > { %v1765_v28 = vpop.f32.mrf.mxu1  ;;  %v2672_v35 = vpop.f32.mrf.mxu0  ;;  %v2782_v21 = vmax.f32 %v2754_v32, 0.0 }
 0x229   : > { %v2450_v57 = vpop.f32.mrf.mxu3  ;;  %v1817_v59 = vadd.f32 %v1765_v28, %v4510_v34  ;;  %v2056_v29 = vpop.f32.mrf.mxu2 }
 0x22a   : > { %v2504_v46 = vadd.f32 %v2450_v57, %v2100_v10 }
 0x22b   : > { %v2101_v30 = vadd.f32 %v2049_v18, %v1817_v59 }
 0x22c   : > { %v2723_v27 = vadd.f32 %v2669_v50, %v2504_v46 }
 0x22e   : > { %v2755_v22 = vadd.f32 %v4621_v54, %v2723_v27 }
 0x230   : > { %v2783_v39 = vmax.f32 %v2755_v22, 0.0  ;;  %v1767_v19 = vpop.f32.mrf.mxu1  ;;  %v2674_v48 = vpop.f32.mrf.mxu0 }
 0x231   : > { %v2453_v25 = vpop.f32.mrf.mxu3  ;;  %v1818_v7 = vadd.f32 %v1767_v19, %v4517_v5  ;;  %v2059_v9 = vpop.f32.mrf.mxu2 }
 0x232   : > { %v3784_v55 = vpack.c.bf16 %v2783_v39, %v2782_v21  ;;  %v2505_v14 = vadd.f32 %v2453_v25, %v2101_v30 }
 0x233   : > { %v2102_v12 = vadd.f32 %v2051_v52, %v1818_v7 }
 0x234   : > { %3841 = vst [vmem:[%s4600_s20 + $0x28] sm:$0xff] %v3784_v55   ;;  %v2724_v49 = vadd.f32 %v2672_v35, %v2505_v14 }
 0x236   : > { %v2756_v43 = vadd.f32 %v4621_v54, %v2724_v49 }
 0x238   : > { %v1770_v1 = vpop.f32.mrf.mxu1  ;;  %v2677_v34 = vpop.f32.mrf.mxu0  ;;  %v2784_v8 = vmax.f32 %v2756_v43, 0.0 }
 0x239   : > { %v2455_v20 = vpop.f32.mrf.mxu3  ;;  %v1819_v18 = vadd.f32 %v1770_v1, %v4522_v31  ;;  %v2061_v37 = vpop.f32.mrf.mxu2 }
 0x23a   : > { %v2506_v6 = vadd.f32 %v2455_v20, %v2102_v12 }
 0x23b   : > { %v2103_v5 = vadd.f32 %v2054_v44, %v1819_v18 }
 0x23c   : > { %v2725_v24 = vadd.f32 %v2674_v48, %v2506_v6 }
 0x23e   : > { %v2757_v26 = vadd.f32 %v4621_v54, %v2725_v24 }
 0x240   : > { %v2785_v51 = vmax.f32 %v2757_v26, 0.0  ;;  %v1772_v40 = vpop.f32.mrf.mxu1  ;;  %v2679_v52 = vpop.f32.mrf.mxu0 }
 0x241   : > { %v2458_v41 = vpop.f32.mrf.mxu3  ;;  %v1820_v11 = vadd.f32 %v1772_v40, %v4529_v47  ;;  %v2064_v0 = vpop.f32.mrf.mxu2 }
 0x242   : > { %v3789_v63 = vpack.c.bf16 %v2785_v51, %v2784_v8  ;;  %v2507_v4 = vadd.f32 %v2458_v41, %v2103_v5 }
 0x243   : > { %v2104_v56 = vadd.f32 %v2056_v29, %v1820_v11 }
 0x244   : > { %3842 = vst [vmem:[%s4600_s20 + $0x30] sm:$0xff] %v3789_v63   ;;  %v2726_v15 = vadd.f32 %v2677_v34, %v2507_v4 }
 0x246   : > { %v2758_v31 = vadd.f32 %v4621_v54, %v2726_v15 }
 0x248   : > { %v1775_v50 = vpop.f32.mrf.mxu1  ;;  %v2682_v23 = vpop.f32.mrf.mxu0  ;;  %v2786_v57 = vmax.f32 %v2758_v31, 0.0 }
 0x249   : > { %v2460_v3 = vpop.f32.mrf.mxu3  ;;  %v1821_v10 = vadd.f32 %v1775_v50, %v4534_v58  ;;  %v2066_v29 = vpop.f32.mrf.mxu2 }
 0x24a   : > { %v2508_v60 = vadd.f32 %v2460_v3, %v2104_v56 }
 0x24b   : > { %v2105_v47 = vadd.f32 %v2059_v9, %v1821_v10 }
 0x24c   : > { %v2727_v61 = vadd.f32 %v2679_v52, %v2508_v60 }
 0x24e   : > { %v2759_v44 = vadd.f32 %v4621_v54, %v2727_v61 }
 0x250   : > { %v2787_v46 = vmax.f32 %v2759_v44, 0.0  ;;  %v1777_v32 = vpop.f32.mrf.mxu1  ;;  %v2684_v27 = vpop.f32.mrf.mxu0 }
 0x251   : > { %v2463_v28 = vpop.f32.mrf.mxu3  ;;  %v1822_v59 = vadd.f32 %v1777_v32, %v4541_v36  ;;  %v2069_v9 = vpop.f32.mrf.mxu2 }
 0x252   : > { %v3794_v35 = vpack.c.bf16 %v2787_v46, %v2786_v57  ;;  %v2509_v22 = vadd.f32 %v2463_v28, %v2105_v47 }
 0x253   : > { %v2106_v39 = vadd.f32 %v2061_v37, %v1822_v59 }
 0x254   : > { %3843 = vst [vmem:[%s4600_s20 + $0x38] sm:$0xff] %v3794_v35   ;;  %v2728_v21 = vadd.f32 %v2682_v23, %v2509_v22 }
 0x256   : > { %v2760_v58 = vadd.f32 %v4621_v54, %v2728_v21 }
 0x258   : > { %v1780_v30 = vpop.f32.mrf.mxu1  ;;  %v2687_v19 = vpop.f32.mrf.mxu0  ;;  %v2788_v49 = vmax.f32 %v2760_v58, 0.0 }
 0x259   : > { %v2465_v25 = vpop.f32.mrf.mxu3  ;;  %v1823_v7 = vadd.f32 %v1780_v30, %v4546_v53  ;;  %v2071_v53 = vpop.f32.mrf.mxu2 }
 0x25a   : > { %v2510_v55 = vadd.f32 %v2465_v25, %v2106_v39 }
 0x25b   : > { %v2107_v6 = vadd.f32 %v2064_v0, %v1823_v7 }
 0x25c   : > { %v2729_v48 = vadd.f32 %v2684_v27, %v2510_v55 }
 0x25e   : > { %v2761_v14 = vadd.f32 %v4621_v54, %v2729_v48 }
 0x260   : > { %v2789_v12 = vmax.f32 %v2761_v14, 0.0  ;;  %v1782_v1 = vpop.f32.mrf.mxu1  ;;  %v2689_v34 = vpop.f32.mrf.mxu0 }
 0x261   : > { %v2468_v20 = vpop.f32.mrf.mxu3  ;;  %v1824_v24 = vadd.f32 %v1782_v1, %v4553_v2  ;;  %v2074_v31 = vpop.f32.mrf.mxu2 }
 0x262   : > { %v3799_v36 = vpack.c.bf16 %v2789_v12, %v2788_v49  ;;  %v2511_v43 = vadd.f32 %v2468_v20, %v2107_v6 }
 0x263   : > { %v2108_v18 = vadd.f32 %v2066_v29, %v1824_v24 }
 0x264   : > { %3844 = vst [vmem:[%s4600_s20 + $0x40] sm:$0xff] %v3799_v36   ;;  %v2730_v26 = vadd.f32 %v2687_v19, %v2511_v43 }
 0x266   : > { %v2762_v5 = vadd.f32 %v4621_v54, %v2730_v26 }
 0x268   : > { %v1785_v41 = vpop.f32.mrf.mxu1  ;;  %v2692_v63 = vpop.f32.mrf.mxu0  ;;  %v2790_v4 = vmax.f32 %v2762_v5, 0.0 }
 0x269   : > { %v2470_v8 = vpop.f32.mrf.mxu3  ;;  %v1825_v37 = vadd.f32 %v1785_v41, %v4558_v33  ;;  %v2076_v32 = vpop.f32.mrf.mxu2 }
 0x26a   : > { %v2512_v51 = vadd.f32 %v2470_v8, %v2108_v18 }
 0x26b   : > { %v2109_v2 = vadd.f32 %v2069_v9, %v1825_v37 }
 0x26c   : > { %v2731_v40 = vadd.f32 %v2689_v34, %v2512_v51 }
 0x26e   : > { %v2763_v52 = vadd.f32 %v4621_v54, %v2731_v40 }
 0x270   : > { %v2791_v11 = vmax.f32 %v2763_v52, 0.0  ;;  %v1787_v3 = vpop.f32.mrf.mxu1  ;;  %v2694_v60 = vpop.f32.mrf.mxu0 }
 0x271   : > { %v2473_v15 = vpop.f32.mrf.mxu3  ;;  %v1826_v23 = vadd.f32 %v1787_v3, %v4565_v16  ;;  %v2079_v58 = vpop.f32.mrf.mxu2 }
 0x272   : > { %v3804_v56 = vpack.c.bf16 %v2791_v11, %v2790_v4  ;;  %v2513_v50 = vadd.f32 %v2473_v15, %v2109_v2 }
 0x273   : > { %v2110_v0 = vadd.f32 %v2071_v53, %v1826_v23 }
 0x274   : > { %3845 = vst [vmem:[%s4600_s20 + $0x48] sm:$0xff] %v3804_v56   ;;  %v2732_v61 = vadd.f32 %v2692_v63, %v2513_v50 }
 0x276   : > { %v2764_v33 = vadd.f32 %v4621_v54, %v2732_v61 }
 0x278   : > { %v1790_v57 = vpop.f32.mrf.mxu1  ;;  %v2697_v46 = vpop.f32.mrf.mxu0  ;;  %v2792_v27 = vmax.f32 %v2764_v33, 0.0 }
 0x279   : > { %v2475_v44 = vpop.f32.mrf.mxu3  ;;  %v1827_v47 = vadd.f32 %v1790_v57, %v4570_v17  ;;  %v2081_v24 = vpop.f32.mrf.mxu2 }
 0x27a   : > { %v2514_v10 = vadd.f32 %v2475_v44, %v2110_v0 }
 0x27b   : > { %v2111_v29 = vadd.f32 %v2074_v31, %v1827_v47 }
 0x27c   : > { %v2733_v28 = vadd.f32 %v2694_v60, %v2514_v10 }
 0x27e   : > { %v2765_v35 = vadd.f32 %v4621_v54, %v2733_v28 }
 0x280   : > { %v2793_v22 = vmax.f32 %v2765_v35, 0.0  ;;  %v1792_v21 = vpop.f32.mrf.mxu1  ;;  %v2699_v39 = vpop.f32.mrf.mxu0 }
 0x281   : > { %v2478_v59 = vpop.f32.mrf.mxu3  ;;  %v1828_v55 = vadd.f32 %v1792_v21, %v4577_v38  ;;  %v2084_v52 = vpop.f32.mrf.mxu2 }
 0x282   : > { %v3809_v16 = vpack.c.bf16 %v2793_v22, %v2792_v27  ;;  %v2515_v25 = vadd.f32 %v2478_v59, %v2111_v29 }
 0x283   : > { %v2112_v19 = vadd.f32 %v2076_v32, %v1828_v55 }
 0x284   : > { %3846 = vst [vmem:[%s4600_s20 + $0x50] sm:$0xff] %v3809_v16   ;;  %v2734_v30 = vadd.f32 %v2697_v46, %v2515_v25 }
 0x286   : > { %v2766_v17 = vadd.f32 %v4621_v54, %v2734_v30 }
 0x288   : > { %v1795_v7 = vpop.f32.mrf.mxu1  ;;  %v2702_v12 = vpop.f32.mrf.mxu0  ;;  %v2794_v36 = vmax.f32 %v2766_v17, 0.0 }
 0x289   : > { %v2480_v48 = vpop.f32.mrf.mxu3  ;;  %v1829_v9 = vadd.f32 %v1795_v7, %v4582_v42  ;;  %v2086_v31 = vpop.f32.mrf.mxu2 }
 0x28a   : > { %v2516_v14 = vadd.f32 %v2480_v48, %v2112_v19 }
 0x28b   : > { %v2113_v38 = vadd.f32 %v2079_v58, %v1829_v9 }
 0x28c   : > { %v2735_v49 = vadd.f32 %v2699_v39, %v2516_v14 }
 0x28e   : > { %v2767_v20 = vadd.f32 %v4621_v54, %v2735_v49 }
 0x290   : > { %v2795_v6 = vmax.f32 %v2767_v20, 0.0  ;;  %v1797_v43 = vpop.f32.mrf.mxu1  ;;  %v2704_v8 = vpop.f32.mrf.mxu0 }
 0x291   : > { %v2483_v1 = vpop.f32.mrf.mxu3  ;;  %v1830_v18 = vadd.f32 %v1797_v43, %v4589_v13 }
 0x292   : > { %v3814_v34 = vpack.c.bf16 %v2795_v6, %v2794_v36  ;;  %v2517_v26 = vadd.f32 %v2483_v1, %v2113_v38 }
 0x293   : > { %v2114_v41 = vadd.f32 %v2081_v24, %v1830_v18 }
 0x294   : > { %3847 = vst [vmem:[%s4600_s20 + $0x58] sm:$0xff] %v3814_v34   ;;  %v2736_v51 = vadd.f32 %v2702_v12, %v2517_v26 }
 0x296   : > { %v2768_v42 = vadd.f32 %v4621_v54, %v2736_v51 }
 0x298   : > { %v1800_v5 = vpop.f32.mrf.mxu1  ;;  %v2796_v11 = vmax.f32 %v2768_v42, 0.0  ;;  %v2707_v56 = vpop.f32.mrf.mxu0 }
 0x299   : > { %v2485_v63 = vpop.f32.mrf.mxu3  ;;  %v1831_v4 = vadd.f32 %v1800_v5, %v4602_v62 }
 0x29a   : > { %v2518_v53 = vadd.f32 %v2485_v63, %v2114_v41 }
 0x29b   : > { %v2115_v3 = vadd.f32 %v2084_v52, %v1831_v4 }
 0x29c   : > { %v2737_v40 = vadd.f32 %v2704_v8, %v2518_v53 }
 0x29e   : > { %v2769_v37 = vadd.f32 %v4621_v54, %v2737_v40 }
 0x2a0   : > { %v2797_v15 = vmax.f32 %v2769_v37, 0.0  ;;  %v1802_v60 = vpop.f32.mrf.mxu1  ;;  %v2709_v57 = vpop.f32.mrf.mxu0 }
 0x2a1   : > { %v2488_v2 = vpop.f32.mrf.mxu3  ;;  %v1832_v23 = vadd.f32 %v1802_v60, %v4609_v45 }
 0x2a2   : > { %v3819_v13 = vpack.c.bf16 %v2797_v15, %v2796_v11  ;;  %v2519_v50 = vadd.f32 %v2488_v2, %v2115_v3 }
 0x2a3   : > { %v2116_v0 = vadd.f32 %v2086_v31, %v1832_v23 }
 0x2a4   : > { %3848 = vst [vmem:[%s4600_s20 + $0x60] sm:$0xff] %v3819_v13   ;;  %v2738_v61 = vadd.f32 %v2707_v56, %v2519_v50 }
 0x2a6   : > { %v2770_v62 = vadd.f32 %v4621_v54, %v2738_v61 }
 0x2a8   : > { %v2798_v28 = vmax.f32 %v2770_v62, 0.0 }
 0x2a9   : > { %v2490_v44 = vpop.f32.mrf.mxu3 }
 0x2aa   : > { %v2520_v10 = vadd.f32 %v2490_v44, %v2116_v0 }
 0x2ac   : > { %v2739_v46 = vadd.f32 %v2709_v57, %v2520_v10 }
 0x2ae   : > { %v2771_v33 = vadd.f32 %v4621_v54, %v2739_v46 }
 0x2b0   : > { %v2799_v35 = vmax.f32 %v2771_v33, 0.0 }
 0x2b2   : > { %v3824_v47 = vpack.c.bf16 %v2799_v35, %v2798_v28 }
 0x2b4   : > { %3849 = vst [vmem:[%s4600_s20 + $0x68] sm:$0xff] %v3824_v47  }
 0x2b5 PF: > { %s13_s12 = sadd.s32 1, %s3892_s12  }
 0x2b6   : > { %p10_p4 = scmp.ge.s32.totalorder %s13_s12, 4  }
 0x2b8   :  { %12 = sbr.rel (!%p10_p4) target bundleno = 1 (0x1), region = 70 }

// kernel: upstep_forward.6
= control target key start
LH: loop header
LB: loop body
LE: loop exit
PB: predicated region body
PF: predicated region fallthrough
CT: control target
= control target key end

     0   :  { %s3969_s12 = smov 0   ;;  %s4715_s0 = inlined_call_operand.vmem [shape: bf16[2,232,128], index: 0, kind: input, shape index: {}]   ;;  %s4716_s1 = inlined_call_operand.vmem [shape: bf16[9,128,128], index: 1, kind: input, shape index: {}]   ;;  %s4717_s2 = inlined_call_operand.vmem [shape: f32[2,192,128], index: 2, kind: output, shape index: {0}]   ;;  %s4718_s3 = inlined_call_operand.vmem [shape: f32[2,2,128], index: 3, kind: output, shape index: {1}]  }
   0x1 LB: > { %s3087_s13 = sadd.s32 4294967295, %s3946_s12   ;;  %p3091_p0 = scmp.ge.s32.totalorder %s3946_s12, 1  ;;  %s3946_s12 = sphi %s3969_s12, %s14_s12  }
   0x2   : > { %p140_p1 = scmp.lt.s32.totalorder %s3946_s12, 3 }
   0x4   : > { %p141_p2 = pnand %p3091_p0, %p140_p1 }
   0x5   : > { %p168_p3 = scmp.lt.s32.totalorder (!%p141_p2), %s3087_s13, 1 }
   0x6   : > { %144 = sbr.rel (%p141_p2) target bundleno = 624 (0x270), region = 28 }
   0xb   : > { %v3779_v0 = vld [vmem:[%s4716_s1 + $0x78] sm:$0xff]  ;;  %v3778_v1 = vld [vmem:[%s4716_s1 + $0x70] sm:$0xff]  ;;  %s4720_s13 = smov (!%p168_p3, %s3087_s13), 1  ;;  %v3777_v2 = vld [vmem:[%s4716_s1 + $0x68] sm:$0xff]  ;;  %vm303_vm0 = vsmask.f32 7424 }
   0xc   : > { %3905 = vmatpush.bf16.msra.mxu1 %v3779_v0  ;;  %3906 = vmatpush.bf16.msra.mxu2 %v3779_v0  ;;  %s3929_s20 = smul.u32 116, %s4720_s13  ;;  %v3776_v3 = vld [vmem:[%s4716_s1 + $0x60] sm:$0xff]  ;;  %v3775_v4 = vld [vmem:[%s4716_s1 + $0x58] sm:$0xff]  ;;  %v3774_v11 = vld [vmem:[%s4716_s1 + $0x50] sm:$0xff]  ;;  %vm683_vm1 = vcmask 1046528  }
   0xd   : > { %3907 = vmatpush.bf16.msra.mxu3 %v3779_v0  ;;  %464 = vmatpush.bf16.msra.mxu0 %v3779_v0  ;;  %v3773_v22 = vld [vmem:[%s4716_s1 + $0x48] sm:$0xff]  ;;  %v3772_v31 = vld [vmem:[%s4716_s1 + $0x40] sm:$0xff]  ;;  %v3787_v40 = vld [vmem:[%s4716_s1 + $0xb8] sm:$0xff]  ;;  %s3930_s17 = smul.u32 192, %s4720_s13 }
   0xe   : > { %s3995_s25 = scalar_lea.vmem %s4715_s0, %s3929_s20  ;;  %v3807_v41 = vld [vmem:[%s4716_s1 + $0xf8] sm:$0xff]  ;;  %v3786_v48 = vld [vmem:[%s4716_s1 + $0xb0] sm:$0xff]  ;;  %v3785_v56 = vld [vmem:[%s4716_s1 + $0xa8] sm:$0xff] }
   0xf   : > { %v4001_v5 = vld [vmem:[%s3995_s25 + $0x18] sm:$0xff]  ;;  %v4004_v6 = vld [vmem:[%s3995_s25 + $0x30] sm:$0xff]  ;;  %v4007_v7 = vld [vmem:[%s3995_s25 + $0x48] sm:$0xff]  ;;  %s4612_s20 = scalar_lea.vmem %s4717_s2, %s3930_s17 }
  0x10   : > { %3908 = vmatpush.bf16.msra.mxu1 %v3778_v1  ;;  %3909 = vmatpush.bf16.msra.mxu2 %v3778_v1  ;;  %v4010_v8 = vld [vmem:[%s3995_s25] sm:$0xff]   ;;  %v4016_v10 = vld [vmem:[%s3995_s25 + $0x38] sm:$0xff]  ;;  %v328_v12 = vshll.u32 %v4001_v5, 16  ;;  %v352_v13 = vshll.u32 %v4004_v6, 16  ;;  %v4024_v14 = vld [vmem:[%s3995_s25 + $0x50] sm:$0xff]  ;;  %v376_v15 = vshll.u32 %v4007_v7, 16 }
  0x11   : > { %3910 = vmatpush.bf16.msra.mxu3 %v3778_v1  ;;  %465 = vmatpush.bf16.msra.mxu0 %v3778_v1  ;;  %v4013_v9 = vld [vmem:[%s3995_s25 + $0x20] sm:$0xff]  ;;  %v4028_v16 = vld [vmem:[%s3995_s25 + $0x8] sm:$0xff]  ;;  %v307_v17 = vshll.u32 %v4010_v8, 16  ;;  %v332_v18 = vshrl.u32 %v4001_v5, 16  ;;  %v356_v20 = vshrl.u32 %v4004_v6, 16  ;;  %v360_v21 = vshll.u32 %v4016_v10, 16 }
  0x12   : > { %v336_v19 = vshll.u32 %v4013_v9, 16  ;;  %v4038_v23 = vrot.slane %v328_v12, 1  ;;  %v4040_v24 = vrot.slane %v352_v13, 1  ;;  %v380_v25 = vshrl.u32 %v4007_v7, 16  ;;  %v3771_v46 = vld [vmem:[%s4716_s1 + $0x38] sm:$0xff]  ;;  %v3806_v49 = vld [vmem:[%s4716_s1 + $0xf0] sm:$0xff] }
  0x13   : > { %v384_v26 = vshll.u32 %v4024_v14, 16  ;;  %v4044_v27 = vrot.slane %v376_v15, 1  ;;  %v305_v28 = vshrl.u32 %v4010_v8, 16  ;;  %v309_v29 = vrot.slane %v307_v17, 1  ;;  %v3826_v47 = vld [vmem:[%s4716_s1 + $0x138] sm:$0xff]  ;;  %v3770_v50 = vld [vmem:[%s4716_s1 + $0x30] sm:$0xff] }
  0x14   : > { %3911 = vmatpush.bf16.msra.mxu1 %v3777_v2  ;;  %3912 = vmatpush.bf16.msra.mxu2 %v3777_v2  ;;  %v312_v30 = vshll.u32 %v4028_v16, 16  ;;  %v334_v32 = vor.u32 %v332_v18, %v4038_v23  ;;  %v338_v33 = vrot.slane %v336_v19, 1  ;;  %v358_v34 = vor.u32 %v356_v20, %v4040_v24  ;;  %v4080_v51 = vld [vmem:[%s3995_s25 + $0x28] sm:$0xff]  ;;  %v4083_v52 = vld [vmem:[%s3995_s25 + $0x40] sm:$0xff]  ;;  %v4086_v53 = vld [vmem:[%s3995_s25 + $0x58] sm:$0xff] }
  0x15   : > { %3913 = vmatpush.bf16.msra.mxu3 %v3777_v2  ;;  %466 = vmatpush.bf16.msra.mxu0 %v3777_v2  ;;  %v362_v35 = vrot.slane %v360_v21, 1  ;;  %v382_v36 = vor.u32 %v380_v25, %v4044_v27  ;;  %v386_v37 = vrot.slane %v384_v26, 1  ;;  %v310_v38 = vor.u32 %v309_v29, %v305_v28  ;;  %v3825_v54 = vld [vmem:[%s4716_s1 + $0x130] sm:$0xff]  ;;  %v3805_v57 = vld [vmem:[%s4716_s1 + $0xe8] sm:$0xff]  ;;  %v3823_v25 = vld [vmem:[%s4716_s1 + $0x120] sm:$0xff] }
  0x16   : > { %v314_v39 = vrot.slane %v312_v30, 1  ;;  %v339_v42 = vsel %vm303_vm0, %v334_v32, %v338_v33  ;;  %v4092_v55 = vld [vmem:[%s3995_s25 + $0x10] sm:$0xff]  ;;  %v340_v58 = vshrl.u32 %v4013_v9, 16  ;;  %v344_v59 = vshll.u32 %v4080_v51, 16  ;;  %v3769_v0 = vld [vmem:[%s4716_s1 + $0x28] sm:$0xff]  ;;  %v3783_v26 = vld [vmem:[%s4716_s1 + $0x98] sm:$0xff] }
  0x17   : > { %v363_v43 = vsel %vm303_vm0, %v358_v34, %v362_v35  ;;  %v387_v44 = vsel %vm303_vm0, %v382_v36, %v386_v37  ;;  %v364_v60 = vshrl.u32 %v4016_v10, 16  ;;  %v368_v61 = vshll.u32 %v4083_v52, 16  ;;  %v3803_v28 = vld [vmem:[%s4716_s1 + $0xd8] sm:$0xff]  ;;  %v222_v29 = vld [vmem:[%s3995_s25 + $0x60] sm:$0x1] }
  0x18   : > { %3914 = vmatpush.bf16.msra.mxu1 %v3776_v3  ;;  %3915 = vmatpush.bf16.msra.mxu2 %v3776_v3  ;;  %v315_v45 = vsel %vm303_vm0, %v310_v38, %v314_v39  ;;  %v388_v62 = vshrl.u32 %v4024_v14, 16  ;;  %v392_v63 = vshll.u32 %v4086_v53, 16  ;;  %v316_v1 = vshrl.u32 %v4028_v16, 16  ;;  %v3767_v34 = vld [vmem:[%s4716_s1 + $0x18] sm:$0xff]  ;;  %v3802_v38 = vld [vmem:[%s4716_s1 + $0xd0] sm:$0xff] }
  0x19   : > { %3916 = vmatpush.bf16.msra.mxu3 %v3776_v3  ;;  %467 = vmatpush.bf16.msra.mxu0 %v3776_v3  ;;  %v320_v2 = vshll.u32 %v4092_v55, 16  ;;  %v3824_v3 = vld [vmem:[%s4716_s1 + $0x128] sm:$0xff]  ;;  %v342_v12 = vor.u32 %v340_v58, %v338_v33  ;;  %v346_v13 = vrot.slane %v344_v59, 1  ;;  %v366_v15 = vor.u32 %v364_v60, %v362_v35  ;;  %v3822_v36 = vld [vmem:[%s4716_s1 + $0x118] sm:$0xff] }
  0x1a   : > { %v370_v17 = vrot.slane %v368_v61, 1  ;;  %v390_v18 = vor.u32 %v388_v62, %v386_v37  ;;  %v394_v19 = vrot.slane %v392_v63, 1  ;;  %v318_v20 = vor.u32 %v316_v1, %v314_v39  ;;  %v3782_v37 = vld [vmem:[%s4716_s1 + $0x90] sm:$0xff]  ;;  %v3873_v58 = vld [vmem:[%s4716_s1 + $0x1f8] sm:$0xff]  ;;  %v3819_v1 = vld [vmem:[%s4716_s1 + $0x100] sm:$0xff] }
  0x1b   : > { %v322_v21 = vrot.slane %v320_v2, 1  ;;  %v347_v30 = vsel %vm303_vm0, %v342_v12, %v346_v13  ;;  %v289_v35 = vunpack.c.l.b16 %v222_v29  ;;  %v3834_v2 = vld [vmem:[%s4716_s1 + $0x178] sm:$0xff]  ;;  %v685_v29 = vrot.slane %v4028_v16, 1 }
  0x1c   : > { %3917 = vmatpush.bf16.msra.mxu1 %v3775_v4  ;;  %3918 = vmatpush.bf16.msra.mxu2 %v3775_v4  ;;  %v395_v32 = vsel %vm303_vm0, %v390_v18, %v394_v19  ;;  %v3895_v18 = vld [vmem:[%s3995_s25] sm:$0xe] }
  0x1d   : > { %3919 = vmatpush.bf16.msra.mxu3 %v3775_v4  ;;  %468 = vmatpush.bf16.msra.mxu0 %v3775_v4  ;;  %v3784_v4 = vld [vmem:[%s4716_s1 + $0xa0] sm:$0xff]  ;;  %v323_v33 = vsel %vm303_vm0, %v318_v20, %v322_v21  ;;  %v4149_v39 = vpack.c.b16 %v289_v35, %v289_v35  ;;  %v3880_v35 = vld [vmem:[%s4716_s1 + $0x230] sm:$0xff] }
  0x20   : > { %3920 = vmatpush.bf16.msra.mxu1 %v3774_v11  ;;  %3921 = vmatpush.bf16.msra.mxu2 %v3774_v11 }
  0x21   : > { %3922 = vmatpush.bf16.msra.mxu3 %v3774_v11  ;;  %469 = vmatpush.bf16.msra.mxu0 %v3774_v11  ;;  %v3804_v11 = vld [vmem:[%s4716_s1 + $0xe0] sm:$0xff] }
  0x24   : > { %3923 = vmatpush.bf16.msra.mxu1 %v3773_v22  ;;  %3924 = vmatpush.bf16.msra.mxu2 %v3773_v22 }
  0x25   : > { %3925 = vmatpush.bf16.msra.mxu3 %v3773_v22  ;;  %470 = vmatpush.bf16.msra.mxu0 %v3773_v22  ;;  %v3768_v22 = vld [vmem:[%s4716_s1 + $0x20] sm:$0xff] }
  0x28   : > { %3926 = vmatpush.bf16.msra.mxu1 %v3772_v31  ;;  %3927 = vmatpush.bf16.msra.mxu2 %v3772_v31 }
  0x29   : > { %3928 = vmatpush.bf16.msra.mxu3 %v3772_v31  ;;  %471 = vmatpush.bf16.msra.mxu0 %v3772_v31  ;;  %v371_v31 = vsel %vm303_vm0, %v366_v15, %v370_v17  ;;  %v3897_v15 = vld [vmem:[%s3995_s25 + $0x8] sm:$0xff]  }
  0x2a   : > { %v1224_v20 = vshll.u32 %v3897_v15, 16 }
  0x2b   : > { %487 = vmatmul.bf16.vlgmr.msra.gmra.mxu1 %v339_v42  ;;  %502 = vmatmul.bf16.vlgmr.msra.gmra.mxu2 %v363_v43  ;;  %v3781_v42 = vld [vmem:[%s4716_s1 + $0x88] sm:$0xff] }
  0x2c   : > { %769 = vmatpush.bf16.msrb.mxu2 %v3787_v40  ;;  %517 = vmatmul.bf16.vlgmr.msra.gmra.mxu3 %v387_v44  ;;  %v3766_v40 = vld [vmem:[%s4716_s1 + $0x10] sm:$0xff]  ;;  %v3801_v43 = vld [vmem:[%s4716_s1 + $0xc8] sm:$0xff]  ;;  %v348_v44 = vshrl.u32 %v4080_v51, 16 }
  0x2d   : > { %1023 = vmatpush.bf16.msrb.mxu3 %v3807_v41  ;;  %472 = vmatmul.bf16.vlgmr.msra.gmra.mxu0 %v315_v45  ;;  %v3821_v41 = vld [vmem:[%s4716_s1 + $0x110] sm:$0xff]  ;;  %v372_v45 = vshrl.u32 %v4083_v52, 16 }
  0x2e   : > { %593 = vmatpush.bf16.msrb.mxu1 %v3771_v46  ;;  %1381 = vmatpush.bf16.msrb.mxu0 %v3826_v47  ;;  %v396_v46 = vshrl.u32 %v4086_v53, 16  ;;  %v400_v47 = vshll.u32 %v4149_v39, 16  ;;  %v350_v59 = vor.u32 %v348_v44, %v346_v13 }
  0x2f   : > { %v374_v60 = vor.u32 %v372_v45, %v370_v17  ;;  %v3894_v17 = vld [vmem:[%s3995_s25] sm:$0xf0]  ;;  %v3852_v45 = vld [vmem:[%s4716_s1 + $0x1a8] sm:$0xff] }
  0x30   : > { %770 = vmatpush.bf16.msrb.mxu2 %v3786_v48  ;;  %v324_v48 = vshrl.u32 %v4092_v55, 16  ;;  %v398_v61 = vor.u32 %v396_v46, %v394_v19  ;;  %v402_v62 = vrot.slane %v400_v47, 1  ;;  %v4218_v19 = vld [vmem:[%s3995_s25 + $0x10] sm:$0xff]  ;;  %v3871_v46 = vld [vmem:[%s4716_s1 + $0x1e8] sm:$0xff] }
  0x31   : > { %1024 = vmatpush.bf16.msrb.mxu3 %v3806_v49  ;;  %v3765_v49 = vld [vmem:[%s4716_s1 + $0x8] sm:$0xff] }
  0x32   : > { %594 = vmatpush.bf16.msrb.mxu1 %v3770_v50  ;;  %1382 = vmatpush.bf16.msrb.mxu0 %v3825_v54  ;;  %v3820_v50 = vld [vmem:[%s4716_s1 + $0x108] sm:$0xff]  ;;  %v3780_v54 = vld [vmem:[%s4716_s1 + $0x80] sm:$0xff]  ;;  %v326_v63 = vor.u32 %v324_v48, %v322_v21  ;;  %v403_v12 = vsel %vm303_vm0, %v398_v61, %v402_v62  ;;  %v3896_v21 = vor.u32 %v3895_v18, %v3894_v17  ;;  %v693_v17 = vrot.slane %v4080_v51, 1 }
  0x33   : > { %v3832_v47 = vld [vmem:[%s4716_s1 + $0x168] sm:$0xff]  ;;  %v4249_v48 = vld [vmem:[%s3995_s25 + $0x20] sm:$0xff] }
  0x34   : > { %771 = vmatpush.bf16.msrb.mxu2 %v3785_v56  ;;  %v3800_v56 = vld [vmem:[%s4716_s1 + $0xc0] sm:$0xff]  ;;  %v331_v13 = vsel %vm303_vm0, %v326_v63, %v4038_v23  ;;  %v3833_v23 = vld [vmem:[%s4716_s1 + $0x170] sm:$0xff] }
  0x35   : > { %1025 = vmatpush.bf16.msrb.mxu3 %v3805_v57  ;;  %v3854_v57 = vld [vmem:[%s4716_s1 + $0x1b8] sm:$0xff]  ;;  %v3851_v61 = vld [vmem:[%s4716_s1 + $0x1a0] sm:$0xff] }
  0x36   : > { %595 = vmatpush.bf16.msrb.mxu1 %v3769_v0  ;;  %1383 = vmatpush.bf16.msrb.mxu0 %v3824_v3  ;;  %v3764_v0 = vld [vmem:[%s4716_s1] sm:$0xff]  ;;  %v3881_v3 = vld [vmem:[%s4716_s1 + $0x238] sm:$0xff] }
  0x37   : > { %v3870_v62 = vld [vmem:[%s4716_s1 + $0x1e0] sm:$0xff] }
  0x38   : > { %772 = vmatpush.bf16.msrb.mxu2 %v3784_v4  ;;  %v355_v4 = vsel %vm303_vm0, %v350_v59, %v4040_v24  ;;  %v3853_v24 = vld [vmem:[%s4716_s1 + $0x1b0] sm:$0xff]  ;;  %v3790_v59 = vld [vmem:[%s3995_s25 + $0x18] sm:$0xff]  ;;  %v3831_v63 = vld [vmem:[%s4716_s1 + $0x160] sm:$0xff] }
  0x39   : > { %1026 = vmatpush.bf16.msrb.mxu3 %v3804_v11  ;;  %v379_v11 = vsel %vm303_vm0, %v374_v60, %v4044_v27  ;;  %v3872_v27 = vld [vmem:[%s4716_s1 + $0x1f0] sm:$0xff] }
  0x3a   : > { %596 = vmatpush.bf16.msrb.mxu1 %v3768_v22  ;;  %1384 = vmatpush.bf16.msrb.mxu0 %v3823_v25  ;;  %v1222_v22 = vshrl.u32 %v3897_v15, 16  ;;  %v1226_v25 = vrot.slane %v1224_v20, 1  ;;  %v3878_v15 = vld [vmem:[%s4716_s1 + $0x220] sm:$0xff] }
  0x3b   : > { %492 = vmatmul.bf16.gmra.mxu1 %v347_v30  ;;  %507 = vmatmul.bf16.gmra.mxu2 %v371_v31 }
  0x3c   : > { %773 = vmatpush.bf16.msrb.mxu2 %v3783_v26  ;;  %522 = vmatmul.bf16.gmra.mxu3 %v395_v32  ;;  %v1229_v26 = vshll.u32 %v4218_v19, 16  ;;  %v1227_v30 = vor.u32 %v1226_v25, %v1222_v22  ;;  %v3850_v25 = vld [vmem:[%s4716_s1 + $0x198] sm:$0xff] }
  0x3d   : > { %1027 = vmatpush.bf16.msrb.mxu3 %v3803_v28  ;;  %477 = vmatmul.bf16.gmra.mxu0 %v323_v33  ;;  %v684_v28 = vrot.slane %v3896_v21, 1  ;;  %v3788_v33 = vld [vmem:[%s3995_s25 + $0x8] sm:$0xff] }
  0x3e   : > { %597 = vmatpush.bf16.msrb.mxu1 %v3767_v34  ;;  %1385 = vmatpush.bf16.msrb.mxu0 %v3822_v36  ;;  %v1231_v31 = vrot.slane %v1229_v26, 1  ;;  %v4230_v36 = vld [vmem:[%s3995_s25 + $0x18] sm:$0xff]  ;;  %v3792_v21 = vld [vmem:[%s3995_s25 + $0x28] sm:$0xff] }
  0x3f   : > { %v686_v32 = vsel %vm683_vm1, %v684_v28, %v685_v29  ;;  %v3869_v26 = vld [vmem:[%s4716_s1 + $0x1d8] sm:$0xff] }
  0x40   : > { %774 = vmatpush.bf16.msrb.mxu2 %v3782_v37  ;;  %v1232_v34 = vsel %vm303_vm0, %v1227_v30, %v1231_v31  ;;  %v1233_v37 = vshrl.u32 %v4218_v19, 16  ;;  %v4300_v28 = vld [vmem:[%s3995_s25 + $0x38] sm:$0xff] }
  0x41   : > { %1028 = vmatpush.bf16.msrb.mxu3 %v3802_v38  ;;  %v1237_v38 = vshll.u32 %v4230_v36, 16  ;;  %v1269_v30 = vshll.u32 %v4300_v28, 16 }
  0x42   : > { %598 = vmatpush.bf16.msrb.mxu1 %v3766_v40  ;;  %1386 = vmatpush.bf16.msrb.mxu0 %v3821_v41  ;;  %v687_v40 = vrot.slane %v4092_v55, 1  ;;  %v1235_v41 = vor.u32 %v1233_v37, %v1231_v31  ;;  %v3877_v31 = vld [vmem:[%s4716_s1 + $0x218] sm:$0xff] }
  0x44   : > { %775 = vmatpush.bf16.msrb.mxu2 %v3781_v42  ;;  %v1239_v42 = vrot.slane %v1237_v38, 1  ;;  %v3793_v38 = vld [vmem:[%s3995_s25 + $0x30] sm:$0xff] }
  0x45   : > { %1029 = vmatpush.bf16.msrb.mxu3 %v3801_v43  ;;  %v3789_v43 = vld [vmem:[%s3995_s25 + $0x10] sm:$0xff] }
  0x46   : > { %599 = vmatpush.bf16.msrb.mxu1 %v3765_v49  ;;  %1387 = vmatpush.bf16.msrb.mxu0 %v3820_v50  ;;  %v1240_v44 = vsel %vm303_vm0, %v1235_v41, %v1239_v42  ;;  %v1241_v49 = vshrl.u32 %v4230_v36, 16  ;;  %v1245_v50 = vshll.u32 %v4249_v48, 16 }
  0x48   : > { %776 = vmatpush.bf16.msrb.mxu2 %v3780_v54  ;;  %v689_v54 = vrot.slane %v4001_v5, 1 }
  0x49   : > { %1030 = vmatpush.bf16.msrb.mxu3 %v3800_v56  ;;  %v1243_v56 = vor.u32 %v1241_v49, %v1239_v42  ;;  %v4320_v42 = vld [vmem:[%s3995_s25 + $0x40] sm:$0xff]  ;;  %v697_v49 = vrot.slane %v4016_v10, 1 }
  0x4a   : > { %600 = vmatpush.bf16.msrb.mxu1 %v3764_v0  ;;  %1388 = vmatpush.bf16.msrb.mxu0 %v3819_v1  ;;  %v4271_v0 = vld [vmem:[%s3995_s25 + $0x28] sm:$0xff] }
  0x4b   : > { %497 = vmatmul.bf16.gmra.mxu1 %v355_v4  ;;  %512 = vmatmul.bf16.gmra.mxu2 %v379_v11  ;;  %v1253_v1 = vshll.u32 %v4271_v0, 16 }
  0x4c   : > { %1834 = vmatpush.bf16.msra.mxu2 %v3854_v57  ;;  %527 = vmatmul.bf16.gmra.mxu3 %v403_v12  ;;  %v1247_v57 = vrot.slane %v1245_v50, 1  ;;  %v3791_v12 = vld [vmem:[%s3995_s25 + $0x20] sm:$0xff] }
  0x4d   : > { %2192 = vmatpush.bf16.msra.mxu3 %v3873_v58  ;;  %482 = vmatmul.bf16.gmra.mxu0 %v331_v13  ;;  %v690_v58 = vsel %vm683_vm1, %v687_v40, %v689_v54  ;;  %v1255_v4 = vrot.slane %v1253_v1, 1  ;;  %v4358_v1 = vld [vmem:[%s3995_s25 + $0x48] sm:$0xff] }
  0x4e   : > { %1580 = vmatpush.bf16.msra.mxu1 %v3834_v2  ;;  %2391 = vmatpush.bf16.msra.mxu0 %v3881_v3  ;;  %v1248_v60 = vsel %vm303_vm0, %v1243_v56, %v1247_v57  ;;  %v691_v2 = vrot.slane %v4013_v9, 1 }
  0x50   : > { %1835 = vmatpush.bf16.msra.mxu2 %v3853_v24  ;;  %v692_v11 = vsel %vm683_vm1, %v689_v54, %v691_v2  ;;  %v4284_v24 = vld [vmem:[%s3995_s25 + $0x30] sm:$0xff] }
  0x51   : > { %2193 = vmatpush.bf16.msra.mxu3 %v3872_v27  ;;  %v1257_v27 = vshrl.u32 %v4271_v0, 16 }
  0x52   : > { %1581 = vmatpush.bf16.msra.mxu1 %v3833_v23  ;;  %2392 = vmatpush.bf16.msra.mxu0 %v3880_v35  ;;  %v1261_v23 = vshll.u32 %v4284_v24, 16 }
  0x53   : > { %v1259_v18 = vor.u32 %v1257_v27, %v1255_v4 }
  0x54   : > { %1836 = vmatpush.bf16.msra.mxu2 %v3852_v45  ;;  %v1263_v20 = vrot.slane %v1261_v23, 1 }
  0x55   : > { %2194 = vmatpush.bf16.msra.mxu3 %v3871_v46  ;;  %v1273_v46 = vshrl.u32 %v4300_v28, 16 }
  0x56   : > { %1582 = vmatpush.bf16.msra.mxu1 %v3832_v47  ;;  %v1264_v22 = vsel %vm303_vm0, %v1259_v18, %v1263_v20  ;;  %v1277_v47 = vshll.u32 %v4320_v42, 16 }
  0x58   : > { %1837 = vmatpush.bf16.msra.mxu2 %v3851_v61  ;;  %v1279_v54 = vrot.slane %v1277_v47, 1  ;;  %v3794_v61 = vld [vmem:[%s3995_s25 + $0x38] sm:$0xff] }
  0x59   : > { %2195 = vmatpush.bf16.msra.mxu3 %v3870_v62 }
  0x5a   : > { %1583 = vmatpush.bf16.msra.mxu1 %v3831_v63 }
  0x5b   : > { %601 = vmatmul.bf16.vlgmr.msrb.gmra.mxu1 %v4010_v8  ;;  %777 = vmatmul.bf16.vlgmr.msrb.gmra.mxu2 %v686_v32  ;;  %v688_v8 = vsel %vm683_vm1, %v685_v29, %v687_v40  ;;  %v1265_v29 = vshrl.u32 %v4284_v24, 16  ;;  %v695_v32 = vrot.slane %v4004_v6, 1 }
  0x5c   : > { %1031 = vmatmul.bf16.vlgmr.msrb.gmra.mxu3 %v3788_v33  ;;  %1838 = vmatpush.bf16.msra.mxu2 %v3850_v25  ;;  %v3848_v25 = vld [vmem:[%s4716_s1 + $0x188] sm:$0xff] }
  0x5d   : > { %1389 = vmatmul.bf16.vlgmr.msrb.gmra.mxu0 %v1232_v34  ;;  %2196 = vmatpush.bf16.msra.mxu3 %v3869_v26  ;;  %v1267_v33 = vor.u32 %v1265_v29, %v1263_v20  ;;  %v1271_v34 = vrot.slane %v1269_v30, 1  ;;  %v696_v37 = vsel %vm683_vm1, %v693_v17, %v695_v32  ;;  %v3867_v26 = vld [vmem:[%s4716_s1 + $0x1c8] sm:$0xff] }
  0x5f   : > { %v1272_v41 = vsel %vm303_vm0, %v1267_v33, %v1271_v34  ;;  %v1275_v50 = vor.u32 %v1273_v46, %v1271_v34  ;;  %v3828_v34 = vld [vmem:[%s4716_s1 + $0x148] sm:$0xff] }
  0x61   : > { %v1280_v63 = vsel %vm303_vm0, %v1275_v50, %v1279_v54  ;;  %v3796_v50 = vld [vmem:[%s3995_s25 + $0x48] sm:$0xff] }
  0x6b   : > { %606 = vmatmul.bf16.gmra.mxu1 %v4028_v16  ;;  %782 = vmatmul.bf16.gmra.mxu2 %v688_v8  ;;  %v3879_v16 = vld [vmem:[%s4716_s1 + $0x228] sm:$0xff] }
  0x6c   : > { %1036 = vmatmul.bf16.gmra.mxu3 %v3789_v43  ;;  %2393 = vmatpush.bf16.msra.mxu0 %v3879_v16  ;;  %v3868_v16 = vld [vmem:[%s4716_s1 + $0x1d0] sm:$0xff] }
  0x6d   : > { %1394 = vmatmul.bf16.gmra.mxu0 %v1240_v44  ;;  %2197 = vmatpush.bf16.msra.mxu3 %v3868_v16 }
  0x70   : > { %2394 = vmatpush.bf16.msra.mxu0 %v3878_v15 }
  0x71   : > { %2198 = vmatpush.bf16.msra.mxu3 %v3867_v26 }
  0x74   : > { %2395 = vmatpush.bf16.msra.mxu0 %v3877_v31 }
  0x7b   : > { %611 = vmatmul.bf16.gmra.mxu1 %v4092_v55  ;;  %787 = vmatmul.bf16.gmra.mxu2 %v690_v58  ;;  %v1249_v55 = vshrl.u32 %v4249_v48, 16  ;;  %v3829_v58 = vld [vmem:[%s4716_s1 + $0x150] sm:$0xff] }
  0x7c   : > { %1041 = vmatmul.bf16.gmra.mxu3 %v3790_v59 }
  0x7d   : > { %1399 = vmatmul.bf16.gmra.mxu0 %v1248_v60  ;;  %v1251_v3 = vor.u32 %v1249_v55, %v1247_v57  ;;  %v698_v60 = vsel %vm683_vm1, %v695_v32, %v697_v49  ;;  %v3876_v55 = vld [vmem:[%s4716_s1 + $0x210] sm:$0xff]  ;;  %v1289_v32 = vshrl.u32 %v4358_v1, 16 }
  0x7e   : > { %2396 = vmatpush.bf16.msra.mxu0 %v3876_v55 }
  0x7f   : > { %v1256_v13 = vsel %vm303_vm0, %v1251_v3, %v1255_v4 }
  0x8b   : > { %616 = vmatmul.bf16.gmra.mxu1 %v4001_v5  ;;  %792 = vmatmul.bf16.gmra.mxu2 %v692_v11  ;;  %v694_v5 = vsel %vm683_vm1, %v691_v2, %v693_v17 }
  0x8c   : > { %1046 = vmatmul.bf16.gmra.mxu3 %v3791_v12  ;;  %v1285_v12 = vshll.u32 %v4358_v1, 16 }
  0x8d   : > { %1404 = vmatmul.bf16.gmra.mxu0 %v1256_v13  ;;  %v699_v13 = vrot.slane %v4083_v52, 1 }
  0x8e   : > { %v1287_v27 = vrot.slane %v1285_v12, 1 }
  0x8f   : > { %v700_v20 = vsel %vm683_vm1, %v697_v49, %v699_v13 }
  0x9b   : > { %621 = vmatmul.bf16.gmra.mxu1 %v4013_v9  ;;  %797 = vmatmul.bf16.gmra.mxu2 %v694_v5  ;;  %v3830_v9 = vld [vmem:[%s4716_s1 + $0x158] sm:$0xff]  ;;  %v3795_v5 = vld [vmem:[%s3995_s25 + $0x40] sm:$0xff] }
  0x9c   : > { %1051 = vmatmul.bf16.gmra.mxu3 %v3792_v21  ;;  %1584 = vmatpush.bf16.msra.mxu1 %v3830_v9  ;;  %v4390_v9 = vld [vmem:[%s3995_s25 + $0x50] sm:$0xff] }
  0x9d   : > { %1409 = vmatmul.bf16.gmra.mxu0 %v1264_v22  ;;  %v1293_v33 = vshll.u32 %v4390_v9, 16 }
  0x9f   : > { %v1295_v46 = vrot.slane %v1293_v33, 1 }
  0xa0   : > { %1585 = vmatpush.bf16.msra.mxu1 %v3829_v58 }
  0xa4   : > { %1586 = vmatpush.bf16.msra.mxu1 %v3828_v34 }
  0xa8   : > { %v4311_v35 = vpop.f32.mrf.mxu1 }
  0xaa   : > { %v4315_v40 = vpop.f32.mrf.mxu0 }
  0xab   : > { %626 = vmatmul.bf16.gmra.mxu1 %v4080_v51  ;;  %802 = vmatmul.bf16.gmra.mxu2 %v696_v37  ;;  %v3849_v51 = vld [vmem:[%s4716_s1 + $0x190] sm:$0xff]  ;;  %v3875_v37 = vld [vmem:[%s4716_s1 + $0x208] sm:$0xff] }
  0xac   : > { %1056 = vmatmul.bf16.gmra.mxu3 %v3793_v38  ;;  %1839 = vmatpush.bf16.msra.mxu2 %v3849_v51  ;;  %v701_v38 = vrot.slane %v4007_v7, 1 }
  0xad   : > { %1414 = vmatmul.bf16.gmra.mxu0 %v1272_v41  ;;  %v1291_v41 = vor.u32 %v1289_v32, %v1287_v27 }
  0xae   : > { %v4322_v8 = vpop.f32.mrf.mxu2  ;;  %2397 = vmatpush.bf16.msra.mxu0 %v3875_v37  ;;  %v702_v49 = vsel %vm683_vm1, %v699_v13, %v701_v38 }
  0xaf   : > { %v4324_v43 = vpop.f32.mrf.mxu3 }
  0xb0   : > { %v4326_v44 = vpop.f32.mrf.mxu1  ;;  %1840 = vmatpush.bf16.msra.mxu2 %v3848_v25 }
  0xb2   : > { %v4328_v45 = vpop.f32.mrf.mxu0 }
  0xb6   : > { %v4339_v56 = vpop.f32.mrf.mxu2 }
  0xb7   : > { %v4341_v57 = vpop.f32.mrf.mxu3 }
  0xb8   : > { %v4346_v59 = vpop.f32.mrf.mxu1 }
  0xba   : > { %v4350_v62 = vpop.f32.mrf.mxu0 }
  0xbb   : > { %631 = vmatmul.bf16.gmra.mxu1 %v4004_v6  ;;  %807 = vmatmul.bf16.gmra.mxu2 %v698_v60  ;;  %v1281_v6 = vshrl.u32 %v4320_v42, 16  ;;  %v1296_v60 = vsel %vm303_vm0, %v1291_v41, %v1295_v46 }
  0xbc   : > { %1061 = vmatmul.bf16.gmra.mxu3 %v3794_v61  ;;  %v4419_v61 = vld [vmem:[%s3995_s25 + $0x58] sm:$0xff] }
  0xbd   : > { %1419 = vmatmul.bf16.gmra.mxu0 %v1280_v63  ;;  %v1283_v15 = vor.u32 %v1281_v6, %v1279_v54 }
  0xbe   : > { %v4360_v2 = vpop.f32.mrf.mxu2 }
  0xbf   : > { %v4362_v3 = vpop.f32.mrf.mxu3  ;;  %v1288_v22 = vsel %vm303_vm0, %v1283_v15, %v1287_v27 }
  0xc0   : > { %v4364_v4 = vpop.f32.mrf.mxu1 }
  0xc2   : > { %v4366_v11 = vpop.f32.mrf.mxu0 }
  0xc6   : > { %v4371_v23 = vpop.f32.mrf.mxu2 }
  0xc7   : > { %v4373_v17 = vpop.f32.mrf.mxu3 }
  0xc8   : > { %v4375_v18 = vpop.f32.mrf.mxu1 }
  0xca   : > { %v4379_v21 = vpop.f32.mrf.mxu0 }
  0xcb   : > { %636 = vmatmul.bf16.gmra.mxu1 %v4016_v10  ;;  %812 = vmatmul.bf16.gmra.mxu2 %v700_v20  ;;  %v1301_v20 = vshll.u32 %v4419_v61, 16 }
  0xcc   : > { %1066 = vmatmul.bf16.gmra.mxu3 %v3795_v5  ;;  %v3866_v5 = vld [vmem:[%s4716_s1 + $0x1c0] sm:$0xff] }
  0xcd   : > { %1424 = vmatmul.bf16.gmra.mxu0 %v1288_v22  ;;  %2199 = vmatpush.bf16.msra.mxu3 %v3866_v5  ;;  %v1303_v26 = vrot.slane %v1301_v20, 1 }
  0xce   : > { %v4392_v29 = vpop.f32.mrf.mxu2 }
  0xcf   : > { %v4394_v30 = vpop.f32.mrf.mxu3 }
  0xd0   : > { %v4396_v10 = vpop.f32.mrf.mxu1 }
  0xd2   : > { %v4398_v31 = vpop.f32.mrf.mxu0 }
  0xd6   : > { %v4409_v47 = vpop.f32.mrf.mxu2 }
  0xd7   : > { %v4411_v51 = vpop.f32.mrf.mxu3 }
  0xd8   : > { %v602_v16 = vpop.f32.mrf.mxu1 }
  0xd9   : > { %v603_v54 = vadd.f32 %v602_v16, %v4315_v40  ;;  %v1297_v40 = vshrl.u32 %v4390_v9, 16  ;;  %v3797_v16 = vld [vmem:[%s3995_s25 + $0x50] sm:$0xff] }
  0xda   : > { %v1390_v58 = vpop.f32.mrf.mxu0 }
  0xdb   : > { %641 = vmatmul.bf16.gmra.mxu1 %v4083_v52  ;;  %817 = vmatmul.bf16.gmra.mxu2 %v702_v49  ;;  %v3847_v52 = vld [vmem:[%s4716_s1 + $0x180] sm:$0xff]  ;;  %v1299_v25 = vor.u32 %v1297_v40, %v1295_v46 }
  0xdc   : > { %1071 = vmatmul.bf16.gmra.mxu3 %v3796_v50  ;;  %1841 = vmatpush.bf16.msra.mxu2 %v3847_v52  ;;  %v705_v52 = vrot.slane %v4086_v53, 1 }
  0xdd   : > { %1429 = vmatmul.bf16.gmra.mxu0 %v1296_v60  ;;  %v1304_v60 = vsel %vm303_vm0, %v1299_v25, %v1303_v26 }
  0xde   : > { %v778_v63 = vpop.f32.mrf.mxu2 }
  0xdf   : > { %v838_v55 = vadd.f32 %v778_v63, %v603_v54  ;;  %v1032_v6 = vpop.f32.mrf.mxu3  ;;  %v4447_v63 = vld [vmem:[%s3995_s25 + $0x60] sm:$0xff] }
  0xe0   : > { %v604_v12 = vpop.f32.mrf.mxu1  ;;  %v1309_v40 = vshll.u32 %v4447_v63, 16 }
  0xe1   : > { %v1092_v15 = vadd.f32 %v1032_v6, %v838_v55  ;;  %v605_v13 = vadd.f32 %v604_v12, %v4328_v45  ;;  %v703_v45 = vrot.slane %v4024_v14, 1 }
  0xe2   : > { %v1392_v27 = vpop.f32.mrf.mxu0  ;;  %v1311_v25 = vrot.slane %v1309_v40, 1 }
  0xe3   : > { %v4430_v22 = vadd.f32 %v1390_v58, %v1092_v15  ;;  %v704_v41 = vsel %vm683_vm1, %v701_v38, %v703_v45  ;;  %v3827_v58 = vld [vmem:[%s4716_s1 + $0x140] sm:$0xff] }
  0xe4   : > { %v3874_v38 = vld [vmem:[%s4716_s1 + $0x200] sm:$0xff]  ;;  %1587 = vmatpush.bf16.msra.mxu1 %v3827_v58 }
  0xe5   : > { %2398 = vmatpush.bf16.msra.mxu0 %v3874_v38 }
  0xe6   : > { %v780_v32 = vpop.f32.mrf.mxu2 }
  0xe7   : > { %v839_v33 = vadd.f32 %v780_v32, %v605_v13  ;;  %v1034_v34 = vpop.f32.mrf.mxu3 }
  0xe8   : > { %v607_v37 = vpop.f32.mrf.mxu1 }
  0xe9   : > { %v1093_v49 = vadd.f32 %v1034_v34, %v839_v33  ;;  %v608_v50 = vadd.f32 %v607_v37, %v4350_v62  ;;  %v1140_v33 = vld [vmem:[%s3995_s25 + $0x68] sm:$0x1] }
  0xea   : > { %v1395_v54 = vpop.f32.mrf.mxu0 }
  0xeb   : > { %646 = vmatmul.bf16.gmra.mxu1 %v4007_v7  ;;  %822 = vmatmul.bf16.gmra.mxu2 %v704_v41  ;;  %v4441_v46 = vadd.f32 %v1392_v27, %v1093_v49  ;;  %v1305_v27 = vshrl.u32 %v4419_v61, 16  ;;  %v3798_v49 = vld [vmem:[%s3995_s25 + $0x58] sm:$0xff] }
  0xec   : > { %1076 = vmatmul.bf16.gmra.mxu3 %v3797_v16  ;;  %v706_v16 = vsel %vm683_vm1, %v703_v45, %v705_v52 }
  0xed   : > { %1434 = vmatmul.bf16.gmra.mxu0 %v1304_v60  ;;  %v1307_v5 = vor.u32 %v1305_v27, %v1303_v26  ;;  %v707_v27 = vrot.slane %v4149_v39, 1 }
  0xee   : > { %v783_v62 = vpop.f32.mrf.mxu2 }
  0xef   : > { %v840_v55 = vadd.f32 %v783_v62, %v608_v50  ;;  %v1037_v6 = vpop.f32.mrf.mxu3  ;;  %v1312_v58 = vsel %vm303_vm0, %v1307_v5, %v1311_v25 }
  0xf0   : > { %v609_v12 = vpop.f32.mrf.mxu1 }
  0xf1   : > { %v1094_v7 = vadd.f32 %v1037_v6, %v840_v55  ;;  %v610_v15 = vadd.f32 %v609_v12, %v4366_v11 }
  0xf2   : > { %v1397_v13 = vpop.f32.mrf.mxu0 }
  0xf3   : > { %v4452_v20 = vadd.f32 %v1395_v54, %v1094_v7  ;;  %v1207_v54 = vunpack.c.l.b16 %v1140_v33 }
  0xf5   : > { %v4463_v38 = vpack.c.b16 %v1207_v54, %v1207_v54  ;;  %v4482_v54 = vld [vmem:[%s3995_s25 + $0x18] sm:$0xff] }
  0xf6   : > { %v785_v32 = vpop.f32.mrf.mxu2 }
  0xf7   : > { %v841_v34 = vadd.f32 %v785_v32, %v610_v15  ;;  %v1039_v37 = vpop.f32.mrf.mxu3  ;;  %v1313_v15 = vshrl.u32 %v4447_v63, 16 }
  0xf8   : > { %v612_v41 = vpop.f32.mrf.mxu1 }
  0xf9   : > { %v1095_v11 = vadd.f32 %v1039_v37, %v841_v34  ;;  %v613_v50 = vadd.f32 %v612_v41, %v4379_v21  ;;  %v1315_v40 = vor.u32 %v1313_v15, %v1311_v25  ;;  %v3799_v41 = vld [vmem:[%s3995_s25 + $0x60] sm:$0xff] }
  0xfa   : > { %v1400_v60 = vpop.f32.mrf.mxu0 }
  0xfb   : > { %651 = vmatmul.bf16.gmra.mxu1 %v4024_v14  ;;  %827 = vmatmul.bf16.gmra.mxu2 %v706_v16  ;;  %v4461_v26 = vadd.f32 %v1397_v13, %v1095_v11  ;;  %v1317_v14 = vshll.u32 %v4463_v38, 16 }
  0xfc   : > { %1081 = vmatmul.bf16.gmra.mxu3 %v3798_v49 }
  0xfd   : > { %1439 = vmatmul.bf16.gmra.mxu0 %v1312_v58  ;;  %v1319_v5 = vrot.slane %v1317_v14, 1  ;;  %v3898_v58 = vld [vmem:[%s3995_s25 + $0x8] sm:$0xf0] }
  0xfe   : > { %v788_v62 = vpop.f32.mrf.mxu2 }
  0xff   : > { %v842_v55 = vadd.f32 %v788_v62, %v613_v50  ;;  %v1042_v45 = vpop.f32.mrf.mxu3  ;;  %v1320_v11 = vsel %vm303_vm0, %v1315_v40, %v1319_v5  ;;  %v3901_v50 = vld [vmem:[%s3995_s25 + $0x10] sm:$0xff]   ;;  %v2040_v40 = vshll.u32 %v4482_v54, 16 }
 0x100   : > { %v614_v6 = vpop.f32.mrf.mxu1  ;;  %v2035_v25 = vshll.u32 %v3901_v50, 16 }
 0x101   : > { %v1096_v12 = vadd.f32 %v1042_v45, %v842_v55  ;;  %v615_v21 = vadd.f32 %v614_v6, %v4398_v31  ;;  %v708_v31 = vsel %vm683_vm1, %v705_v52, %v707_v27  ;;  %v3899_v52 = vld [vmem:[%s3995_s25 + $0x8] sm:$0xe]  ;;  %v3902_v55 = vld [vmem:[%s3995_s25 + $0x10] sm:$0xf0]  ;;  %v3903_v45 = vld [vmem:[%s3995_s25 + $0x10] sm:$0xe] }
 0x102   : > { %v1402_v7 = vpop.f32.mrf.mxu0  ;;  %v3900_v15 = vor.u32 %v3899_v52, %v3898_v58  ;;  %v2037_v14 = vrot.slane %v2035_v25, 1  ;;  %v3904_v5 = vor.u32 %v3903_v45, %v3902_v55 }
 0x103   : > { %v4468_v13 = vadd.f32 %v1400_v60, %v1096_v12 }
 0x106   : > { %v790_v32 = vpop.f32.mrf.mxu2 }
 0x107   : > { %v843_v33 = vadd.f32 %v790_v32, %v615_v21  ;;  %v1044_v34 = vpop.f32.mrf.mxu3  ;;  %v1495_v32 = vrot.slane %v3900_v15, 1 }
 0x108   : > { %v617_v37 = vpop.f32.mrf.mxu1 }
 0x109   : > { %v1097_v16 = vadd.f32 %v1044_v34, %v843_v33  ;;  %v618_v60 = vadd.f32 %v617_v37, %v4311_v35  ;;  %v1496_v33 = vrot.slane %v4218_v19, 1 }
 0x10a   : > { %v1405_v49 = vpop.f32.mrf.mxu0 }
 0x10b   : > { %656 = vmatmul.bf16.gmra.mxu1 %v4086_v53  ;;  %832 = vmatmul.bf16.gmra.mxu2 %v708_v31  ;;  %v4476_v39 = vadd.f32 %v1402_v7, %v1097_v16  ;;  %v2033_v53 = vshrl.u32 %v3901_v50, 16  ;;  %v2042_v31 = vrot.slane %v2040_v40, 1  ;;  %v2307_v16 = vrot.slane %v4482_v54, 1 }
 0x10c   : > { %1086 = vmatmul.bf16.gmra.mxu3 %v3799_v41  ;;  %v2306_v41 = vrot.slane %v3904_v5, 1  ;;  %v1497_v52 = vsel %vm683_vm1, %v1495_v32, %v1496_v33  ;;  %v2044_v40 = vshrl.u32 %v4482_v54, 16 }
 0x10d   : > { %1444 = vmatmul.bf16.gmra.mxu0 %v1320_v11  ;;  %v2038_v34 = vor.u32 %v2037_v14, %v2033_v53 }
 0x10e   : > { %v793_v62 = vpop.f32.mrf.mxu2  ;;  %v2308_v19 = vsel %vm683_vm1, %v2306_v41, %v2307_v16 }
 0x10f   : > { %v844_v6 = vadd.f32 %v793_v62, %v618_v60  ;;  %v1047_v12 = vpop.f32.mrf.mxu3  ;;  %v3835_v60 = vld [vmem:[%s3995_s25 + $0x10] sm:$0xff]  ;;  %v2043_v55 = vsel %vm303_vm0, %v2038_v34, %v2042_v31 }
 0x110   : > { %v619_v21 = vpop.f32.mrf.mxu1 }
 0x111   : > { %v1098_v7 = vadd.f32 %v1047_v12, %v844_v6  ;;  %v620_v37 = vadd.f32 %v619_v21, %v4326_v44  ;;  %v3856_v6 = vld [vmem:[%s3995_s25 + $0x20] sm:$0xff] }
 0x112   : > { %v1407_v27 = vpop.f32.mrf.mxu0  ;;  %v2048_v5 = vshll.u32 %v3856_v6, 16 }
 0x113   : > { %v4487_v35 = vadd.f32 %v1405_v49, %v1098_v7 }
 0x114   : > { %v2050_v41 = vrot.slane %v2048_v5, 1 }
 0x116   : > { %v795_v11 = vpop.f32.mrf.mxu2 }
 0x117   : > { %v845_v50 = vadd.f32 %v795_v11, %v620_v37  ;;  %v1049_v25 = vpop.f32.mrf.mxu3  ;;  %v2046_v37 = vor.u32 %v2044_v40, %v2042_v31  ;;  %v3857_v31 = vld [vmem:[%s3995_s25 + $0x28] sm:$0xff] }
 0x118   : > { %v622_v58 = vpop.f32.mrf.mxu1 }
 0x119   : > { %v1099_v49 = vadd.f32 %v1049_v25, %v845_v50  ;;  %v623_v45 = vadd.f32 %v622_v58, %v4346_v59  ;;  %v2309_v59 = vrot.slane %v3856_v6, 1 }
 0x11a   : > { %v1410_v62 = vpop.f32.mrf.mxu0 }
 0x11b   : > { %1588 = vmatmul.bf16.vlgmr.msra.gmra.mxu1 %v1497_v52  ;;  %1842 = vmatmul.bf16.vlgmr.msra.gmra.mxu2 %v3835_v60  ;;  %v4496_v44 = vadd.f32 %v1407_v27, %v1099_v49  ;;  %v1498_v27 = vrot.slane %v4230_v36, 1  ;;  %v3836_v60 = vld [vmem:[%s3995_s25 + $0x18] sm:$0xff] }
 0x11c   : > { %2200 = vmatmul.bf16.vlgmr.msra.gmra.mxu3 %v2043_v55  ;;  %v2310_v55 = vsel %vm683_vm1, %v2307_v16, %v2309_v59  ;;  %v1500_v16 = vrot.slane %v4249_v48, 1 }
 0x11d   : > { %2399 = vmatmul.bf16.vlgmr.msra.gmra.mxu0 %v2308_v19  ;;  %v1499_v52 = vsel %vm683_vm1, %v1496_v33, %v1498_v27 }
 0x11e   : > { %v798_v12 = vpop.f32.mrf.mxu2 }
 0x11f   : > { %v846_v21 = vadd.f32 %v798_v12, %v623_v45  ;;  %v1052_v15 = vpop.f32.mrf.mxu3 }
 0x120   : > { %v624_v53 = vpop.f32.mrf.mxu1 }
 0x121   : > { %v1100_v14 = vadd.f32 %v1052_v15, %v846_v21  ;;  %v625_v34 = vadd.f32 %v624_v53, %v4364_v4  ;;  %v2052_v53 = vshrl.u32 %v3856_v6, 16 }
 0x122   : > { %v1412_v7 = vpop.f32.mrf.mxu0 }
 0x123   : > { %v4501_v32 = vadd.f32 %v1410_v62, %v1100_v14  ;;  %v2051_v62 = vsel %vm303_vm0, %v2046_v37, %v2050_v41  ;;  %v2056_v14 = vshll.u32 %v3857_v31, 16  ;;  %v2054_v5 = vor.u32 %v2052_v53, %v2050_v41  ;;  %v3858_v41 = vld [vmem:[%s3995_s25 + $0x30] sm:$0xff] }
 0x124   : > { %v2311_v37 = vrot.slane %v3857_v31, 1 }
 0x126   : > { %v800_v11 = vpop.f32.mrf.mxu2 }
 0x127   : > { %v847_v50 = vadd.f32 %v800_v11, %v625_v34  ;;  %v1054_v25 = vpop.f32.mrf.mxu3  ;;  %v2058_v34 = vrot.slane %v2056_v14, 1 }
 0x128   : > { %v627_v58 = vpop.f32.mrf.mxu1 }
 0x129   : > { %v1101_v49 = vadd.f32 %v1054_v25, %v847_v50  ;;  %v628_v4 = vadd.f32 %v627_v58, %v4375_v18  ;;  %v3837_v25 = vld [vmem:[%s3995_s25 + $0x20] sm:$0xff]  ;;  %v1501_v58 = vsel %vm683_vm1, %v1498_v27, %v1500_v16 }
 0x12a   : > { %v1415_v54 = vpop.f32.mrf.mxu0 }
 0x12b   : > { %1593 = vmatmul.bf16.gmra.mxu1 %v1499_v52  ;;  %1847 = vmatmul.bf16.gmra.mxu2 %v3836_v60  ;;  %v4509_v36 = vadd.f32 %v1412_v7, %v1101_v49  ;;  %v2059_v49 = vsel %vm303_vm0, %v2054_v5, %v2058_v34 }
 0x12c   : > { %2205 = vmatmul.bf16.gmra.mxu3 %v2051_v62 }
 0x12d   : > { %2404 = vmatmul.bf16.gmra.mxu0 %v2310_v55 }
 0x12e   : > { %v803_v19 = vpop.f32.mrf.mxu2 }
 0x12f   : > { %v848_v45 = vadd.f32 %v803_v19, %v628_v4  ;;  %v1057_v12 = vpop.f32.mrf.mxu3 }
 0x130   : > { %v629_v33 = vpop.f32.mrf.mxu1 }
 0x131   : > { %v1102_v21 = vadd.f32 %v1057_v12, %v848_v45  ;;  %v630_v7 = vadd.f32 %v629_v33, %v4396_v10  ;;  %v2060_v12 = vshrl.u32 %v3857_v31, 16  ;;  %v2064_v33 = vshll.u32 %v3858_v41, 16 }
 0x132   : > { %v1417_v15 = vpop.f32.mrf.mxu0 }
 0x133   : > { %v4513_v40 = vadd.f32 %v1415_v54, %v1102_v21  ;;  %v2312_v54 = vsel %vm683_vm1, %v2309_v59, %v2311_v37  ;;  %v1502_v59 = vrot.slane %v4271_v0, 1  ;;  %v2062_v53 = vor.u32 %v2060_v12, %v2058_v34  ;;  %v3859_v34 = vld [vmem:[%s3995_s25 + $0x38] sm:$0xff] }
 0x134   : > { %v2066_v14 = vrot.slane %v2064_v33, 1  ;;  %v2315_v33 = vrot.slane %v3859_v34, 1 }
 0x136   : > { %v805_v18 = vpop.f32.mrf.mxu2 }
 0x137   : > { %v849_v11 = vadd.f32 %v805_v18, %v630_v7  ;;  %v1059_v50 = vpop.f32.mrf.mxu3  ;;  %v2313_v7 = vrot.slane %v3858_v41, 1 }
 0x138   : > { %v632_v60 = vpop.f32.mrf.mxu1 }
 0x139   : > { %v1103_v52 = vadd.f32 %v1059_v50, %v849_v11  ;;  %v633_v10 = vadd.f32 %v632_v60, %v4322_v8  ;;  %v3838_v11 = vld [vmem:[%s3995_s25 + $0x28] sm:$0xff] }
 0x13a   : > { %v1420_v6 = vpop.f32.mrf.mxu0 }
 0x13b   : > { %1598 = vmatmul.bf16.gmra.mxu1 %v1501_v58  ;;  %1852 = vmatmul.bf16.gmra.mxu2 %v3837_v25  ;;  %v4521_v48 = vadd.f32 %v1417_v15, %v1103_v52  ;;  %v1503_v25 = vsel %vm683_vm1, %v1500_v16, %v1502_v59  ;;  %v2067_v58 = vsel %vm303_vm0, %v2062_v53, %v2066_v14 }
 0x13c   : > { %2210 = vmatmul.bf16.gmra.mxu3 %v2059_v49  ;;  %v2314_v52 = vsel %vm683_vm1, %v2311_v37, %v2313_v7  ;;  %v1504_v37 = vrot.slane %v4284_v24, 1 }
 0x13d   : > { %2409 = vmatmul.bf16.gmra.mxu0 %v2312_v54 }
 0x13e   : > { %v808_v62 = vpop.f32.mrf.mxu2 }
 0x13f   : > { %v850_v55 = vadd.f32 %v808_v62, %v633_v10  ;;  %v1062_v4 = vpop.f32.mrf.mxu3 }
 0x140   : > { %v634_v27 = vpop.f32.mrf.mxu1 }
 0x141   : > { %v1104_v19 = vadd.f32 %v1062_v4, %v850_v55  ;;  %v635_v15 = vadd.f32 %v634_v27, %v4339_v56  ;;  %v2068_v55 = vshrl.u32 %v3858_v41, 16  ;;  %v2072_v4 = vshll.u32 %v3859_v34, 16 }
 0x142   : > { %v1422_v45 = vpop.f32.mrf.mxu0 }
 0x143   : > { %v4525_v21 = vadd.f32 %v1420_v6, %v1104_v19  ;;  %v2074_v12 = vrot.slane %v2072_v4, 1 }
 0x146   : > { %v810_v8 = vpop.f32.mrf.mxu2 }
 0x147   : > { %v851_v5 = vadd.f32 %v810_v8, %v635_v15  ;;  %v1064_v18 = vpop.f32.mrf.mxu3  ;;  %v3839_v8 = vld [vmem:[%s3995_s25 + $0x30] sm:$0xff] }
 0x148   : > { %v637_v50 = vpop.f32.mrf.mxu1 }
 0x149   : > { %v1105_v60 = vadd.f32 %v1064_v18, %v851_v5  ;;  %v638_v56 = vadd.f32 %v637_v50, %v4360_v2  ;;  %v1505_v18 = vsel %vm683_vm1, %v1502_v59, %v1504_v37 }
 0x14a   : > { %v1425_v31 = vpop.f32.mrf.mxu0 }
 0x14b   : > { %1603 = vmatmul.bf16.gmra.mxu1 %v1503_v25  ;;  %1857 = vmatmul.bf16.gmra.mxu2 %v3838_v11  ;;  %v4533_v0 = vadd.f32 %v1422_v45, %v1105_v60  ;;  %v2070_v45 = vor.u32 %v2068_v55, %v2066_v14  ;;  %v2316_v25 = vsel %vm683_vm1, %v2313_v7, %v2315_v33  ;;  %v3860_v14 = vld [vmem:[%s3995_s25 + $0x40] sm:$0xff]  ;;  %v1506_v7 = vrot.slane %v4300_v28, 1 }
 0x14c   : > { %2215 = vmatmul.bf16.gmra.mxu3 %v2067_v58  ;;  %v2317_v55 = vrot.slane %v3860_v14, 1 }
 0x14d   : > { %2414 = vmatmul.bf16.gmra.mxu0 %v2314_v52  ;;  %v2075_v50 = vsel %vm303_vm0, %v2070_v45, %v2074_v12  ;;  %v3840_v45 = vld [vmem:[%s3995_s25 + $0x38] sm:$0xff] }
 0x14e   : > { %v813_v6 = vpop.f32.mrf.mxu2 }
 0x14f   : > { %v852_v49 = vadd.f32 %v813_v6, %v638_v56  ;;  %v1067_v54 = vpop.f32.mrf.mxu3  ;;  %v2076_v6 = vshrl.u32 %v3859_v34, 16 }
 0x150   : > { %v639_v16 = vpop.f32.mrf.mxu1 }
 0x151   : > { %v1106_v10 = vadd.f32 %v1067_v54, %v852_v49  ;;  %v640_v19 = vadd.f32 %v639_v16, %v4371_v23  ;;  %v2080_v49 = vshll.u32 %v3860_v14, 16 }
 0x152   : > { %v1427_v62 = vpop.f32.mrf.mxu0 }
 0x153   : > { %v4537_v27 = vadd.f32 %v1425_v31, %v1106_v10  ;;  %v2078_v10 = vor.u32 %v2076_v6, %v2074_v12  ;;  %v3861_v12 = vld [vmem:[%s3995_s25 + $0x48] sm:$0xff] }
 0x156   : > { %v815_v2 = vpop.f32.mrf.mxu2 }
 0x157   : > { %v853_v15 = vadd.f32 %v815_v2, %v640_v19  ;;  %v1069_v53 = vpop.f32.mrf.mxu3 }
 0x158   : > { %v642_v5 = vpop.f32.mrf.mxu1 }
 0x159   : > { %v1107_v11 = vadd.f32 %v1069_v53, %v853_v15  ;;  %v643_v23 = vadd.f32 %v642_v5, %v4392_v29  ;;  %v1507_v15 = vsel %vm683_vm1, %v1504_v37, %v1506_v7  ;;  %v2318_v5 = vsel %vm683_vm1, %v2315_v33, %v2317_v55 }
 0x15a   : > { %v1430_v41 = vpop.f32.mrf.mxu0  ;;  %v1508_v33 = vrot.slane %v4320_v42, 1 }
 0x15b   : > { %1608 = vmatmul.bf16.gmra.mxu1 %v1505_v18  ;;  %1862 = vmatmul.bf16.gmra.mxu2 %v3839_v8  ;;  %v4545_v24 = vadd.f32 %v1427_v62, %v1107_v11  ;;  %v2082_v62 = vrot.slane %v2080_v49, 1 }
 0x15c   : > { %2220 = vmatmul.bf16.gmra.mxu3 %v2075_v50 }
 0x15d   : > { %2419 = vmatmul.bf16.gmra.mxu0 %v2316_v25  ;;  %v2083_v8 = vsel %vm303_vm0, %v2078_v10, %v2082_v62 }
 0x15e   : > { %v818_v60 = vpop.f32.mrf.mxu2 }
 0x15f   : > { %v854_v31 = vadd.f32 %v818_v60, %v643_v23  ;;  %v1072_v58 = vpop.f32.mrf.mxu3  ;;  %v2084_v23 = vshrl.u32 %v3860_v14, 16  ;;  %v2088_v60 = vshll.u32 %v3861_v12, 16 }
 0x160   : > { %v644_v59 = vpop.f32.mrf.mxu1 }
 0x161   : > { %v1108_v52 = vadd.f32 %v1072_v58, %v854_v31  ;;  %v645_v16 = vadd.f32 %v644_v59, %v4409_v47  ;;  %v2086_v59 = vor.u32 %v2084_v23, %v2082_v62  ;;  %v3862_v62 = vld [vmem:[%s3995_s25 + $0x50] sm:$0xff] }
 0x162   : > { %v1432_v56 = vpop.f32.mrf.mxu0 }
 0x163   : > { %v4549_v54 = vadd.f32 %v1430_v41, %v1108_v52  ;;  %v2090_v52 = vrot.slane %v2088_v60, 1  ;;  %v3842_v60 = vld [vmem:[%s3995_s25 + $0x48] sm:$0xff] }
 0x166   : > { %v820_v29 = vpop.f32.mrf.mxu2 }
 0x167   : > { %v855_v4 = vadd.f32 %v820_v29, %v645_v16  ;;  %v1074_v19 = vpop.f32.mrf.mxu3  ;;  %v3841_v16 = vld [vmem:[%s3995_s25 + $0x40] sm:$0xff]  ;;  %v1509_v29 = vsel %vm683_vm1, %v1506_v7, %v1508_v33 }
 0x168   : > { %v647_v2 = vpop.f32.mrf.mxu1 }
 0x169   : > { %v1109_v53 = vadd.f32 %v1074_v19, %v855_v4  ;;  %v648_v47 = vadd.f32 %v647_v2, %v4324_v43  ;;  %v2091_v19 = vsel %vm303_vm0, %v2086_v59, %v2090_v52 }
 0x16a   : > { %v1435_v34 = vpop.f32.mrf.mxu0 }
 0x16b   : > { %1613 = vmatmul.bf16.gmra.mxu1 %v1507_v15  ;;  %1867 = vmatmul.bf16.gmra.mxu2 %v3840_v45  ;;  %v4557_v28 = vadd.f32 %v1432_v56, %v1109_v53  ;;  %v2319_v56 = vrot.slane %v3861_v12, 1 }
 0x16c   : > { %2225 = vmatmul.bf16.gmra.mxu3 %v2083_v8 }
 0x16d   : > { %2424 = vmatmul.bf16.gmra.mxu0 %v2318_v5  ;;  %v2320_v45 = vsel %vm683_vm1, %v2317_v55, %v2319_v56  ;;  %v2092_v5 = vshrl.u32 %v3861_v12, 16  ;;  %v1510_v55 = vrot.slane %v4358_v1, 1 }
 0x16e   : > { %v823_v18 = vpop.f32.mrf.mxu2 }
 0x16f   : > { %v856_v11 = vadd.f32 %v823_v18, %v648_v47  ;;  %v1077_v41 = vpop.f32.mrf.mxu3  ;;  %v2096_v47 = vshll.u32 %v3862_v62, 16  ;;  %v1511_v59 = vsel %vm683_vm1, %v1508_v33, %v1510_v55 }
 0x170   : > { %v649_v37 = vpop.f32.mrf.mxu1 }
 0x171   : > { %v1110_v50 = vadd.f32 %v1077_v41, %v856_v11  ;;  %v650_v58 = vadd.f32 %v649_v37, %v4341_v57  ;;  %v2094_v41 = vor.u32 %v2092_v5, %v2090_v52  ;;  %v2098_v37 = vrot.slane %v2096_v47, 1  ;;  %v4585_v52 = vld [vmem:[%s3995_s25 + $0x58] sm:$0xff]  ;;  %v3843_v5 = vld [vmem:[%s3995_s25 + $0x50] sm:$0xff] }
 0x172   : > { %v1437_v25 = vpop.f32.mrf.mxu0  ;;  %v2508_v47 = vlaneseq }
 0x173   : > { %v4561_v31 = vadd.f32 %v1435_v34, %v1110_v50  ;;  %v2321_v50 = vrot.slane %v3862_v62, 1 }
 0x176   : > { %v825_v43 = vpop.f32.mrf.mxu2 }
 0x177   : > { %v857_v6 = vadd.f32 %v825_v43, %v650_v58  ;;  %v1079_v49 = vpop.f32.mrf.mxu3 }
 0x178   : > { %v652_v10 = vpop.f32.mrf.mxu1 }
 0x179   : > { %v1111_v4 = vadd.f32 %v1079_v49, %v857_v6  ;;  %v653_v57 = vadd.f32 %v652_v10, %v4362_v3  ;;  %v2099_v6 = vsel %vm303_vm0, %v2094_v41, %v2098_v37  ;;  %v2322_v49 = vsel %vm683_vm1, %v2319_v56, %v2321_v50 }
 0x17a   : > { %v1440_v14 = vpop.f32.mrf.mxu0  ;;  %v2104_v56 = vshll.u32 %v4585_v52, 16 }
 0x17b   : > { %1618 = vmatmul.bf16.gmra.mxu1 %v1509_v29  ;;  %1872 = vmatmul.bf16.gmra.mxu2 %v3841_v16  ;;  %v4569_v42 = vadd.f32 %v1437_v25, %v1111_v4 }
 0x17c   : > { %2230 = vmatmul.bf16.gmra.mxu3 %v2091_v19  ;;  %v2100_v19 = vshrl.u32 %v3862_v62, 16 }
 0x17d   : > { %2429 = vmatmul.bf16.gmra.mxu0 %v2320_v45 }
 0x17e   : > { %v828_v2 = vpop.f32.mrf.mxu2 }
 0x17f   : > { %v858_v15 = vadd.f32 %v828_v2, %v653_v57  ;;  %v1082_v53 = vpop.f32.mrf.mxu3  ;;  %v1512_v57 = vrot.slane %v4390_v9, 1 }
 0x180   : > { %v654_v7 = vpop.f32.mrf.mxu1 }
 0x181   : > { %v1112_v34 = vadd.f32 %v1082_v53, %v858_v15  ;;  %v655_v11 = vadd.f32 %v654_v7, %v4373_v17  ;;  %v2102_v15 = vor.u32 %v2100_v19, %v2098_v37  ;;  %v2323_v53 = vrot.slane %v4585_v52, 1 }
 0x182   : > { %v1442_v8 = vpop.f32.mrf.mxu0  ;;  %v4597_v37 = vshrl.u32 %v2508_v47, 7 }
 0x183   : > { %v4573_v18 = vadd.f32 %v1440_v14, %v1112_v34 }
 0x186   : > { %v830_v3 = vpop.f32.mrf.mxu2 }
 0x187   : > { %v859_v25 = vadd.f32 %v830_v3, %v655_v11  ;;  %v1084_v23 = vpop.f32.mrf.mxu3  ;;  %v1513_v11 = vsel %vm683_vm1, %v1510_v55, %v1512_v57 }
 0x188   : > { %v657_v58 = vpop.f32.mrf.mxu1 }
 0x189   : > { %v1113_v43 = vadd.f32 %v1084_v23, %v859_v25  ;;  %v658_v17 = vadd.f32 %v657_v58, %v4394_v30  ;;  %v2106_v30 = vrot.slane %v2104_v56, 1 }
 0x18a   : > { %v1445_v12 = vpop.f32.mrf.mxu0 }
 0x18b   : > { %1623 = vmatmul.bf16.gmra.mxu1 %v1511_v59  ;;  %1877 = vmatmul.bf16.gmra.mxu2 %v3842_v60  ;;  %v4581_v1 = vadd.f32 %v1442_v8, %v1113_v43  ;;  %v2107_v9 = vsel %vm303_vm0, %v2102_v15, %v2106_v30  ;;  %v4603_v60 = vld [vmem:[%s3995_s25 + $0x60] sm:$0xff]  ;;  %v2510_v43 = vadd.s32 8, %v4597_v37 }
 0x18c   : > { %2235 = vmatmul.bf16.gmra.mxu3 %v2099_v6 }
 0x18d   : > { %2434 = vmatmul.bf16.gmra.mxu0 %v2322_v49  ;;  %v2108_v49 = vshrl.u32 %v4585_v52, 16 }
 0x18e   : > { %v833_v16 = vpop.f32.mrf.mxu2 }
 0x18f   : > { %v860_v10 = vadd.f32 %v833_v16, %v658_v17  ;;  %v1087_v33 = vpop.f32.mrf.mxu3  ;;  %v2112_v17 = vshll.u32 %v4603_v60, 16  ;;  %v2544_v16 = vand.u32 15, %v2510_v43 }
 0x190   : > { %v659_v29 = vpop.f32.mrf.mxu1 }
 0x191   : > { %v1114_v4 = vadd.f32 %v1087_v33, %v860_v10  ;;  %v660_v2 = vadd.f32 %v659_v29, %v4411_v51  ;;  %v2324_v51 = vsel %vm683_vm1, %v2321_v50, %v2323_v53  ;;  %v1514_v10 = vrot.slane %v4419_v61, 1 }
 0x192   : > { %v1447_v14 = vpop.f32.mrf.mxu0  ;;  %v2110_v29 = vor.u32 %v2108_v49, %v2106_v30  ;;  %vm2822_vm2 = vcmp.lt.s32.totalorder %v2544_v16, 12  ;;  %v3948_v30 = vmov 0.0  }
 0x193   : > { %v4588_v45 = vadd.f32 %v1445_v12, %v1114_v4  ;;  %v2114_v4 = vrot.slane %v2112_v17, 1  ;;  %v1516_v17 = vrot.slane %v4447_v63, 1 }
 0x195   : > { %v2115_v61 = vsel %vm303_vm0, %v2110_v29, %v2114_v4  ;;  %v1517_v63 = vsel %vm683_vm1, %v1514_v10, %v1516_v17 }
 0x196   : > { %v835_v7 = vpop.f32.mrf.mxu2 }
 0x197   : > { %v861_v34 = vadd.f32 %v835_v7, %v660_v2  ;;  %v1089_v8 = vpop.f32.mrf.mxu3  ;;  %v3844_v2 = vld [vmem:[%s3995_s25 + $0x58] sm:$0xff]  ;;  %v1515_v7 = vsel %vm683_vm1, %v1512_v57, %v1514_v10 }
 0x198   : > { %v1589_v62 = vpop.f32.mrf.mxu1 }
 0x199   : > { %v1115_v41 = vadd.f32 %v1089_v8, %v861_v34  ;;  %v1649_v23 = vadd.f32 %v1589_v62, %v4430_v22  ;;  %v4624_v62 = vld [vmem:[%s3995_s25 + $0x68] sm:$0xff] }
 0x19a   : > { %v2400_v3 = vpop.f32.mrf.mxu0  ;;  %v2120_v43 = vshll.u32 %v4624_v62, 16 }
 0x19b   : > { %1628 = vmatmul.bf16.gmra.mxu1 %v1513_v11  ;;  %1882 = vmatmul.bf16.gmra.mxu2 %v3843_v5  ;;  %v4599_v25 = vadd.f32 %v1447_v14, %v1115_v41  ;;  %v2325_v14 = vrot.slane %v4603_v60, 1  ;;  %v3739_v5 = vsel %vm2822_vm2, 1.0, %v3948_v30 }
 0x19c   : > { %2240 = vmatmul.bf16.gmra.mxu3 %v2107_v9 }
 0x19d   : > { %2439 = vmatmul.bf16.gmra.mxu0 %v2324_v51 }
 0x19e   : > { %v1843_v58 = vpop.f32.mrf.mxu2 }
 0x19f   : > { %v1903_v55 = vadd.f32 %v1843_v58, %v1649_v23  ;;  %v2201_v59 = vpop.f32.mrf.mxu3 }
 0x1a0   : > { %v1591_v12 = vpop.f32.mrf.mxu1 }
 0x1a1   : > { %v2261_v50 = vadd.f32 %v2201_v59, %v1903_v55  ;;  %v1650_v33 = vadd.f32 %v1591_v12, %v4441_v46  ;;  %v2326_v46 = vsel %vm683_vm1, %v2323_v53, %v2325_v14  ;;  %v2116_v59 = vshrl.u32 %v4603_v60, 16  ;;  %v1951_v60 = vld [vmem:[%s3995_s25 + $0x70] sm:$0x1] }
 0x1a2   : > { %v2402_v6 = vpop.f32.mrf.mxu0 }
 0x1a3   : > { %v2460_v22 = vadd.f32 %v2400_v3, %v2261_v50  ;;  %v2512_v3 = vadd.s32 24, %v4597_v37  ;;  %v2118_v16 = vor.u32 %v2116_v59, %v2114_v4  ;;  %v2018_v4 = vunpack.c.l.b16 %v1951_v60 }
 0x1a5   : > { %2484 = vst [vmem:[%s4612_s20] sm:$0xff] %v2460_v22  ;;  %v2947_v9 = vmul.f32 %v2460_v22, %v2460_v22 }
 0x1a6   : > { %v1845_v52 = vpop.f32.mrf.mxu2 }
 0x1a7   : > { %v1904_v19 = vadd.f32 %v1845_v52, %v1650_v33  ;;  %v2203_v56 = vpop.f32.mrf.mxu3  ;;  %v2122_v33 = vrot.slane %v2120_v43, 1 }
 0x1a8   : > { %v1594_v15 = vpop.f32.mrf.mxu1 }
 0x1a9   : > { %v2262_v34 = vadd.f32 %v2203_v56, %v1904_v19  ;;  %v1651_v57 = vadd.f32 %v1594_v15, %v4452_v20  ;;  %v2558_v20 = vand.u32 15, %v2512_v3  ;;  %v2327_v19 = vrot.slane %v4624_v62, 1 }
 0x1aa   : > { %v2405_v8 = vpop.f32.mrf.mxu0 }
 0x1ab   : > { %v2461_v47 = vadd.f32 %v2402_v6, %v2262_v34  ;;  %1633 = vmatmul.bf16.gmra.mxu1 %v1515_v7  ;;  %1887 = vmatmul.bf16.gmra.mxu2 %v3844_v2  ;;  %vm2824_vm3 = vcmp.lt.s32.totalorder %v2558_v20, 12  ;;  %v3845_v34 = vld [vmem:[%s3995_s25 + $0x60] sm:$0xff] }
 0x1ac   : > { %2245 = vmatmul.bf16.gmra.mxu3 %v2115_v61 }
 0x1ad   : > { %2444 = vmatmul.bf16.gmra.mxu0 %v2326_v46  ;;  %2485 = vst [vmem:[%s4612_s20 + $0x8] sm:$0xff] %v2461_v47  ;;  %v2894_v11 = vmul.f32 %v3739_v5, %v2461_v47  ;;  %v2123_v5 = vsel %vm303_vm0, %v2118_v16, %v2122_v33 }
 0x1ae   : > { %v1848_v41 = vpop.f32.mrf.mxu2 }
 0x1af   : > { %v2948_v53 = vmul.f32 %v2894_v11, %v2461_v47  ;;  %v1905_v51 = vadd.f32 %v1848_v41, %v1651_v57  ;;  %v2206_v23 = vpop.f32.mrf.mxu3  ;;  %v2917_v58 = vadd.f32 %v2894_v11, %v2460_v22  ;;  %v3740_v47 = vsel %vm2824_vm3, 1.0, %v3948_v30 }
 0x1b0   : > { %v1596_v55 = vpop.f32.mrf.mxu1  ;;  %v2031_v57 = vpack.c.b16 %v2018_v4, %v2018_v4 }
 0x1b1   : > { %v2971_v12 = vadd.f32 %v2948_v53, %v2947_v9  ;;  %v2263_v50 = vadd.f32 %v2206_v23, %v1905_v51  ;;  %v1652_v22 = vadd.f32 %v1596_v55, %v4461_v26  ;;  %v2328_v26 = vsel %vm683_vm1, %v2325_v14, %v2327_v19 }
 0x1b2   : > { %v2407_v6 = vpop.f32.mrf.mxu0  ;;  %v2514_v14 = vadd.s32 40, %v4597_v37  ;;  %v2124_v55 = vshrl.u32 %v4624_v62, 16  ;;  %v2128_v59 = vshll.u32 %v2031_v57, 16  ;;  %v2329_v60 = vrot.slane %v2031_v57, 1 }
 0x1b3   : > { %v2462_v49 = vadd.f32 %v2405_v8, %v2263_v50 }
 0x1b4   : > { %v2126_v20 = vor.u32 %v2124_v55, %v2122_v33  ;;  %v2130_v16 = vrot.slane %v2128_v59, 1  ;;  %v2330_v4 = vsel %vm683_vm1, %v2327_v19, %v2329_v60 }
 0x1b5   : > { %2486 = vst [vmem:[%s4612_s20 + $0x10] sm:$0xff] %v2462_v49  ;;  %v2918_v29 = vadd.f32 %v2917_v58, %v2462_v49  ;;  %v2949_v52 = vmul.f32 %v2462_v49, %v2462_v49  ;;  %v2572_v49 = vand.u32 15, %v2514_v14 }
 0x1b6   : > { %v1850_v56 = vpop.f32.mrf.mxu2  ;;  %v2131_v33 = vsel %vm303_vm0, %v2126_v20, %v2130_v16 }
 0x1b7   : > { %v2972_v2 = vadd.f32 %v2971_v12, %v2949_v52  ;;  %v1906_v15 = vadd.f32 %v1850_v56, %v1652_v22  ;;  %v2208_v7 = vpop.f32.mrf.mxu3  ;;  %vm2826_vm4 = vcmp.lt.s32.totalorder %v2572_v49, 12 }
 0x1b8   : > { %v1599_v8 = vpop.f32.mrf.mxu1 }
 0x1b9   : > { %v2264_v61 = vadd.f32 %v2208_v7, %v1906_v15  ;;  %v1653_v3 = vadd.f32 %v1599_v8, %v4468_v13  ;;  %v1518_v13 = vrot.slane %v4463_v38, 1  ;;  %v3846_v7 = vld [vmem:[%s3995_s25 + $0x68] sm:$0xff]  ;;  %s3094_s25 = sshll.u32 %s4720_s13, 1 }
 0x1ba   : > { %v2410_v46 = vpop.f32.mrf.mxu0  ;;  %s181_s23 = scalar_lea.vmem %s4718_s3, %s3094_s25 }
 0x1bb   : > { %v2463_v11 = vadd.f32 %v2407_v6, %v2264_v61  ;;  %1638 = vmatmul.bf16.gmra.mxu1 %v1517_v63  ;;  %1892 = vmatmul.bf16.gmra.mxu2 %v3845_v34  ;;  %v1519_v8 = vsel %vm683_vm1, %v1516_v17, %v1518_v13  ;;  %v3741_v61 = vsel %vm2826_vm4, 1.0, %v3948_v30 }
 0x1bc   : > { %2250 = vmatmul.bf16.gmra.mxu3 %v2123_v5 }
 0x1bd   : > { %2449 = vmatmul.bf16.gmra.mxu0 %v2328_v26  ;;  %2487 = vst [vmem:[%s4612_s20 + $0x18] sm:$0xff] %v2463_v11  ;;  %v2896_v41 = vmul.f32 %v3740_v47, %v2463_v11 }
 0x1be   : > { %v1853_v10 = vpop.f32.mrf.mxu2 }
 0x1bf   : > { %v2950_v9 = vmul.f32 %v2896_v41, %v2463_v11  ;;  %v1907_v53 = vadd.f32 %v1853_v10, %v1653_v3  ;;  %v2211_v51 = vpop.f32.mrf.mxu3  ;;  %v2919_v23 = vadd.f32 %v2918_v29, %v2896_v41  ;;  %v2516_v41 = vadd.s32 56, %v4597_v37 }
 0x1c0   : > { %v1601_v58 = vpop.f32.mrf.mxu1 }
 0x1c1   : > { %v2973_v43 = vadd.f32 %v2972_v2, %v2950_v9  ;;  %v2265_v12 = vadd.f32 %v2211_v51, %v1907_v53  ;;  %v1654_v29 = vadd.f32 %v1601_v58, %v4476_v39  ;;  %v2586_v51 = vand.u32 15, %v2516_v41 }
 0x1c2   : > { %v2412_v50 = vpop.f32.mrf.mxu0 }
 0x1c3   : > { %v2464_v6 = vadd.f32 %v2410_v46, %v2265_v12  ;;  %vm2828_vm5 = vcmp.lt.s32.totalorder %v2586_v51, 12 }
 0x1c4   : > { %v3742_v49 = vsel %vm2828_vm5, 1.0, %v3948_v30 }
 0x1c5   : > { %2488 = vst [vmem:[%s4612_s20 + $0x20] sm:$0xff] %v2464_v6  ;;  %v2920_v52 = vadd.f32 %v2919_v23, %v2464_v6  ;;  %v2951_v22 = vmul.f32 %v2464_v6, %v2464_v6 }
 0x1c6   : > { %v1855_v56 = vpop.f32.mrf.mxu2 }
 0x1c7   : > { %v2974_v15 = vadd.f32 %v2973_v43, %v2951_v22  ;;  %v1908_v62 = vadd.f32 %v1855_v56, %v1654_v29  ;;  %v2213_v2 = vpop.f32.mrf.mxu3  ;;  %v2518_v56 = vadd.s32 72, %v4597_v37 }
 0x1c8   : > { %v1604_v34 = vpop.f32.mrf.mxu1 }
 0x1c9   : > { %v2266_v63 = vadd.f32 %v2213_v2, %v1908_v62  ;;  %v1655_v5 = vadd.f32 %v1604_v34, %v4487_v35 }
 0x1ca   : > { %v2415_v38 = vpop.f32.mrf.mxu0 }
 0x1cb   : > { %v2465_v39 = vadd.f32 %v2412_v50, %v2266_v63  ;;  %1643 = vmatmul.bf16.gmra.mxu1 %v1519_v8  ;;  %1897 = vmatmul.bf16.gmra.mxu2 %v3846_v7  ;;  %v2600_v8 = vand.u32 15, %v2518_v56 }
 0x1cc   : > { %2255 = vmatmul.bf16.gmra.mxu3 %v2131_v33 }
 0x1cd   : > { %2454 = vmatmul.bf16.gmra.mxu0 %v2330_v4  ;;  %2489 = vst [vmem:[%s4612_s20 + $0x28] sm:$0xff] %v2465_v39  ;;  %v2898_v46 = vmul.f32 %v3741_v61, %v2465_v39  ;;  %vm2830_vm6 = vcmp.lt.s32.totalorder %v2600_v8, 12 }
 0x1ce   : > { %v1858_v26 = vpop.f32.mrf.mxu2 }
 0x1cf   : > { %v2952_v17 = vmul.f32 %v2898_v46, %v2465_v39  ;;  %v1909_v47 = vadd.f32 %v1858_v26, %v1655_v5  ;;  %v2216_v11 = vpop.f32.mrf.mxu3  ;;  %v2921_v57 = vadd.f32 %v2920_v52, %v2898_v46 }
 0x1d0   : > { %v1606_v19 = vpop.f32.mrf.mxu1 }
 0x1d1   : > { %v2975_v3 = vadd.f32 %v2974_v15, %v2952_v17  ;;  %v2267_v10 = vadd.f32 %v2216_v11, %v1909_v47  ;;  %v1656_v58 = vadd.f32 %v1606_v19, %v4496_v44  ;;  %v3743_v17 = vsel %vm2830_vm6, 1.0, %v3948_v30 }
 0x1d2   : > { %v2417_v9 = vpop.f32.mrf.mxu0 }
 0x1d3   : > { %v2466_v53 = vadd.f32 %v2415_v38, %v2267_v10 }
 0x1d5   : > { %2490 = vst [vmem:[%s4612_s20 + $0x30] sm:$0xff] %v2466_v53  ;;  %v2922_v23 = vadd.f32 %v2921_v57, %v2466_v53  ;;  %v2953_v14 = vmul.f32 %v2466_v53, %v2466_v53 }
 0x1d6   : > { %v1860_v35 = vpop.f32.mrf.mxu2 }
 0x1d7   : > { %v2976_v55 = vadd.f32 %v2975_v3, %v2953_v14  ;;  %v1910_v59 = vadd.f32 %v1860_v35, %v1656_v58  ;;  %v2218_v43 = vpop.f32.mrf.mxu3 }
 0x1d8   : > { %v1609_v12 = vpop.f32.mrf.mxu1 }
 0x1d9   : > { %v2268_v50 = vadd.f32 %v2218_v43, %v1910_v59  ;;  %v1657_v16 = vadd.f32 %v1609_v12, %v4501_v32 }
 0x1da   : > { %v2420_v6 = vpop.f32.mrf.mxu0 }
 0x1db   : > { %v2467_v13 = vadd.f32 %v2417_v9, %v2268_v50  ;;  %v2520_v9 = vadd.s32 88, %v4597_v37 }
 0x1dd   : > { %2491 = vst [vmem:[%s4612_s20 + $0x38] sm:$0xff] %v2467_v13  ;;  %v2900_v20 = vmul.f32 %v3742_v49, %v2467_v13  ;;  %v2614_v35 = vand.u32 15, %v2520_v9  ;;  %v2524_v9 = vadd.s32 120, %v4597_v37 }
 0x1de   : > { %v1863_v52 = vpop.f32.mrf.mxu2 }
 0x1df   : > { %v2954_v22 = vmul.f32 %v2900_v20, %v2467_v13  ;;  %v1911_v29 = vadd.f32 %v1863_v52, %v1657_v16  ;;  %v2221_v44 = vpop.f32.mrf.mxu3  ;;  %v2923_v60 = vadd.f32 %v2922_v23, %v2900_v20  ;;  %vm2832_vm7 = vcmp.lt.s32.totalorder %v2614_v35, 12 }
 0x1e0   : > { %v1611_v15 = vpop.f32.mrf.mxu1  ;;  %v3744_v16 = vsel %vm2832_vm7, 1.0, %v3948_v30  ;;  %v2642_v35 = vand.u32 15, %v2524_v9 }
 0x1e1   : > { %v2977_v62 = vadd.f32 %v2976_v55, %v2954_v22  ;;  %v2269_v2 = vadd.f32 %v2221_v44, %v1911_v29  ;;  %v1658_v33 = vadd.f32 %v1611_v15, %v4509_v36 }
 0x1e2   : > { %v2422_v7 = vpop.f32.mrf.mxu0  ;;  %vm2836_vm9 = vcmp.lt.s32.totalorder %v2642_v35, 12 }
 0x1e3   : > { %v2468_v34 = vadd.f32 %v2420_v6, %v2269_v2 }
 0x1e5   : > { %2492 = vst [vmem:[%s4612_s20 + $0x40] sm:$0xff] %v2468_v34  ;;  %v2924_v63 = vadd.f32 %v2923_v60, %v2468_v34  ;;  %v2955_v38 = vmul.f32 %v2468_v34, %v2468_v34 }
 0x1e6   : > { %v1865_v32 = vpop.f32.mrf.mxu2 }
 0x1e7   : > { %v2978_v4 = vadd.f32 %v2977_v62, %v2955_v38  ;;  %v1912_v61 = vadd.f32 %v1865_v32, %v1658_v33  ;;  %v2223_v39 = vpop.f32.mrf.mxu3  ;;  %v2522_v62 = vadd.s32 104, %v4597_v37 }
 0x1e8   : > { %v1614_v46 = vpop.f32.mrf.mxu1 }
 0x1e9   : > { %v2270_v5 = vadd.f32 %v2223_v39, %v1912_v61  ;;  %v1659_v57 = vadd.f32 %v1614_v46, %v4513_v40  ;;  %v2628_v38 = vand.u32 15, %v2522_v62 }
 0x1ea   : > { %v2425_v26 = vpop.f32.mrf.mxu0 }
 0x1eb   : > { %v2469_v47 = vadd.f32 %v2422_v7, %v2270_v5  ;;  %vm2834_vm8 = vcmp.lt.s32.totalorder %v2628_v38, 12 }
 0x1ed   : > { %2493 = vst [vmem:[%s4612_s20 + $0x48] sm:$0xff] %v2469_v47  ;;  %v2902_v11 = vmul.f32 %v3743_v17, %v2469_v47 }
 0x1ee   : > { %v1868_v41 = vpop.f32.mrf.mxu2 }
 0x1ef   : > { %v2956_v19 = vmul.f32 %v2902_v11, %v2469_v47  ;;  %v1913_v3 = vadd.f32 %v1868_v41, %v1659_v57  ;;  %v2226_v36 = vpop.f32.mrf.mxu3  ;;  %v2925_v10 = vadd.f32 %v2924_v63, %v2902_v11  ;;  %v3745_v47 = vsel %vm2834_vm8, 1.0, %v3948_v30 }
 0x1f0   : > { %v1616_v53 = vpop.f32.mrf.mxu1 }
 0x1f1   : > { %v2979_v51 = vadd.f32 %v2978_v4, %v2956_v19  ;;  %v2271_v23 = vadd.f32 %v2226_v36, %v1913_v3  ;;  %v1660_v43 = vadd.f32 %v1616_v53, %v4521_v48 }
 0x1f2   : > { %v2427_v14 = vpop.f32.mrf.mxu0 }
 0x1f3   : > { %v2470_v58 = vadd.f32 %v2425_v26, %v2271_v23 }
 0x1f5   : > { %2494 = vst [vmem:[%s4612_s20 + $0x50] sm:$0xff] %v2470_v58  ;;  %v2926_v55 = vadd.f32 %v2925_v10, %v2470_v58  ;;  %v2957_v59 = vmul.f32 %v2470_v58, %v2470_v58 }
 0x1f6   : > { %v1870_v40 = vpop.f32.mrf.mxu2 }
 0x1f7   : > { %v2980_v12 = vadd.f32 %v2979_v51, %v2957_v59  ;;  %v1914_v50 = vadd.f32 %v1870_v40, %v1660_v43  ;;  %v2228_v6 = vpop.f32.mrf.mxu3 }
 0x1f8   : > { %v1619_v49 = vpop.f32.mrf.mxu1 }
 0x1f9   : > { %v2272_v13 = vadd.f32 %v2228_v6, %v1914_v50  ;;  %v1661_v29 = vadd.f32 %v1619_v49, %v4525_v21 }
 0x1fa   : > { %v2430_v20 = vpop.f32.mrf.mxu0 }
 0x1fb   : > { %v2471_v52 = vadd.f32 %v2427_v14, %v2272_v13 }
 0x1fd   : > { %2495 = vst [vmem:[%s4612_s20 + $0x58] sm:$0xff] %v2471_v52  ;;  %v2904_v22 = vmul.f32 %v3744_v16, %v2471_v52 }
 0x1fe   : > { %v1873_v44 = vpop.f32.mrf.mxu2 }
 0x1ff   : > { %v2958_v60 = vmul.f32 %v2904_v22, %v2471_v52  ;;  %v1915_v56 = vadd.f32 %v1873_v44, %v1661_v29  ;;  %v2231_v48 = vpop.f32.mrf.mxu3  ;;  %v2927_v15 = vadd.f32 %v2926_v55, %v2904_v22 }
 0x200   : > { %v1621_v2 = vpop.f32.mrf.mxu1 }
 0x201   : > { %v2981_v7 = vadd.f32 %v2980_v12, %v2958_v60  ;;  %v2273_v34 = vadd.f32 %v2231_v48, %v1915_v56  ;;  %v1662_v4 = vadd.f32 %v1621_v2, %v4533_v0  ;;  %v2526_v48 = vadd.s32 136, %v4597_v37 }
 0x202   : > { %v2432_v8 = vpop.f32.mrf.mxu0 }
 0x203   : > { %v2472_v63 = vadd.f32 %v2430_v20, %v2273_v34  ;;  %v3746_v20 = vsel %vm2836_vm9, 1.0, %v3948_v30 }
 0x205   : > { %2496 = vst [vmem:[%s4612_s20 + $0x60] sm:$0xff] %v2472_v63  ;;  %v2928_v33 = vadd.f32 %v2927_v15, %v2472_v63  ;;  %v2959_v32 = vmul.f32 %v2472_v63, %v2472_v63 }
 0x206   : > { %v1875_v21 = vpop.f32.mrf.mxu2 }
 0x207   : > { %v2982_v61 = vadd.f32 %v2981_v7, %v2959_v32  ;;  %v1916_v39 = vadd.f32 %v1875_v21, %v1662_v4  ;;  %v2233_v46 = vpop.f32.mrf.mxu3 }
 0x208   : > { %v1624_v5 = vpop.f32.mrf.mxu1 }
 0x209   : > { %v2274_v26 = vadd.f32 %v2233_v46, %v1916_v39  ;;  %v1663_v41 = vadd.f32 %v1624_v5, %v4537_v27 }
 0x20a   : > { %v2435_v17 = vpop.f32.mrf.mxu0 }
 0x20b   : > { %v2473_v11 = vadd.f32 %v2432_v8, %v2274_v26  ;;  %v2656_v8 = vand.u32 15, %v2526_v48 }
 0x20d   : > { %2497 = vst [vmem:[%s4612_s20 + $0x68] sm:$0xff] %v2473_v11  ;;  %v2906_v57 = vmul.f32 %v3745_v47, %v2473_v11  ;;  %vm2838_vm10 = vcmp.lt.s32.totalorder %v2656_v8, 12 }
 0x20e   : > { %v1878_v19 = vpop.f32.mrf.mxu2  ;;  %v3747_v5 = vsel %vm2838_vm10, 1.0, %v3948_v30 }
 0x20f   : > { %v2960_v3 = vmul.f32 %v2906_v57, %v2473_v11  ;;  %v1917_v36 = vadd.f32 %v1878_v19, %v1663_v41  ;;  %v2236_v0 = vpop.f32.mrf.mxu3  ;;  %v2929_v10 = vadd.f32 %v2928_v33, %v2906_v57 }
 0x210   : > { %v1626_v53 = vpop.f32.mrf.mxu1 }
 0x211   : > { %v2983_v51 = vadd.f32 %v2982_v61, %v2960_v3  ;;  %v2275_v23 = vadd.f32 %v2236_v0, %v1917_v36  ;;  %v1664_v43 = vadd.f32 %v1626_v53, %v4545_v24  ;;  %v2528_v3 = vadd.s32 152, %v4597_v37 }
 0x212   : > { %v2437_v14 = vpop.f32.mrf.mxu0 }
 0x213   : > { %v2474_v58 = vadd.f32 %v2435_v17, %v2275_v23 }
 0x215   : > { %2498 = vst [vmem:[%s4612_s20 + $0x70] sm:$0xff] %v2474_v58  ;;  %v2930_v55 = vadd.f32 %v2929_v10, %v2474_v58  ;;  %v2961_v59 = vmul.f32 %v2474_v58, %v2474_v58 }
 0x216   : > { %v1880_v27 = vpop.f32.mrf.mxu2 }
 0x217   : > { %v2984_v40 = vadd.f32 %v2983_v51, %v2961_v59  ;;  %v1918_v12 = vadd.f32 %v1880_v27, %v1664_v43  ;;  %v2238_v50 = vpop.f32.mrf.mxu3  ;;  %v2670_v51 = vand.u32 15, %v2528_v3 }
 0x218   : > { %v1629_v6 = vpop.f32.mrf.mxu1 }
 0x219   : > { %v2276_v49 = vadd.f32 %v2238_v50, %v1918_v12  ;;  %v1665_v22 = vadd.f32 %v1629_v6, %v4549_v54  ;;  %vm2840_vm11 = vcmp.lt.s32.totalorder %v2670_v51, 12 }
 0x21a   : > { %v2440_v13 = vpop.f32.mrf.mxu0 }
 0x21b   : > { %v2475_v16 = vadd.f32 %v2437_v14, %v2276_v49 }
 0x21d   : > { %2499 = vst [vmem:[%s4612_s20 + $0x78] sm:$0xff] %v2475_v16  ;;  %v2908_v52 = vmul.f32 %v3746_v20, %v2475_v16 }
 0x21e   : > { %v1883_v29 = vpop.f32.mrf.mxu2 }
 0x21f   : > { %v2962_v44 = vmul.f32 %v2908_v52, %v2475_v16  ;;  %v1919_v60 = vadd.f32 %v1883_v29, %v1665_v22  ;;  %v2241_v24 = vpop.f32.mrf.mxu3  ;;  %v2931_v56 = vadd.f32 %v2930_v55, %v2908_v52  ;;  %v2530_v22 = vadd.s32 168, %v4597_v37 }
 0x220   : > { %v1631_v15 = vpop.f32.mrf.mxu1 }
 0x221   : > { %v2985_v62 = vadd.f32 %v2984_v40, %v2962_v44  ;;  %v2277_v2 = vadd.f32 %v2241_v24, %v1919_v60  ;;  %v1666_v33 = vadd.f32 %v1631_v15, %v4557_v28  ;;  %v3748_v40 = vsel %vm2840_vm11, 1.0, %v3948_v30 }
 0x222   : > { %v2442_v7 = vpop.f32.mrf.mxu0 }
 0x223   : > { %v2476_v34 = vadd.f32 %v2440_v13, %v2277_v2 }
 0x225   : > { %2500 = vst [vmem:[%s4612_s20 + $0x80] sm:$0xff] %v2476_v34  ;;  %v2932_v63 = vadd.f32 %v2931_v56, %v2476_v34  ;;  %v2963_v38 = vmul.f32 %v2476_v34, %v2476_v34  ;;  %v2684_v56 = vand.u32 15, %v2530_v22 }
 0x226   : > { %v1885_v54 = vpop.f32.mrf.mxu2 }
 0x227   : > { %v2986_v32 = vadd.f32 %v2985_v62, %v2963_v38  ;;  %v1920_v4 = vadd.f32 %v1885_v54, %v1666_v33  ;;  %v2243_v21 = vpop.f32.mrf.mxu3  ;;  %vm2842_vm12 = vcmp.lt.s32.totalorder %v2684_v56, 12 }
 0x228   : > { %v1634_v61 = vpop.f32.mrf.mxu1  ;;  %v3749_v33 = vsel %vm2842_vm12, 1.0, %v3948_v30 }
 0x229   : > { %v2278_v39 = vadd.f32 %v2243_v21, %v1920_v4  ;;  %v1667_v47 = vadd.f32 %v1634_v61, %v4561_v31 }
 0x22a   : > { %v2445_v46 = vpop.f32.mrf.mxu0 }
 0x22b   : > { %v2477_v26 = vadd.f32 %v2442_v7, %v2278_v39 }
 0x22d   : > { %2501 = vst [vmem:[%s4612_s20 + $0x88] sm:$0xff] %v2477_v26  ;;  %v2910_v17 = vmul.f32 %v3747_v5, %v2477_v26  ;;  %v2532_v5 = vadd.s32 184, %v4597_v37 }
 0x22e   : > { %v1888_v11 = vpop.f32.mrf.mxu2 }
 0x22f   : > { %v2964_v57 = vmul.f32 %v2910_v17, %v2477_v26  ;;  %v1921_v41 = vadd.f32 %v1888_v11, %v1667_v47  ;;  %v2246_v28 = vpop.f32.mrf.mxu3  ;;  %v2933_v19 = vadd.f32 %v2932_v63, %v2910_v17 }
 0x230   : > { %v1636_v36 = vpop.f32.mrf.mxu1 }
 0x231   : > { %v2987_v0 = vadd.f32 %v2986_v32, %v2964_v57  ;;  %v2279_v10 = vadd.f32 %v2246_v28, %v1921_v41  ;;  %v1668_v58 = vadd.f32 %v1636_v36, %v4569_v42  ;;  %v2698_v41 = vand.u32 15, %v2532_v5 }
 0x232   : > { %v2447_v9 = vpop.f32.mrf.mxu0 }
 0x233   : > { %v2478_v53 = vadd.f32 %v2445_v46, %v2279_v10  ;;  %vm2844_vm13 = vcmp.lt.s32.totalorder %v2698_v41, 12 }
 0x235   : > { %2502 = vst [vmem:[%s4612_s20 + $0x90] sm:$0xff] %v2478_v53  ;;  %v2934_v23 = vadd.f32 %v2933_v19, %v2478_v53  ;;  %v2965_v14 = vmul.f32 %v2478_v53, %v2478_v53  ;;  %v3750_v53 = vsel %vm2844_vm13, 1.0, %v3948_v30 }
 0x236   : > { %v1890_v31 = vpop.f32.mrf.mxu2 }
 0x237   : > { %v2988_v35 = vadd.f32 %v2987_v0, %v2965_v14  ;;  %v1922_v55 = vadd.f32 %v1890_v31, %v1668_v58  ;;  %v2248_v59 = vpop.f32.mrf.mxu3 }
 0x238   : > { %v1639_v43 = vpop.f32.mrf.mxu1 }
 0x239   : > { %v2280_v27 = vadd.f32 %v2248_v59, %v1922_v55  ;;  %v1669_v49 = vadd.f32 %v1639_v43, %v4573_v18 }
 0x23a   : > { %v2450_v50 = vpop.f32.mrf.mxu0 }
 0x23b   : > { %v2479_v12 = vadd.f32 %v2447_v9, %v2280_v27 }
 0x23d   : > { %2503 = vst [vmem:[%s4612_s20 + $0x98] sm:$0xff] %v2479_v12  ;;  %v2912_v6 = vmul.f32 %v3748_v40, %v2479_v12 }
 0x23e   : > { %v1893_v13 = vpop.f32.mrf.mxu2 }
 0x23f   : > { %v2966_v20 = vmul.f32 %v2912_v6, %v2479_v12  ;;  %v1923_v16 = vadd.f32 %v1893_v13, %v1669_v49  ;;  %v2251_v42 = vpop.f32.mrf.mxu3  ;;  %v2935_v52 = vadd.f32 %v2934_v23, %v2912_v6 }
 0x240   : > { %v1641_v29 = vpop.f32.mrf.mxu1 }
 0x241   : > { %v2989_v44 = vadd.f32 %v2988_v35, %v2966_v20  ;;  %v2281_v60 = vadd.f32 %v2251_v42, %v1923_v16  ;;  %v1670_v62 = vadd.f32 %v1641_v29, %v4581_v1 }
 0x242   : > { %v2452_v2 = vpop.f32.mrf.mxu0 }
 0x243   : > { %v2480_v24 = vadd.f32 %v2450_v50, %v2281_v60 }
 0x245   : > { %2504 = vst [vmem:[%s4612_s20 + $0xa0] sm:$0xff] %v2480_v24  ;;  %v2936_v48 = vadd.f32 %v2935_v52, %v2480_v24  ;;  %v2967_v15 = vmul.f32 %v2480_v24, %v2480_v24 }
 0x246   : > { %v1895_v18 = vpop.f32.mrf.mxu2 }
 0x247   : > { %v2990_v7 = vadd.f32 %v2989_v44, %v2967_v15  ;;  %v1924_v34 = vadd.f32 %v1895_v18, %v1670_v62  ;;  %v2253_v8 = vpop.f32.mrf.mxu3 }
 0x248   : > { %v1644_v63 = vpop.f32.mrf.mxu1 }
 0x249   : > { %v2282_v38 = vadd.f32 %v2253_v8, %v1924_v34  ;;  %v1671_v4 = vadd.f32 %v1644_v63, %v4588_v45 }
 0x24a   : > { %v2455_v26 = vpop.f32.mrf.mxu0 }
 0x24b   : > { %v2481_v54 = vadd.f32 %v2452_v2, %v2282_v38 }
 0x24d   : > { %2505 = vst [vmem:[%s4612_s20 + $0xa8] sm:$0xff] %v2481_v54  ;;  %v2914_v32 = vmul.f32 %v3749_v33, %v2481_v54 }
 0x24e   : > { %v1898_v21 = vpop.f32.mrf.mxu2 }
 0x24f   : > { %v2968_v61 = vmul.f32 %v2914_v32, %v2481_v54  ;;  %v1925_v39 = vadd.f32 %v1898_v21, %v1671_v4  ;;  %v2256_v1 = vpop.f32.mrf.mxu3  ;;  %v2937_v46 = vadd.f32 %v2936_v48, %v2914_v32 }
 0x250   : > { %v1646_v11 = vpop.f32.mrf.mxu1 }
 0x251   : > { %v2991_v17 = vadd.f32 %v2990_v7, %v2968_v61  ;;  %v2283_v47 = vadd.f32 %v2256_v1, %v1925_v39  ;;  %v1672_v3 = vadd.f32 %v1646_v11, %v4599_v25 }
 0x252   : > { %v2457_v37 = vpop.f32.mrf.mxu0 }
 0x253   : > { %v2482_v57 = vadd.f32 %v2455_v26, %v2283_v47 }
 0x255   : > { %2506 = vst [vmem:[%s4612_s20 + $0xb0] sm:$0xff] %v2482_v57  ;;  %v2938_v28 = vadd.f32 %v2937_v46, %v2482_v57  ;;  %v2969_v19 = vmul.f32 %v2482_v57, %v2482_v57 }
 0x256   : > { %v1900_v45 = vpop.f32.mrf.mxu2 }
 0x257   : > { %v2992_v36 = vadd.f32 %v2991_v17, %v2969_v19  ;;  %v1926_v0 = vadd.f32 %v1900_v45, %v1672_v3  ;;  %v2258_v10 = vpop.f32.mrf.mxu3 }
 0x259   : > { %v2284_v9 = vadd.f32 %v2258_v10, %v1926_v0 }
 0x25b   : > { %v2483_v51 = vadd.f32 %v2457_v37, %v2284_v9 }
 0x25d   : > { %2507 = vst [vmem:[%s4612_s20 + $0xb8] sm:$0xff] %v2483_v51  ;;  %v2916_v23 = vmul.f32 %v3750_v53, %v2483_v51 }
 0x25f   : > { %v2939_v14 = vadd.f32 %v2938_v28, %v2916_v23  ;;  %v2970_v58 = vmul.f32 %v2916_v23, %v2483_v51 }
 0x261   : > { %v2940_v31 = vrot.slane %v2939_v14, 4  ;;  %v2993_v35 = vadd.f32 %v2992_v36, %v2970_v58 }
 0x263   : > { %v2941_v55 = vadd.f32 %v2940_v31, %v2939_v14  ;;  %v2994_v59 = vrot.slane %v2993_v35, 4 }
 0x265   : > { %v2942_v25 = vrot.slane %v2941_v55, 2  ;;  %v2995_v43 = vadd.f32 %v2994_v59, %v2993_v35 }
 0x267   : > { %v2943_v27 = vadd.f32 %v2942_v25, %v2941_v55  ;;  %v2996_v40 = vrot.slane %v2995_v43, 2 }
 0x269   : > { %v2944_v12 = vrot.slane %v2943_v27, 1  ;;  %v2997_v50 = vadd.f32 %v2996_v40, %v2995_v43 }
 0x26b   : > { %v2945_v30 = vadd.f32 %v2944_v12, %v2943_v27  ;;  %v2998_v6 = vrot.slane %v2997_v50, 1 }
 0x26d   : > { %2946 = vst [vmem:[%s181_s23] sm:$0x1] %v2945_v30  ;;  %v2999_v49 = vadd.f32 %v2998_v6, %v2997_v50 }
 0x26f   : > { %3000 = vst [vmem:[%s181_s23 + $0x1] sm:$0x1] %v2999_v49 }
 0x270 PF: > { %s14_s12 = sadd.s32 1, %s3946_s12  }
 0x271   : > { %p11_p4 = scmp.ge.s32.totalorder %s14_s12, 4  }
 0x273   :  { %13 = sbr.rel (!%p11_p4) target bundleno = 1 (0x1), region = 78 }

</bundles_post_ra>
